<compile_context>
chip_gen: v6e
topology: v6e:2x2x1
jax: 0.10.0
libtpu: 0.0.40
codegen_flags: <defaults>
</compile_context>

<pallas_src>
import functools

import jax
import jax.numpy as jnp
import numpy as np
from jax.experimental import pallas as pl
from jax.experimental.pallas import tpu as pltpu


def _round_up(v, m):
    return ((v + m - 1) // m) * m


# ---------------------------------------------------------------- kernel ----
def _conv_ffn_kernel(x_ref, w1_ref, b1_ref, wdw_ref, bdw_ref, w2_ref, b2_ref,
                     o_ref, h_ref, *, level_shapes, approximate_gelu):
    """One batch row: per-level [fc1 -> 3x3 depthwise conv -> GELU -> fc2].

    x_ref   : (1, N, Cin)         bf16
    w1_ref  : (Cin, hidden)       bf16
    b1_ref  : (1, hidden)         f32
    wdw_ref : (9, 1, hidden)      f32   (3x3 taps, row-major)
    bdw_ref : (1, hidden)         f32
    w2_ref  : (hidden, Cout)      bf16
    b2_ref  : (1, Cout)           f32
    o_ref   : (1, N, Cout)        f32
    h_ref   : (max_rows, hidden)  f32   VMEM scratch reused by all 3 levels
    """
    f32 = jnp.float32
    hidden = w1_ref.shape[1]

    # Hoisted: loaded once per grid step, reused by every level / tap.
    w1 = w1_ref[...]
    b1 = b1_ref[...]
    taps = wdw_ref[...]                                            # (9, 1, hidden)
    b_dw = bdw_ref[...]
    w2 = w2_ref[...]
    b2 = b2_ref[...]

    off = 0
    for hh, ww in level_shapes:
        t = hh * ww
        pad = _round_up(ww + 1, 8)          # halo rows, multiple of 8 (aligned)

        # Zero only the halo rows (2*pad), not a whole padded image.
        h_ref[0:pad, :] = jnp.zeros((pad, hidden), f32)
        h_ref[pad + t:pad + t + pad, :] = jnp.zeros((pad, hidden), f32)

        # fc1 for this level's tokens, written straight into the scratch interior
        # (bf16 operands on the MXU, f32 accumulation).
        x_lvl = x_ref[0, off:off + t, :]                           # (t, Cin) bf16
        h_ref[pad:pad + t, :] = (
            jnp.dot(x_lvl, w1, preferred_element_type=f32) + b1)

        # Pre-shifted (+-1 column) views of the haloed buffer, masks pre-applied.
        # These are the only 2 misaligned slices / masks of the level.
        ext = t + 2 * ww
        zL = h_ref[pad - ww - 1:pad - ww - 1 + ext, :]             # reads token-1
        zR = h_ref[pad - ww + 1:pad - ww + 1 + ext, :]             # reads token+1
        colk = jax.lax.broadcasted_iota(jnp.int32, (ext, 1), 0) % ww
        zL = jnp.where(colk != 0, zL, 0.0)                         # x-1 >= 0
        zR = jnp.where(colk != ww - 1, zR, 0.0)                    # x+1 <  ww

        # 9-tap depthwise conv: init from the aligned, unmasked center tap.
        acc = h_ref[pad:pad + t, :] * taps[4]
        for dy in (-1, 0, 1):
            base = (dy + 1) * ww
            if dy != 0:                                            # dx = 0 taps
                acc = acc + h_ref[pad + dy * ww:pad + dy * ww + t, :] * taps[(dy + 1) * 3 + 1]
            acc = acc + zL[base:base + t, :] * taps[(dy + 1) * 3 + 0]   # dx = -1
            acc = acc + zR[base:base + t, :] * taps[(dy + 1) * 3 + 2]   # dx = +1

        # GELU (tanh approx -> EUP slot by default; exact erf via flag) + fc2.
        g = jax.nn.gelu(acc + b_dw, approximate=approximate_gelu)
        out = jnp.dot(g.astype(jnp.bfloat16), w2,
                      preferred_element_type=f32) + b2             # (t, Cout)
        o_ref[0, off:off + t, :] = out.astype(o_ref.dtype)
        off += t


# ---------------------------------------------------------------- wrapper ---
def conv_ffn_forward(x, H, W, params, *, approximate_gelu=True):
    """x: (B, N, Cin) with N = 21 * (H*W // 4). Returns (B, N, Cout)."""
    B, N, Cin = x.shape
    assert H % 2 == 0 and W % 2 == 0, "H and W must be even"
    n = (H * W) // 4
    assert N == 21 * n, f"N={N} must equal 21*(H*W//4)={21 * n}"

    hidden = params["w1"].shape[1]
    Cout = params["w2"].shape[1]
    level_shapes = ((2 * H, 2 * W), (H, W), (H // 2, W // 2))
    max_rows = max(hh * ww + 2 * _round_up(ww + 1, 8) for hh, ww in level_shapes)

    out_dtype = x.dtype

    # Activations DMA'd as bf16 (half the HBM bytes); weights pre-cast once (tiny,
    # resident in VMEM for the whole grid).
    x_bf = x.astype(jnp.bfloat16)
    w1 = params["w1"].astype(jnp.bfloat16)                           # (Cin, hidden)
    w2 = params["w2"].astype(jnp.bfloat16)                           # (hidden, Cout)
    b1 = params["b1"].reshape(1, hidden).astype(jnp.float32)
    b2 = params["b2"].reshape(1, Cout).astype(jnp.float32)
    w_dw = params["w_dw"].reshape(9, 1, hidden).astype(jnp.float32)  # (3,3,h) -> (9,1,h)
    b_dw = params["b_dw"].reshape(1, hidden).astype(jnp.float32)

    kernel = functools.partial(_conv_ffn_kernel, level_shapes=level_shapes,
                               approximate_gelu=approximate_gelu)

    return pl.pallas_call(
        kernel,
        grid_spec=pltpu.PrefetchScalarGridSpec(
            num_scalar_prefetch=0,
            grid=(B,),
            in_specs=[
                pl.BlockSpec((1, N, Cin), lambda b: (b, 0, 0)),      # x, one batch row
                pl.BlockSpec((Cin, hidden), lambda b: (0, 0)),       # w1 (resident)
                pl.BlockSpec((1, hidden), lambda b: (0, 0)),         # b1
                pl.BlockSpec((9, 1, hidden), lambda b: (0, 0, 0)),   # w_dw
                pl.BlockSpec((1, hidden), lambda b: (0, 0)),         # b_dw
                pl.BlockSpec((hidden, Cout), lambda b: (0, 0)),      # w2
                pl.BlockSpec((1, Cout), lambda b: (0, 0)),           # b2
            ],
            out_specs=pl.BlockSpec((1, N, Cout), lambda b: (b, 0, 0)),
            scratch_shapes=[pltpu.VMEM((max_rows, hidden), jnp.float32)],
        ),
        out_shape=jax.ShapeDtypeStruct((B, N, Cout), out_dtype),
        compiler_params=pltpu.CompilerParams(
            dimension_semantics=("parallel",),        # batch sharded across TCs (v7x)
            vmem_limit_bytes=48 * 1024 * 1024,        # sweep per generation at prod sizes
        ),
    )(x_bf, w1, b1, w_dw, b_dw, w2, b2)


# -------------------------------------------------------- pure-JAX reference
def conv_ffn_reference(x, H, W, params):
    B, N, Cin = x.shape
    hidden = params["w1"].shape[1]
    n = N // 21
    h = x @ params["w1"] + params["b1"]
    level_shapes = [(2 * H, 2 * W), (H, W), (H // 2, W // 2)]
    bounds = [0, 16 * n, 20 * n, 21 * n]
    w_dw = params["w_dw"].reshape(3, 3, 1, hidden)                   # HWIO, depthwise
    outs = []
    for (hh, ww), s0, s1 in zip(level_shapes, bounds[:-1], bounds[1:]):
        xl = h[:, s0:s1, :].reshape(B, hh, ww, hidden)
        yl = jax.lax.conv_general_dilated(
            xl, w_dw, window_strides=(1, 1), padding="SAME",
            dimension_numbers=("NHWC", "HWIO", "NHWC"),
            feature_group_count=hidden,
        ) + params["b_dw"]
        outs.append(yl.reshape(B, hh * ww, hidden))
    y = jnp.concatenate(outs, axis=1)
    y = jax.nn.gelu(y, approximate=False)                            # exact nn.GELU()
    return y @ params["w2"] + params["b2"]


# ------------------------------------------------------------------- main ---
if __name__ == "__main__":
    B, H, W = 2, 8, 8
    in_features, hidden_features, out_features = 32, 64, 32
    n = (H * W) // 4
    N = 21 * n  # 336 tokens: 16n @ (2H,2W) + 4n @ (H,W) + n @ (H/2,W/2)

    key = jax.random.PRNGKey(0)
    k_x, k_w1, k_b1, k_wd, k_bd, k_w2, k_b2 = jax.random.split(key, 7)
    params = {
        "w1": jax.random.normal(k_w1, (in_features, hidden_features), jnp.float32) * 0.05,
        "b1": jax.random.normal(k_b1, (hidden_features,), jnp.float32) * 0.02,
        # depthwise conv: groups=hidden, kernel 3x3 -> stored as (3, 3, hidden)
        "w_dw": jax.random.normal(k_wd, (3, 3, hidden_features), jnp.float32) * 0.1,
        "b_dw": jax.random.normal(k_bd, (hidden_features,), jnp.float32) * 0.02,
        "w2": jax.random.normal(k_w2, (hidden_features, out_features), jnp.float32) * 0.05,
        "b2": jax.random.normal(k_b2, (out_features,), jnp.float32) * 0.02,
    }
    x = jax.random.normal(k_x, (B, N, in_features), jnp.float32)

    out = jax.block_until_ready(conv_ffn_forward(x, H, W, params))
    ref = jax.block_until_ready(conv_ffn_reference(x, H, W, params))

    # bf16 MXU operands + bf16 activation DMA + tanh-GELU vs all-f32 exact reference.
    np.testing.assert_allclose(np.asarray(out), np.asarray(ref), rtol=1e-2, atol=1e-2)

    print("KERNEL_OK")
</pallas_src>

<mosaic_0001>
module attributes {stable_mosaic.version = 11 : i64} {
  func.func @_conv_ffn_kernel(%arg0: i32, %arg1: memref<1x336x32xbf16, #tpu.memory_space<vmem>>, %arg2: memref<32x64xbf16, #tpu.memory_space<vmem>>, %arg3: memref<1x64xf32, #tpu.memory_space<vmem>>, %arg4: memref<9x1x64xf32, #tpu.memory_space<vmem>>, %arg5: memref<1x64xf32, #tpu.memory_space<vmem>>, %arg6: memref<64x32xbf16, #tpu.memory_space<vmem>>, %arg7: memref<1x32xf32, #tpu.memory_space<vmem>>, %arg8: memref<1x336x32xf32, #tpu.memory_space<vmem>>, %arg9: memref<304x64xf32, #tpu.memory_space<vmem>>) attributes {dimension_semantics = [#tpu.dimension_semantics<parallel>], iteration_bounds = array<i64: 2>, scalar_prefetch = 0 : i64, scratch_operands = 1 : i64, tpu.core_type = #tpu.core_type<tc>, window_params = [{transform_indices = @transform_0, window_bounds = array<i64: 1, 336, 32>}, {pipeline_mode = #tpu.pipeline_mode<synchronous>, transform_indices = @transform_1, window_bounds = array<i64: 32, 64>}, {pipeline_mode = #tpu.pipeline_mode<synchronous>, transform_indices = @transform_2, window_bounds = array<i64: 1, 64>}, {pipeline_mode = #tpu.pipeline_mode<synchronous>, transform_indices = @transform_3, window_bounds = array<i64: 9, 1, 64>}, {pipeline_mode = #tpu.pipeline_mode<synchronous>, transform_indices = @transform_4, window_bounds = array<i64: 1, 64>}, {pipeline_mode = #tpu.pipeline_mode<synchronous>, transform_indices = @transform_5, window_bounds = array<i64: 64, 32>}, {pipeline_mode = #tpu.pipeline_mode<synchronous>, transform_indices = @transform_6, window_bounds = array<i64: 1, 32>}, {transform_indices = @transform_7, window_bounds = array<i64: 1, 336, 32>}]} {
    %c0 = arith.constant 0 : index
    %c0_0 = arith.constant 0 : index
    %0 = vector.load %arg2[%c0, %c0_0] : memref<32x64xbf16, #tpu.memory_space<vmem>>, vector<32x64xbf16>
    %c0_1 = arith.constant 0 : index
    %c0_2 = arith.constant 0 : index
    %1 = vector.load %arg3[%c0_1, %c0_2] : memref<1x64xf32, #tpu.memory_space<vmem>>, vector<1x64xf32>
    %c0_3 = arith.constant 0 : index
    %c0_4 = arith.constant 0 : index
    %c0_5 = arith.constant 0 : index
    %2 = vector.load %arg4[%c0_3, %c0_4, %c0_5] : memref<9x1x64xf32, #tpu.memory_space<vmem>>, vector<9x1x64xf32>
    %c0_6 = arith.constant 0 : index
    %c0_7 = arith.constant 0 : index
    %3 = vector.load %arg5[%c0_6, %c0_7] : memref<1x64xf32, #tpu.memory_space<vmem>>, vector<1x64xf32>
    %c0_8 = arith.constant 0 : index
    %c0_9 = arith.constant 0 : index
    %4 = vector.load %arg6[%c0_8, %c0_9] : memref<64x32xbf16, #tpu.memory_space<vmem>>, vector<64x32xbf16>
    %c0_10 = arith.constant 0 : index
    %c0_11 = arith.constant 0 : index
    %5 = vector.load %arg7[%c0_10, %c0_11] : memref<1x32xf32, #tpu.memory_space<vmem>>, vector<1x32xf32>
    %cst = arith.constant 0.000000e+00 : f32
    %6 = vector.broadcast %cst : f32 to vector<24x64xf32>
    %c0_12 = arith.constant 0 : index
    %c0_13 = arith.constant 0 : index
    %7 = vector.load %arg9[%c0_12, %c0_13] : memref<304x64xf32, #tpu.memory_space<vmem>>, vector<24x64xf32>
    tpu.vector_store %arg9[%c0_12, %c0_13], %6 {strides = array<i32>} : memref<304x64xf32, #tpu.memory_space<vmem>>, vector<24x64xf32>,
    %cst_14 = arith.constant 0.000000e+00 : f32
    %8 = vector.broadcast %cst_14 : f32 to vector<24x64xf32>
    %c280 = arith.constant 280 : index
    %c0_15 = arith.constant 0 : index
    %9 = vector.load %arg9[%c280, %c0_15] : memref<304x64xf32, #tpu.memory_space<vmem>>, vector<24x64xf32>
    tpu.vector_store %arg9[%c280, %c0_15], %8 {strides = array<i32>} : memref<304x64xf32, #tpu.memory_space<vmem>>, vector<24x64xf32>,
    %c0_16 = arith.constant 0 : index
    %c0_17 = arith.constant 0 : index
    %c0_18 = arith.constant 0 : index
    %10 = vector.load %arg1[%c0_16, %c0_17, %c0_18] : memref<1x336x32xbf16, #tpu.memory_space<vmem>>, vector<1x256x32xbf16>
    %11 = vector.shape_cast %10 : vector<1x256x32xbf16> to vector<256x32xbf16>
    %cst_19 = arith.constant dense<0.000000e+00> : vector<256x64xf32>
    %12 = tpu.matmul %11, %0, %cst_19 {dimension_numbers = #tpu.dot_dimension_numbers<[1], [0], [0], [1], [0, 0, 1, 1], [], []>} : vector<256x32xbf16>, vector<32x64xbf16>, vector<256x64xf32> -> vector<256x64xf32>
    %13 = vector.broadcast %1 : vector<1x64xf32> to vector<256x64xf32>
    %14 = arith.addf %12, %13 : vector<256x64xf32>
    %c24 = arith.constant 24 : index
    %c0_20 = arith.constant 0 : index
    %15 = vector.load %arg9[%c24, %c0_20] : memref<304x64xf32, #tpu.memory_space<vmem>>, vector<256x64xf32>
    tpu.vector_store %arg9[%c24, %c0_20], %14 {strides = array<i32>} : memref<304x64xf32, #tpu.memory_space<vmem>>, vector<256x64xf32>,
    %c7 = arith.constant 7 : index
    %c0_21 = arith.constant 0 : index
    %16 = vector.load %arg9[%c7, %c0_21] : memref<304x64xf32, #tpu.memory_space<vmem>>, vector<288x64xf32>
    %c9 = arith.constant 9 : index
    %c0_22 = arith.constant 0 : index
    %17 = vector.load %arg9[%c9, %c0_22] : memref<304x64xf32, #tpu.memory_space<vmem>>, vector<288x64xf32>
    %18 = tpu.iota {dimensions = array<i32: 0>} : vector<288x1xi32>
    %c16_i32 = arith.constant 16 : i32
    %c0_i32 = arith.constant 0 : i32
    %19 = arith.cmpi eq, %c16_i32, %c0_i32 : i32
    %c1_i32 = arith.constant 1 : i32
    %20 = arith.select %19, %c1_i32, %c16_i32 : i32
    %21 = vector.broadcast %20 : i32 to vector<288x1xi32>
    %22 = arith.remsi %18, %21 : vector<288x1xi32>
    %c0_i32_23 = arith.constant 0 : i32
    %23 = vector.broadcast %c0_i32_23 : i32 to vector<288x1xi32>
    %24 = arith.cmpi ne, %22, %23 : vector<288x1xi32>
    %c0_i32_24 = arith.constant 0 : i32
    %25 = vector.broadcast %c0_i32_24 : i32 to vector<288x1xi32>
    %26 = arith.cmpi slt, %22, %25 : vector<288x1xi32>
    %c0_i32_25 = arith.constant 0 : i32
    %27 = arith.cmpi slt, %20, %c0_i32_25 : i32
    %28 = vector.broadcast %27 : i1 to vector<288x1xi1>
    %29 = vector.broadcast %28 : vector<288x1xi1> to vector<288x1xi1>
    %30 = arith.xori %26, %29 : vector<288x1xi1>
    %31 = arith.andi %30, %24 : vector<288x1xi1>
    %32 = vector.broadcast %20 : i32 to vector<288x1xi32>
    %33 = arith.addi %22, %32 : vector<288x1xi32>
    %34 = arith.select %31, %33, %22 : vector<288x1xi1>, vector<288x1xi32>
    %c0_i32_26 = arith.constant 0 : i32
    %35 = vector.broadcast %c0_i32_26 : i32 to vector<288x1xi32>
    %36 = arith.cmpi ne, %34, %35 : vector<288x1xi32>
    %cst_27 = arith.constant 0.000000e+00 : f32
    %37 = vector.shape_cast %36 : vector<288x1xi1> to vector<288x1xi1>
    %38 = vector.broadcast %37 : vector<288x1xi1> to vector<288x64xi1>
    %39 = vector.broadcast %cst_27 : f32 to vector<288x64xf32>
    %40 = arith.select %38, %16, %39 : vector<288x64xi1>, vector<288x64xf32>
    %c15_i32 = arith.constant 15 : i32
    %41 = vector.broadcast %c15_i32 : i32 to vector<288x1xi32>
    %42 = arith.cmpi ne, %34, %41 : vector<288x1xi32>
    %cst_28 = arith.constant 0.000000e+00 : f32
    %43 = vector.shape_cast %42 : vector<288x1xi1> to vector<288x1xi1>
    %44 = vector.broadcast %43 : vector<288x1xi1> to vector<288x64xi1>
    %45 = vector.broadcast %cst_28 : f32 to vector<288x64xf32>
    %46 = arith.select %44, %17, %45 : vector<288x64xi1>, vector<288x64xf32>
    %c24_29 = arith.constant 24 : index
    %c0_30 = arith.constant 0 : index
    %47 = vector.load %arg9[%c24_29, %c0_30] : memref<304x64xf32, #tpu.memory_space<vmem>>, vector<256x64xf32>
    %48 = vector.extract_strided_slice %2 {offsets = [4, 0, 0], sizes = [1, 1, 64], strides = [1, 1, 1]} : vector<9x1x64xf32> to vector<1x1x64xf32>
    %49 = vector.shape_cast %48 : vector<1x1x64xf32> to vector<1x64xf32>
    %50 = vector.broadcast %49 : vector<1x64xf32> to vector<256x64xf32>
    %51 = arith.mulf %47, %50 : vector<256x64xf32>
    %c8 = arith.constant 8 : index
    %c0_31 = arith.constant 0 : index
    %52 = vector.load %arg9[%c8, %c0_31] : memref<304x64xf32, #tpu.memory_space<vmem>>, vector<256x64xf32>
    %53 = vector.extract_strided_slice %2 {offsets = [1, 0, 0], sizes = [1, 1, 64], strides = [1, 1, 1]} : vector<9x1x64xf32> to vector<1x1x64xf32>
    %54 = vector.shape_cast %53 : vector<1x1x64xf32> to vector<1x64xf32>
    %55 = vector.broadcast %54 : vector<1x64xf32> to vector<256x64xf32>
    %56 = arith.mulf %52, %55 : vector<256x64xf32>
    %57 = arith.addf %51, %56 : vector<256x64xf32>
    %58 = vector.extract_strided_slice %40 {offsets = [0, 0], sizes = [256, 64], strides = [1, 1]} : vector<288x64xf32> to vector<256x64xf32>
    %59 = vector.extract_strided_slice %2 {offsets = [0, 0, 0], sizes = [1, 1, 64], strides = [1, 1, 1]} : vector<9x1x64xf32> to vector<1x1x64xf32>
    %60 = vector.shape_cast %59 : vector<1x1x64xf32> to vector<1x64xf32>
    %61 = vector.broadcast %60 : vector<1x64xf32> to vector<256x64xf32>
    %62 = arith.mulf %58, %61 : vector<256x64xf32>
    %63 = arith.addf %57, %62 : vector<256x64xf32>
    %64 = vector.extract_strided_slice %46 {offsets = [0, 0], sizes = [256, 64], strides = [1, 1]} : vector<288x64xf32> to vector<256x64xf32>
    %65 = vector.extract_strided_slice %2 {offsets = [2, 0, 0], sizes = [1, 1, 64], strides = [1, 1, 1]} : vector<9x1x64xf32> to vector<1x1x64xf32>
    %66 = vector.shape_cast %65 : vector<1x1x64xf32> to vector<1x64xf32>
    %67 = vector.broadcast %66 : vector<1x64xf32> to vector<256x64xf32>
    %68 = arith.mulf %64, %67 : vector<256x64xf32>
    %69 = arith.addf %63, %68 : vector<256x64xf32>
    %70 = vector.extract_strided_slice %40 {offsets = [16, 0], sizes = [256, 64], strides = [1, 1]} : vector<288x64xf32> to vector<256x64xf32>
    %71 = vector.extract_strided_slice %2 {offsets = [3, 0, 0], sizes = [1, 1, 64], strides = [1, 1, 1]} : vector<9x1x64xf32> to vector<1x1x64xf32>
    %72 = vector.shape_cast %71 : vector<1x1x64xf32> to vector<1x64xf32>
    %73 = vector.broadcast %72 : vector<1x64xf32> to vector<256x64xf32>
    %74 = arith.mulf %70, %73 : vector<256x64xf32>
    %75 = arith.addf %69, %74 : vector<256x64xf32>
    %76 = vector.extract_strided_slice %46 {offsets = [16, 0], sizes = [256, 64], strides = [1, 1]} : vector<288x64xf32> to vector<256x64xf32>
    %77 = vector.extract_strided_slice %2 {offsets = [5, 0, 0], sizes = [1, 1, 64], strides = [1, 1, 1]} : vector<9x1x64xf32> to vector<1x1x64xf32>
    %78 = vector.shape_cast %77 : vector<1x1x64xf32> to vector<1x64xf32>
    %79 = vector.broadcast %78 : vector<1x64xf32> to vector<256x64xf32>
    %80 = arith.mulf %76, %79 : vector<256x64xf32>
    %81 = arith.addf %75, %80 : vector<256x64xf32>
    %c40 = arith.constant 40 : index
    %c0_32 = arith.constant 0 : index
    %82 = vector.load %arg9[%c40, %c0_32] : memref<304x64xf32, #tpu.memory_space<vmem>>, vector<256x64xf32>
    %83 = vector.extract_strided_slice %2 {offsets = [7, 0, 0], sizes = [1, 1, 64], strides = [1, 1, 1]} : vector<9x1x64xf32> to vector<1x1x64xf32>
    %84 = vector.shape_cast %83 : vector<1x1x64xf32> to vector<1x64xf32>
    %85 = vector.broadcast %84 : vector<1x64xf32> to vector<256x64xf32>
    %86 = arith.mulf %82, %85 : vector<256x64xf32>
    %87 = arith.addf %81, %86 : vector<256x64xf32>
    %88 = vector.extract_strided_slice %40 {offsets = [32, 0], sizes = [256, 64], strides = [1, 1]} : vector<288x64xf32> to vector<256x64xf32>
    %89 = vector.extract_strided_slice %2 {offsets = [6, 0, 0], sizes = [1, 1, 64], strides = [1, 1, 1]} : vector<9x1x64xf32> to vector<1x1x64xf32>
    %90 = vector.shape_cast %89 : vector<1x1x64xf32> to vector<1x64xf32>
    %91 = vector.broadcast %90 : vector<1x64xf32> to vector<256x64xf32>
    %92 = arith.mulf %88, %91 : vector<256x64xf32>
    %93 = arith.addf %87, %92 : vector<256x64xf32>
    %94 = vector.extract_strided_slice %46 {offsets = [32, 0], sizes = [256, 64], strides = [1, 1]} : vector<288x64xf32> to vector<256x64xf32>
    %95 = vector.extract_strided_slice %2 {offsets = [8, 0, 0], sizes = [1, 1, 64], strides = [1, 1, 1]} : vector<9x1x64xf32> to vector<1x1x64xf32>
    %96 = vector.shape_cast %95 : vector<1x1x64xf32> to vector<1x64xf32>
    %97 = vector.broadcast %96 : vector<1x64xf32> to vector<256x64xf32>
    %98 = arith.mulf %94, %97 : vector<256x64xf32>
    %99 = arith.addf %93, %98 : vector<256x64xf32>
    %100 = vector.broadcast %3 : vector<1x64xf32> to vector<256x64xf32>
    %101 = arith.addf %99, %100 : vector<256x64xf32>
    %102 = arith.mulf %101, %101 : vector<256x64xf32>
    %103 = arith.mulf %101, %102 : vector<256x64xf32>
    %cst_33 = arith.constant 4.471500e-02 : f32
    %104 = vector.broadcast %cst_33 : f32 to vector<256x64xf32>
    %105 = arith.mulf %104, %103 : vector<256x64xf32>
    %106 = arith.addf %101, %105 : vector<256x64xf32>
    %cst_34 = arith.constant 0.797884583 : f32
    %107 = vector.broadcast %cst_34 : f32 to vector<256x64xf32>
    %108 = arith.mulf %107, %106 : vector<256x64xf32>
    %109 = math.tanh %108 : vector<256x64xf32>
    %cst_35 = arith.constant 1.000000e+00 : f32
    %110 = vector.broadcast %cst_35 : f32 to vector<256x64xf32>
    %111 = arith.addf %110, %109 : vector<256x64xf32>
    %cst_36 = arith.constant 5.000000e-01 : f32
    %112 = vector.broadcast %cst_36 : f32 to vector<256x64xf32>
    %113 = arith.mulf %112, %111 : vector<256x64xf32>
    %114 = arith.mulf %101, %113 : vector<256x64xf32>
    %115 = arith.truncf %114 : vector<256x64xf32> to vector<256x64xbf16>
    %cst_37 = arith.constant dense<0.000000e+00> : vector<256x32xf32>
    %116 = tpu.matmul %115, %4, %cst_37 {dimension_numbers = #tpu.dot_dimension_numbers<[1], [0], [0], [1], [0, 0, 1, 1], [], []>} : vector<256x64xbf16>, vector<64x32xbf16>, vector<256x32xf32> -> vector<256x32xf32>
    %117 = vector.broadcast %5 : vector<1x32xf32> to vector<256x32xf32>
    %118 = arith.addf %116, %117 : vector<256x32xf32>
    %c0_38 = arith.constant 0 : index
    %c0_39 = arith.constant 0 : index
    %c0_40 = arith.constant 0 : index
    %119 = vector.load %arg8[%c0_38, %c0_39, %c0_40] : memref<1x336x32xf32, #tpu.memory_space<vmem>>, vector<1x256x32xf32>
    %120 = vector.shape_cast %119 : vector<1x256x32xf32> to vector<256x32xf32>
    %121 = vector.shape_cast %118 : vector<256x32xf32> to vector<1x256x32xf32>
    tpu.vector_store %arg8[%c0_38, %c0_39, %c0_40], %121 {strides = array<i32>} : memref<1x336x32xf32, #tpu.memory_space<vmem>>, vector<1x256x32xf32>,
    %cst_41 = arith.constant 0.000000e+00 : f32
    %122 = vector.broadcast %cst_41 : f32 to vector<16x64xf32>
    %c0_42 = arith.constant 0 : index
    %c0_43 = arith.constant 0 : index
    %123 = vector.load %arg9[%c0_42, %c0_43] : memref<304x64xf32, #tpu.memory_space<vmem>>, vector<16x64xf32>
    tpu.vector_store %arg9[%c0_42, %c0_43], %122 {strides = array<i32>} : memref<304x64xf32, #tpu.memory_space<vmem>>, vector<16x64xf32>,
    %cst_44 = arith.constant 0.000000e+00 : f32
    %124 = vector.broadcast %cst_44 : f32 to vector<16x64xf32>
    %c80 = arith.constant 80 : index
    %c0_45 = arith.constant 0 : index
    %125 = vector.load %arg9[%c80, %c0_45] : memref<304x64xf32, #tpu.memory_space<vmem>>, vector<16x64xf32>
    tpu.vector_store %arg9[%c80, %c0_45], %124 {strides = array<i32>} : memref<304x64xf32, #tpu.memory_space<vmem>>, vector<16x64xf32>,
    %c0_46 = arith.constant 0 : index
    %c256 = arith.constant 256 : index
    %c0_47 = arith.constant 0 : index
    %126 = vector.load %arg1[%c0_46, %c256, %c0_47] : memref<1x336x32xbf16, #tpu.memory_space<vmem>>, vector<1x64x32xbf16>
    %127 = vector.shape_cast %126 : vector<1x64x32xbf16> to vector<64x32xbf16>
    %cst_48 = arith.constant dense<0.000000e+00> : vector<64x64xf32>
    %128 = tpu.matmul %127, %0, %cst_48 {dimension_numbers = #tpu.dot_dimension_numbers<[1], [0], [0], [1], [0, 0, 1, 1], [], []>} : vector<64x32xbf16>, vector<32x64xbf16>, vector<64x64xf32> -> vector<64x64xf32>
    %129 = vector.broadcast %1 : vector<1x64xf32> to vector<64x64xf32>
    %130 = arith.addf %128, %129 : vector<64x64xf32>
    %c16 = arith.constant 16 : index
    %c0_49 = arith.constant 0 : index
    %131 = vector.load %arg9[%c16, %c0_49] : memref<304x64xf32, #tpu.memory_space<vmem>>, vector<64x64xf32>
    tpu.vector_store %arg9[%c16, %c0_49], %130 {strides = array<i32>} : memref<304x64xf32, #tpu.memory_space<vmem>>, vector<64x64xf32>,
    %c7_50 = arith.constant 7 : index
    %c0_51 = arith.constant 0 : index
    %132 = vector.load %arg9[%c7_50, %c0_51] : memref<304x64xf32, #tpu.memory_space<vmem>>, vector<80x64xf32>
    %c9_52 = arith.constant 9 : index
    %c0_53 = arith.constant 0 : index
    %133 = vector.load %arg9[%c9_52, %c0_53] : memref<304x64xf32, #tpu.memory_space<vmem>>, vector<80x64xf32>
    %134 = tpu.iota {dimensions = array<i32: 0>} : vector<80x1xi32>
    %c8_i32 = arith.constant 8 : i32
    %c0_i32_54 = arith.constant 0 : i32
    %135 = arith.cmpi eq, %c8_i32, %c0_i32_54 : i32
    %c1_i32_55 = arith.constant 1 : i32
    %136 = arith.select %135, %c1_i32_55, %c8_i32 : i32
    %137 = vector.broadcast %136 : i32 to vector<80x1xi32>
    %138 = arith.remsi %134, %137 : vector<80x1xi32>
    %c0_i32_56 = arith.constant 0 : i32
    %139 = vector.broadcast %c0_i32_56 : i32 to vector<80x1xi32>
    %140 = arith.cmpi ne, %138, %139 : vector<80x1xi32>
    %c0_i32_57 = arith.constant 0 : i32
    %141 = vector.broadcast %c0_i32_57 : i32 to vector<80x1xi32>
    %142 = arith.cmpi slt, %138, %141 : vector<80x1xi32>
    %c0_i32_58 = arith.constant 0 : i32
    %143 = arith.cmpi slt, %136, %c0_i32_58 : i32
    %144 = vector.broadcast %143 : i1 to vector<80x1xi1>
    %145 = vector.broadcast %144 : vector<80x1xi1> to vector<80x1xi1>
    %146 = arith.xori %142, %145 : vector<80x1xi1>
    %147 = arith.andi %146, %140 : vector<80x1xi1>
    %148 = vector.broadcast %136 : i32 to vector<80x1xi32>
    %149 = arith.addi %138, %148 : vector<80x1xi32>
    %150 = arith.select %147, %149, %138 : vector<80x1xi1>, vector<80x1xi32>
    %c0_i32_59 = arith.constant 0 : i32
    %151 = vector.broadcast %c0_i32_59 : i32 to vector<80x1xi32>
    %152 = arith.cmpi ne, %150, %151 : vector<80x1xi32>
    %cst_60 = arith.constant 0.000000e+00 : f32
    %153 = vector.shape_cast %152 : vector<80x1xi1> to vector<80x1xi1>
    %154 = vector.broadcast %153 : vector<80x1xi1> to vector<80x64xi1>
    %155 = vector.broadcast %cst_60 : f32 to vector<80x64xf32>
    %156 = arith.select %154, %132, %155 : vector<80x64xi1>, vector<80x64xf32>
    %c7_i32 = arith.constant 7 : i32
    %157 = vector.broadcast %c7_i32 : i32 to vector<80x1xi32>
    %158 = arith.cmpi ne, %150, %157 : vector<80x1xi32>
    %cst_61 = arith.constant 0.000000e+00 : f32
    %159 = vector.shape_cast %158 : vector<80x1xi1> to vector<80x1xi1>
    %160 = vector.broadcast %159 : vector<80x1xi1> to vector<80x64xi1>
    %161 = vector.broadcast %cst_61 : f32 to vector<80x64xf32>
    %162 = arith.select %160, %133, %161 : vector<80x64xi1>, vector<80x64xf32>
    %c16_62 = arith.constant 16 : index
    %c0_63 = arith.constant 0 : index
    %163 = vector.load %arg9[%c16_62, %c0_63] : memref<304x64xf32, #tpu.memory_space<vmem>>, vector<64x64xf32>
    %164 = vector.extract_strided_slice %2 {offsets = [4, 0, 0], sizes = [1, 1, 64], strides = [1, 1, 1]} : vector<9x1x64xf32> to vector<1x1x64xf32>
    %165 = vector.shape_cast %164 : vector<1x1x64xf32> to vector<1x64xf32>
    %166 = vector.broadcast %165 : vector<1x64xf32> to vector<64x64xf32>
    %167 = arith.mulf %163, %166 : vector<64x64xf32>
    %c8_64 = arith.constant 8 : index
    %c0_65 = arith.constant 0 : index
    %168 = vector.load %arg9[%c8_64, %c0_65] : memref<304x64xf32, #tpu.memory_space<vmem>>, vector<64x64xf32>
    %169 = vector.extract_strided_slice %2 {offsets = [1, 0, 0], sizes = [1, 1, 64], strides = [1, 1, 1]} : vector<9x1x64xf32> to vector<1x1x64xf32>
    %170 = vector.shape_cast %169 : vector<1x1x64xf32> to vector<1x64xf32>
    %171 = vector.broadcast %170 : vector<1x64xf32> to vector<64x64xf32>
    %172 = arith.mulf %168, %171 : vector<64x64xf32>
    %173 = arith.addf %167, %172 : vector<64x64xf32>
    %174 = vector.extract_strided_slice %156 {offsets = [0, 0], sizes = [64, 64], strides = [1, 1]} : vector<80x64xf32> to vector<64x64xf32>
    %175 = vector.extract_strided_slice %2 {offsets = [0, 0, 0], sizes = [1, 1, 64], strides = [1, 1, 1]} : vector<9x1x64xf32> to vector<1x1x64xf32>
    %176 = vector.shape_cast %175 : vector<1x1x64xf32> to vector<1x64xf32>
    %177 = vector.broadcast %176 : vector<1x64xf32> to vector<64x64xf32>
    %178 = arith.mulf %174, %177 : vector<64x64xf32>
    %179 = arith.addf %173, %178 : vector<64x64xf32>
    %180 = vector.extract_strided_slice %162 {offsets = [0, 0], sizes = [64, 64], strides = [1, 1]} : vector<80x64xf32> to vector<64x64xf32>
    %181 = vector.extract_strided_slice %2 {offsets = [2, 0, 0], sizes = [1, 1, 64], strides = [1, 1, 1]} : vector<9x1x64xf32> to vector<1x1x64xf32>
    %182 = vector.shape_cast %181 : vector<1x1x64xf32> to vector<1x64xf32>
    %183 = vector.broadcast %182 : vector<1x64xf32> to vector<64x64xf32>
    %184 = arith.mulf %180, %183 : vector<64x64xf32>
    %185 = arith.addf %179, %184 : vector<64x64xf32>
    %186 = vector.extract_strided_slice %156 {offsets = [8, 0], sizes = [64, 64], strides = [1, 1]} : vector<80x64xf32> to vector<64x64xf32>
    %187 = vector.extract_strided_slice %2 {offsets = [3, 0, 0], sizes = [1, 1, 64], strides = [1, 1, 1]} : vector<9x1x64xf32> to vector<1x1x64xf32>
    %188 = vector.shape_cast %187 : vector<1x1x64xf32> to vector<1x64xf32>
    %189 = vector.broadcast %188 : vector<1x64xf32> to vector<64x64xf32>
    %190 = arith.mulf %186, %189 : vector<64x64xf32>
    %191 = arith.addf %185, %190 : vector<64x64xf32>
    %192 = vector.extract_strided_slice %162 {offsets = [8, 0], sizes = [64, 64], strides = [1, 1]} : vector<80x64xf32> to vector<64x64xf32>
    %193 = vector.extract_strided_slice %2 {offsets = [5, 0, 0], sizes = [1, 1, 64], strides = [1, 1, 1]} : vector<9x1x64xf32> to vector<1x1x64xf32>
    %194 = vector.shape_cast %193 : vector<1x1x64xf32> to vector<1x64xf32>
    %195 = vector.broadcast %194 : vector<1x64xf32> to vector<64x64xf32>
    %196 = arith.mulf %192, %195 : vector<64x64xf32>
    %197 = arith.addf %191, %196 : vector<64x64xf32>
    %c24_66 = arith.constant 24 : index
    %c0_67 = arith.constant 0 : index
    %198 = vector.load %arg9[%c24_66, %c0_67] : memref<304x64xf32, #tpu.memory_space<vmem>>, vector<64x64xf32>
    %199 = vector.extract_strided_slice %2 {offsets = [7, 0, 0], sizes = [1, 1, 64], strides = [1, 1, 1]} : vector<9x1x64xf32> to vector<1x1x64xf32>
    %200 = vector.shape_cast %199 : vector<1x1x64xf32> to vector<1x64xf32>
    %201 = vector.broadcast %200 : vector<1x64xf32> to vector<64x64xf32>
    %202 = arith.mulf %198, %201 : vector<64x64xf32>
    %203 = arith.addf %197, %202 : vector<64x64xf32>
    %204 = vector.extract_strided_slice %156 {offsets = [16, 0], sizes = [64, 64], strides = [1, 1]} : vector<80x64xf32> to vector<64x64xf32>
    %205 = vector.extract_strided_slice %2 {offsets = [6, 0, 0], sizes = [1, 1, 64], strides = [1, 1, 1]} : vector<9x1x64xf32> to vector<1x1x64xf32>
    %206 = vector.shape_cast %205 : vector<1x1x64xf32> to vector<1x64xf32>
    %207 = vector.broadcast %206 : vector<1x64xf32> to vector<64x64xf32>
    %208 = arith.mulf %204, %207 : vector<64x64xf32>
    %209 = arith.addf %203, %208 : vector<64x64xf32>
    %210 = vector.extract_strided_slice %162 {offsets = [16, 0], sizes = [64, 64], strides = [1, 1]} : vector<80x64xf32> to vector<64x64xf32>
    %211 = vector.extract_strided_slice %2 {offsets = [8, 0, 0], sizes = [1, 1, 64], strides = [1, 1, 1]} : vector<9x1x64xf32> to vector<1x1x64xf32>
    %212 = vector.shape_cast %211 : vector<1x1x64xf32> to vector<1x64xf32>
    %213 = vector.broadcast %212 : vector<1x64xf32> to vector<64x64xf32>
    %214 = arith.mulf %210, %213 : vector<64x64xf32>
    %215 = arith.addf %209, %214 : vector<64x64xf32>
    %216 = vector.broadcast %3 : vector<1x64xf32> to vector<64x64xf32>
    %217 = arith.addf %215, %216 : vector<64x64xf32>
    %218 = arith.mulf %217, %217 : vector<64x64xf32>
    %219 = arith.mulf %217, %218 : vector<64x64xf32>
    %cst_68 = arith.constant 4.471500e-02 : f32
    %220 = vector.broadcast %cst_68 : f32 to vector<64x64xf32>
    %221 = arith.mulf %220, %219 : vector<64x64xf32>
    %222 = arith.addf %217, %221 : vector<64x64xf32>
    %cst_69 = arith.constant 0.797884583 : f32
    %223 = vector.broadcast %cst_69 : f32 to vector<64x64xf32>
    %224 = arith.mulf %223, %222 : vector<64x64xf32>
    %225 = math.tanh %224 : vector<64x64xf32>
    %cst_70 = arith.constant 1.000000e+00 : f32
    %226 = vector.broadcast %cst_70 : f32 to vector<64x64xf32>
    %227 = arith.addf %226, %225 : vector<64x64xf32>
    %cst_71 = arith.constant 5.000000e-01 : f32
    %228 = vector.broadcast %cst_71 : f32 to vector<64x64xf32>
    %229 = arith.mulf %228, %227 : vector<64x64xf32>
    %230 = arith.mulf %217, %229 : vector<64x64xf32>
    %231 = arith.truncf %230 : vector<64x64xf32> to vector<64x64xbf16>
    %cst_72 = arith.constant dense<0.000000e+00> : vector<64x32xf32>
    %232 = tpu.matmul %231, %4, %cst_72 {dimension_numbers = #tpu.dot_dimension_numbers<[1], [0], [0], [1], [0, 0, 1, 1], [], []>} : vector<64x64xbf16>, vector<64x32xbf16>, vector<64x32xf32> -> vector<64x32xf32>
    %233 = vector.broadcast %5 : vector<1x32xf32> to vector<64x32xf32>
    %234 = arith.addf %232, %233 : vector<64x32xf32>
    %c0_73 = arith.constant 0 : index
    %c256_74 = arith.constant 256 : index
    %c0_75 = arith.constant 0 : index
    %235 = vector.load %arg8[%c0_73, %c256_74, %c0_75] : memref<1x336x32xf32, #tpu.memory_space<vmem>>, vector<1x64x32xf32>
    %236 = vector.shape_cast %235 : vector<1x64x32xf32> to vector<64x32xf32>
    %237 = vector.shape_cast %234 : vector<64x32xf32> to vector<1x64x32xf32>
    tpu.vector_store %arg8[%c0_73, %c256_74, %c0_75], %237 {strides = array<i32>} : memref<1x336x32xf32, #tpu.memory_space<vmem>>, vector<1x64x32xf32>,
    %cst_76 = arith.constant 0.000000e+00 : f32
    %238 = vector.broadcast %cst_76 : f32 to vector<8x64xf32>
    %c0_77 = arith.constant 0 : index
    %c0_78 = arith.constant 0 : index
    %239 = vector.load %arg9[%c0_77, %c0_78] : memref<304x64xf32, #tpu.memory_space<vmem>>, vector<8x64xf32>
    tpu.vector_store %arg9[%c0_77, %c0_78], %238 {strides = array<i32>} : memref<304x64xf32, #tpu.memory_space<vmem>>, vector<8x64xf32>,
    %cst_79 = arith.constant 0.000000e+00 : f32
    %240 = vector.broadcast %cst_79 : f32 to vector<8x64xf32>
    %c24_80 = arith.constant 24 : index
    %c0_81 = arith.constant 0 : index
    %241 = vector.load %arg9[%c24_80, %c0_81] : memref<304x64xf32, #tpu.memory_space<vmem>>, vector<8x64xf32>
    tpu.vector_store %arg9[%c24_80, %c0_81], %240 {strides = array<i32>} : memref<304x64xf32, #tpu.memory_space<vmem>>, vector<8x64xf32>,
    %c0_82 = arith.constant 0 : index
    %c320 = arith.constant 320 : index
    %c0_83 = arith.constant 0 : index
    %242 = vector.load %arg1[%c0_82, %c320, %c0_83] : memref<1x336x32xbf16, #tpu.memory_space<vmem>>, vector<1x16x32xbf16>
    %243 = vector.shape_cast %242 : vector<1x16x32xbf16> to vector<16x32xbf16>
    %cst_84 = arith.constant dense<0.000000e+00> : vector<16x64xf32>
    %244 = tpu.matmul %243, %0, %cst_84 {dimension_numbers = #tpu.dot_dimension_numbers<[1], [0], [0], [1], [0, 0, 1, 1], [], []>} : vector<16x32xbf16>, vector<32x64xbf16>, vector<16x64xf32> -> vector<16x64xf32>
    %245 = vector.broadcast %1 : vector<1x64xf32> to vector<16x64xf32>
    %246 = arith.addf %244, %245 : vector<16x64xf32>
    %c8_85 = arith.constant 8 : index
    %c0_86 = arith.constant 0 : index
    %247 = vector.load %arg9[%c8_85, %c0_86] : memref<304x64xf32, #tpu.memory_space<vmem>>, vector<16x64xf32>
    tpu.vector_store %arg9[%c8_85, %c0_86], %246 {strides = array<i32>} : memref<304x64xf32, #tpu.memory_space<vmem>>, vector<16x64xf32>,
    %c3 = arith.constant 3 : index
    %c0_87 = arith.constant 0 : index
    %248 = vector.load %arg9[%c3, %c0_87] : memref<304x64xf32, #tpu.memory_space<vmem>>, vector<24x64xf32>
    %c5 = arith.constant 5 : index
    %c0_88 = arith.constant 0 : index
    %249 = vector.load %arg9[%c5, %c0_88] : memref<304x64xf32, #tpu.memory_space<vmem>>, vector<24x64xf32>
    %250 = tpu.iota {dimensions = array<i32: 0>} : vector<24x1xi32>
    %c4_i32 = arith.constant 4 : i32
    %c0_i32_89 = arith.constant 0 : i32
    %251 = arith.cmpi eq, %c4_i32, %c0_i32_89 : i32
    %c1_i32_90 = arith.constant 1 : i32
    %252 = arith.select %251, %c1_i32_90, %c4_i32 : i32
    %253 = vector.broadcast %252 : i32 to vector<24x1xi32>
    %254 = arith.remsi %250, %253 : vector<24x1xi32>
    %c0_i32_91 = arith.constant 0 : i32
    %255 = vector.broadcast %c0_i32_91 : i32 to vector<24x1xi32>
    %256 = arith.cmpi ne, %254, %255 : vector<24x1xi32>
    %c0_i32_92 = arith.constant 0 : i32
    %257 = vector.broadcast %c0_i32_92 : i32 to vector<24x1xi32>
    %258 = arith.cmpi slt, %254, %257 : vector<24x1xi32>
    %c0_i32_93 = arith.constant 0 : i32
    %259 = arith.cmpi slt, %252, %c0_i32_93 : i32
    %260 = vector.broadcast %259 : i1 to vector<24x1xi1>
    %261 = vector.broadcast %260 : vector<24x1xi1> to vector<24x1xi1>
    %262 = arith.xori %258, %261 : vector<24x1xi1>
    %263 = arith.andi %262, %256 : vector<24x1xi1>
    %264 = vector.broadcast %252 : i32 to vector<24x1xi32>
    %265 = arith.addi %254, %264 : vector<24x1xi32>
    %266 = arith.select %263, %265, %254 : vector<24x1xi1>, vector<24x1xi32>
    %c0_i32_94 = arith.constant 0 : i32
    %267 = vector.broadcast %c0_i32_94 : i32 to vector<24x1xi32>
    %268 = arith.cmpi ne, %266, %267 : vector<24x1xi32>
    %cst_95 = arith.constant 0.000000e+00 : f32
    %269 = vector.shape_cast %268 : vector<24x1xi1> to vector<24x1xi1>
    %270 = vector.broadcast %269 : vector<24x1xi1> to vector<24x64xi1>
    %271 = vector.broadcast %cst_95 : f32 to vector<24x64xf32>
    %272 = arith.select %270, %248, %271 : vector<24x64xi1>, vector<24x64xf32>
    %c3_i32 = arith.constant 3 : i32
    %273 = vector.broadcast %c3_i32 : i32 to vector<24x1xi32>
    %274 = arith.cmpi ne, %266, %273 : vector<24x1xi32>
    %cst_96 = arith.constant 0.000000e+00 : f32
    %275 = vector.shape_cast %274 : vector<24x1xi1> to vector<24x1xi1>
    %276 = vector.broadcast %275 : vector<24x1xi1> to vector<24x64xi1>
    %277 = vector.broadcast %cst_96 : f32 to vector<24x64xf32>
    %278 = arith.select %276, %249, %277 : vector<24x64xi1>, vector<24x64xf32>
    %c8_97 = arith.constant 8 : index
    %c0_98 = arith.constant 0 : index
    %279 = vector.load %arg9[%c8_97, %c0_98] : memref<304x64xf32, #tpu.memory_space<vmem>>, vector<16x64xf32>
    %280 = vector.extract_strided_slice %2 {offsets = [4, 0, 0], sizes = [1, 1, 64], strides = [1, 1, 1]} : vector<9x1x64xf32> to vector<1x1x64xf32>
    %281 = vector.shape_cast %280 : vector<1x1x64xf32> to vector<1x64xf32>
    %282 = vector.broadcast %281 : vector<1x64xf32> to vector<16x64xf32>
    %283 = arith.mulf %279, %282 : vector<16x64xf32>
    %c4 = arith.constant 4 : index
    %c0_99 = arith.constant 0 : index
    %284 = vector.load %arg9[%c4, %c0_99] : memref<304x64xf32, #tpu.memory_space<vmem>>, vector<16x64xf32>
    %285 = vector.extract_strided_slice %2 {offsets = [1, 0, 0], sizes = [1, 1, 64], strides = [1, 1, 1]} : vector<9x1x64xf32> to vector<1x1x64xf32>
    %286 = vector.shape_cast %285 : vector<1x1x64xf32> to vector<1x64xf32>
    %287 = vector.broadcast %286 : vector<1x64xf32> to vector<16x64xf32>
    %288 = arith.mulf %284, %287 : vector<16x64xf32>
    %289 = arith.addf %283, %288 : vector<16x64xf32>
    %290 = vector.extract_strided_slice %272 {offsets = [0, 0], sizes = [16, 64], strides = [1, 1]} : vector<24x64xf32> to vector<16x64xf32>
    %291 = vector.extract_strided_slice %2 {offsets = [0, 0, 0], sizes = [1, 1, 64], strides = [1, 1, 1]} : vector<9x1x64xf32> to vector<1x1x64xf32>
    %292 = vector.shape_cast %291 : vector<1x1x64xf32> to vector<1x64xf32>
    %293 = vector.broadcast %292 : vector<1x64xf32> to vector<16x64xf32>
    %294 = arith.mulf %290, %293 : vector<16x64xf32>
    %295 = arith.addf %289, %294 : vector<16x64xf32>
    %296 = vector.extract_strided_slice %278 {offsets = [0, 0], sizes = [16, 64], strides = [1, 1]} : vector<24x64xf32> to vector<16x64xf32>
    %297 = vector.extract_strided_slice %2 {offsets = [2, 0, 0], sizes = [1, 1, 64], strides = [1, 1, 1]} : vector<9x1x64xf32> to vector<1x1x64xf32>
    %298 = vector.shape_cast %297 : vector<1x1x64xf32> to vector<1x64xf32>
    %299 = vector.broadcast %298 : vector<1x64xf32> to vector<16x64xf32>
    %300 = arith.mulf %296, %299 : vector<16x64xf32>
    %301 = arith.addf %295, %300 : vector<16x64xf32>
    %302 = vector.extract_strided_slice %272 {offsets = [4, 0], sizes = [16, 64], strides = [1, 1]} : vector<24x64xf32> to vector<16x64xf32>
    %303 = vector.extract_strided_slice %2 {offsets = [3, 0, 0], sizes = [1, 1, 64], strides = [1, 1, 1]} : vector<9x1x64xf32> to vector<1x1x64xf32>
    %304 = vector.shape_cast %303 : vector<1x1x64xf32> to vector<1x64xf32>
    %305 = vector.broadcast %304 : vector<1x64xf32> to vector<16x64xf32>
    %306 = arith.mulf %302, %305 : vector<16x64xf32>
    %307 = arith.addf %301, %306 : vector<16x64xf32>
    %308 = vector.extract_strided_slice %278 {offsets = [4, 0], sizes = [16, 64], strides = [1, 1]} : vector<24x64xf32> to vector<16x64xf32>
    %309 = vector.extract_strided_slice %2 {offsets = [5, 0, 0], sizes = [1, 1, 64], strides = [1, 1, 1]} : vector<9x1x64xf32> to vector<1x1x64xf32>
    %310 = vector.shape_cast %309 : vector<1x1x64xf32> to vector<1x64xf32>
    %311 = vector.broadcast %310 : vector<1x64xf32> to vector<16x64xf32>
    %312 = arith.mulf %308, %311 : vector<16x64xf32>
    %313 = arith.addf %307, %312 : vector<16x64xf32>
    %c12 = arith.constant 12 : index
    %c0_100 = arith.constant 0 : index
    %314 = vector.load %arg9[%c12, %c0_100] : memref<304x64xf32, #tpu.memory_space<vmem>>, vector<16x64xf32>
    %315 = vector.extract_strided_slice %2 {offsets = [7, 0, 0], sizes = [1, 1, 64], strides = [1, 1, 1]} : vector<9x1x64xf32> to vector<1x1x64xf32>
    %316 = vector.shape_cast %315 : vector<1x1x64xf32> to vector<1x64xf32>
    %317 = vector.broadcast %316 : vector<1x64xf32> to vector<16x64xf32>
    %318 = arith.mulf %314, %317 : vector<16x64xf32>
    %319 = arith.addf %313, %318 : vector<16x64xf32>
    %320 = vector.extract_strided_slice %272 {offsets = [8, 0], sizes = [16, 64], strides = [1, 1]} : vector<24x64xf32> to vector<16x64xf32>
    %321 = vector.extract_strided_slice %2 {offsets = [6, 0, 0], sizes = [1, 1, 64], strides = [1, 1, 1]} : vector<9x1x64xf32> to vector<1x1x64xf32>
    %322 = vector.shape_cast %321 : vector<1x1x64xf32> to vector<1x64xf32>
    %323 = vector.broadcast %322 : vector<1x64xf32> to vector<16x64xf32>
    %324 = arith.mulf %320, %323 : vector<16x64xf32>
    %325 = arith.addf %319, %324 : vector<16x64xf32>
    %326 = vector.extract_strided_slice %278 {offsets = [8, 0], sizes = [16, 64], strides = [1, 1]} : vector<24x64xf32> to vector<16x64xf32>
    %327 = vector.extract_strided_slice %2 {offsets = [8, 0, 0], sizes = [1, 1, 64], strides = [1, 1, 1]} : vector<9x1x64xf32> to vector<1x1x64xf32>
    %328 = vector.shape_cast %327 : vector<1x1x64xf32> to vector<1x64xf32>
    %329 = vector.broadcast %328 : vector<1x64xf32> to vector<16x64xf32>
    %330 = arith.mulf %326, %329 : vector<16x64xf32>
    %331 = arith.addf %325, %330 : vector<16x64xf32>
    %332 = vector.broadcast %3 : vector<1x64xf32> to vector<16x64xf32>
    %333 = arith.addf %331, %332 : vector<16x64xf32>
    %334 = arith.mulf %333, %333 : vector<16x64xf32>
    %335 = arith.mulf %333, %334 : vector<16x64xf32>
    %cst_101 = arith.constant 4.471500e-02 : f32
    %336 = vector.broadcast %cst_101 : f32 to vector<16x64xf32>
    %337 = arith.mulf %336, %335 : vector<16x64xf32>
    %338 = arith.addf %333, %337 : vector<16x64xf32>
    %cst_102 = arith.constant 0.797884583 : f32
    %339 = vector.broadcast %cst_102 : f32 to vector<16x64xf32>
    %340 = arith.mulf %339, %338 : vector<16x64xf32>
    %341 = math.tanh %340 : vector<16x64xf32>
    %cst_103 = arith.constant 1.000000e+00 : f32
    %342 = vector.broadcast %cst_103 : f32 to vector<16x64xf32>
    %343 = arith.addf %342, %341 : vector<16x64xf32>
    %cst_104 = arith.constant 5.000000e-01 : f32
    %344 = vector.broadcast %cst_104 : f32 to vector<16x64xf32>
    %345 = arith.mulf %344, %343 : vector<16x64xf32>
    %346 = arith.mulf %333, %345 : vector<16x64xf32>
    %347 = arith.truncf %346 : vector<16x64xf32> to vector<16x64xbf16>
    %cst_105 = arith.constant dense<0.000000e+00> : vector<16x32xf32>
    %348 = tpu.matmul %347, %4, %cst_105 {dimension_numbers = #tpu.dot_dimension_numbers<[1], [0], [0], [1], [0, 0, 1, 1], [], []>} : vector<16x64xbf16>, vector<64x32xbf16>, vector<16x32xf32> -> vector<16x32xf32>
    %349 = vector.broadcast %5 : vector<1x32xf32> to vector<16x32xf32>
    %350 = arith.addf %348, %349 : vector<16x32xf32>
    %c0_106 = arith.constant 0 : index
    %c320_107 = arith.constant 320 : index
    %c0_108 = arith.constant 0 : index
    %351 = vector.load %arg8[%c0_106, %c320_107, %c0_108] : memref<1x336x32xf32, #tpu.memory_space<vmem>>, vector<1x16x32xf32>
    %352 = vector.shape_cast %351 : vector<1x16x32xf32> to vector<16x32xf32>
    %353 = vector.shape_cast %350 : vector<16x32xf32> to vector<1x16x32xf32>
    tpu.vector_store %arg8[%c0_106, %c320_107, %c0_108], %353 {strides = array<i32>} : memref<1x336x32xf32, #tpu.memory_space<vmem>>, vector<1x16x32xf32>,
    return
  }
  func.func @transform_0(%arg0: i32) -> (i32, i32, i32) {
    %c0_i32 = arith.constant 0 : i32
    %c0_i32_0 = arith.constant 0 : i32
    %c0_i32_1 = arith.constant 0 : i32
    return %arg0, %c0_i32, %c0_i32_0 : i32, i32, i32
  }
  func.func @transform_1(%arg0: i32) -> (i32, i32) {
    %c0_i32 = arith.constant 0 : i32
    %c0_i32_0 = arith.constant 0 : i32
    %c0_i32_1 = arith.constant 0 : i32
    return %c0_i32, %c0_i32_0 : i32, i32
  }
  func.func @transform_2(%arg0: i32) -> (i32, i32) {
    %c0_i32 = arith.constant 0 : i32
    %c0_i32_0 = arith.constant 0 : i32
    %c0_i32_1 = arith.constant 0 : i32
    return %c0_i32, %c0_i32_0 : i32, i32
  }
  func.func @transform_3(%arg0: i32) -> (i32, i32, i32) {
    %c0_i32 = arith.constant 0 : i32
    %c0_i32_0 = arith.constant 0 : i32
    %c0_i32_1 = arith.constant 0 : i32
    %c0_i32_2 = arith.constant 0 : i32
    return %c0_i32, %c0_i32_0, %c0_i32_1 : i32, i32, i32
  }
  func.func @transform_4(%arg0: i32) -> (i32, i32) {
    %c0_i32 = arith.constant 0 : i32
    %c0_i32_0 = arith.constant 0 : i32
    %c0_i32_1 = arith.constant 0 : i32
    return %c0_i32, %c0_i32_0 : i32, i32
  }
  func.func @transform_5(%arg0: i32) -> (i32, i32) {
    %c0_i32 = arith.constant 0 : i32
    %c0_i32_0 = arith.constant 0 : i32
    %c0_i32_1 = arith.constant 0 : i32
    return %c0_i32, %c0_i32_0 : i32, i32
  }
  func.func @transform_6(%arg0: i32) -> (i32, i32) {
    %c0_i32 = arith.constant 0 : i32
    %c0_i32_0 = arith.constant 0 : i32
    %c0_i32_1 = arith.constant 0 : i32
    return %c0_i32, %c0_i32_0 : i32, i32
  }
  func.func @transform_7(%arg0: i32) -> (i32, i32, i32) {
    %c0_i32 = arith.constant 0 : i32
    %c0_i32_0 = arith.constant 0 : i32
    %c0_i32_1 = arith.constant 0 : i32
    return %arg0, %c0_i32, %c0_i32_0 : i32, i32, i32
  }
}

</mosaic_0001>

<bundles_post_ra>
// kernel: tpu_custom_call.1
= control target key start
LH: loop header
LB: loop body
LE: loop exit
PB: predicated region body
PF: predicated region fallthrough
CT: control target
= control target key end

     0   :  { %s4193_s24 = smov 0   ;;  %s6654_s0 = inlined_call_operand.vmem [shape: bf16[2,336,32], index: 0, kind: input, shape index: {}]   ;;  %s6655_s1 = inlined_call_operand.vmem [shape: bf16[32,64], index: 1, kind: input, shape index: {}]   ;;  %s6656_s2 = inlined_call_operand.vmem [shape: f32[1,64], index: 2, kind: input, shape index: {}]   ;;  %s6657_s3 = inlined_call_operand.vmem [shape: f32[9,1,64], index: 3, kind: input, shape index: {}]   ;;  %s6658_s4 = inlined_call_operand.vmem [shape: f32[1,64], index: 4, kind: input, shape index: {}]   ;;  %s6659_s5 = inlined_call_operand.vmem [shape: bf16[64,32], index: 5, kind: input, shape index: {}]   ;;  %s6660_s6 = inlined_call_operand.vmem [shape: f32[1,32], index: 6, kind: input, shape index: {}]   ;;  %s6661_s7 = inlined_call_operand.vmem [shape: f32[2,336,32], index: 7, kind: output, shape index: {}]  }
   0x1 LB: > { %s3716_s25 = sadd.s32 4294967295, %s4149_s24   ;;  %p3720_p0 = scmp.ge.s32.totalorder %s4149_s24, 1  ;;  %s4149_s24 = sphi %s4193_s24, %s17_s24  }
   0x2   : > { %p237_p1 = scmp.lt.s32.totalorder %s4149_s24, 3 }
   0x4   : > { %p238_p2 = pnand %p3720_p0, %p237_p1 }
   0x6   : > { %241 = sbr.rel (%p238_p2) target bundleno = 802 (0x322), region = 48 }
   0xb   : > { %v4002_v0 = vld [vmem:[%s6655_s1 + $0x8] sm:$0xff]   ;;  %p269_p3 = scmp.lt.s32.totalorder %s3716_s25, 1  ;;  %v4003_v1 = vld [vmem:[%s6655_s1] sm:$0xff]   ;;  %vm304_vm0 = vcmask 523264   ;;  %v6662_v2 = vmov 0.0   ;;  %vm441_vm1 = vcmask 261120   ;;  %v755_v32 = vlaneseq }
   0xc   : > { %3866 = vmatprep.subr.bf16.mxu0 %v4002_v0  ;;  %305 = vst.msk [vmem:[#allocation2] sm:$0xff] %vm304_vm0, %v6662_v2  ;;  %306 = vst.msk [vmem:[#allocation2 + $0x8] sm:$0xff] %vm304_vm0, %v6662_v2  ;;  %vm4152_vm2 = vmmov 0   ;;  %v4280_v28 = vld [vmem:[%s6659_s5 + $0x18] sm:$0xff]   ;;  %v4287_v29 = vld [vmem:[%s6659_s5 + $0x10] sm:$0xff]  }
   0xd   : > { %s6843_s25 = smov (!%p269_p3, %s3716_s25), 1  ;;  %3867 = vmatpush3.bf16.msra.mxu0 %v4002_v0  ;;  %307 = vst.msk [vmem:[#allocation2 + $0x10] sm:$0xff] %vm304_vm0, %v6662_v2  ;;  %308 = vst.msk [vmem:[#allocation2 + $0x118] sm:$0xff] %vm304_vm0, %v6662_v2  ;;  %3902 = vmatprep.subr.bf16.mxu1 %v4280_v28  ;;  %v4027_v30 = vld [vmem:[%s6659_s5 + $0x8] sm:$0xff]   ;;  %v4028_v31 = vld [vmem:[%s6659_s5] sm:$0xff]   ;;  %v4298_v33 = vshrl.u32 %v755_v32, 7 }
   0xe   : > { %309 = vst.msk [vmem:[#allocation2 + $0x120] sm:$0xff] %vm304_vm0, %v6662_v2  ;;  %310 = vst.msk [vmem:[#allocation2 + $0x128] sm:$0xff] %vm304_vm0, %v6662_v2  ;;  %3868 = vmatprep.subr.bf16.mxu0 %v4003_v1  ;;  %s3990_s30 = smul.u32 168, %s6843_s25  ;;  %3903 = vmatpush3.bf16.msra.mxu1 %v4280_v28  ;;  %v4317_v39 = vld [vmem:[%s6656_s2] ss:$0 sm:$0xff] }
   0xf   : > { %3904 = vmatprep.subr.bf16.mxu1 %v4287_v29  ;;  %6687 = vst [vmem:[#allocation3_spill] sm:$0xff] %v4298_v33  ;;  %v796_v34 = vand.u32 15, %v4298_v33  ;;  %v4302_v35 = vadd.s32 8, %v4298_v33  ;;  %v4305_v36 = vadd.s32 16, %v4298_v33  ;;  %v4308_v37 = vadd.s32 24, %v4298_v33  ;;  %s3991_s15 = smul.u32 336, %s6843_s25 }
  0x10   : > { %s4225_s10 = scalar_lea.vmem %s6654_s0, %s3990_s30  ;;  %v4322_v40 = vld [vmem:[%s6657_s3 + $0x1] ss:$0 sm:$0xff]  ;;  %v4325_v41 = vadd.s32 32, %v4298_v33  ;;  %v4328_v42 = vadd.s32 40, %v4298_v33  ;;  %v4335_v45 = vld [vmem:[%s6657_s3] ss:$0 sm:$0xff] }
  0x11   : > { %3869 = vmatpush3.bf16.msra.mxu0 %v4003_v1  ;;  %v4004_v3 = vld [vmem:[%s4225_s10] sm:$0xff]   ;;  %v4005_v4 = vld [vmem:[%s4225_s10 + $0x8] sm:$0xff]   ;;  %v4006_v5 = vld [vmem:[%s4225_s10 + $0x10] sm:$0xff]   ;;  %6688 = vst [vmem:[#allocation4_spill] sm:$0xff] %v4302_v35  ;;  %vm4310_vm3 = vcmp.ne.s32.totalorder %v796_v34, 0  ;;  %v803_v43 = vand.u32 15, %v4302_v35  ;;  %s6503_s21 = scalar_lea.vmem %s6661_s7, %s3991_s15 }
  0x12   : > { %3942 = vmatprep.subr.bf16.mxu0 %v4002_v0  ;;  %3870 = vmatprep.mubr.msk.bf16.mxu0 %vm441_vm1, %v4004_v3  ;;  %v4007_v6 = vld [vmem:[%s4225_s10 + $0x18] sm:$0xff]   ;;  %v4008_v7 = vld [vmem:[%s4225_s10 + $0x20] sm:$0xff]   ;;  %v4009_v8 = vld [vmem:[%s4225_s10 + $0x28] sm:$0xff]   ;;  %6689 = vst [vmem:[#allocation5_spill] sm:$0xff] %v4305_v36  ;;  %v810_v44 = vand.u32 15, %v4305_v36  ;;  %v4340_v48 = vadd.s32 48, %v4298_v33 }
  0x13   : > { %v4010_v9 = vld [vmem:[%s4225_s10 + $0x30] sm:$0xff]   ;;  %v4011_v10 = vld [vmem:[%s4225_s10 + $0x38] sm:$0xff]   ;;  %v4012_v11 = vld [vmem:[%s4225_s10 + $0x40] sm:$0xff]   ;;  %3905 = vmatpush3.bf16.msra.mxu1 %v4287_v29  ;;  %6690 = vst [vmem:[#allocation6_spill] sm:$0xff] %v4308_v37  ;;  %v817_v50 = vand.u32 15, %v4308_v37  ;;  %v4347_v52 = vadd.s32 56, %v4298_v33 }
  0x14   : > { %3871 = vmatmul.mubr.msk.bf16.vlgmr.msra.gmra.mxu0 %vm441_vm1, %v4005_v4  ;;  %v4013_v12 = vld [vmem:[%s4225_s10 + $0x48] sm:$0xff]   ;;  %v4014_v13 = vld [vmem:[%s4225_s10 + $0x50] sm:$0xff]   ;;  %v4015_v14 = vld [vmem:[%s4225_s10 + $0x58] sm:$0xff]   ;;  %3906 = vmatprep.subr.bf16.mxu1 %v4027_v30  ;;  %6693 = vst [vmem:[#allocation7_spill] sm:$0xff] %v4328_v42  ;;  %v4351_v54 = vadd.s32 64, %v4298_v33  ;;  %v4354_v55 = vadd.s32 72, %v4298_v33 }
  0x15   : > { %3943 = vmatpush3.bf16.msra.mxu0 %v4002_v0  ;;  %3874 = vmatprep.mubr.msk.bf16.mxu0 %vm441_vm1, %v4006_v5  ;;  %v4016_v15 = vld [vmem:[%s4225_s10 + $0x60] sm:$0xff]   ;;  %v4017_v16 = vld [vmem:[%s4225_s10 + $0x68] sm:$0xff]   ;;  %v4018_v17 = vld [vmem:[%s4225_s10 + $0x70] sm:$0xff]   ;;  %6694 = vst [vmem:[#allocation8_spill] sm:$0xff] %v4340_v48  ;;  %v4357_v56 = vadd.s32 80, %v4298_v33  ;;  %v824_v59 = vand.u32 15, %v4325_v41 }
  0x16   : > { %3944 = vmatprep.subr.bf16.mxu0 %v4003_v1  ;;  %v4019_v18 = vld [vmem:[%s4225_s10 + $0x78] sm:$0xff]   ;;  %v4020_v19 = vld [vmem:[%s4225_s10 + $0x80] sm:$0xff]   ;;  %v4021_v20 = vld [vmem:[%s4225_s10 + $0x88] sm:$0xff]   ;;  %6695 = vst [vmem:[#allocation9_spill] sm:$0xff] %v4347_v52  ;;  %v831_v60 = vand.u32 15, %v4328_v42  ;;  %vm4366_vm4 = vcmp.ne.s32.totalorder %v810_v44, 0 }
  0x17   : > { %v4022_v21 = vld [vmem:[%s4225_s10 + $0x90] sm:$0xff]   ;;  %v4023_v22 = vld [vmem:[%s4225_s10 + $0x98] sm:$0xff]   ;;  %v4024_v23 = vld [vmem:[%s4225_s10 + $0xa0] sm:$0xff]   ;;  %3907 = vmatpush3.bf16.msra.mxu1 %v4027_v30  ;;  %6696 = vst [vmem:[#allocation10_spill] sm:$0xff] %v4351_v54  ;;  %vm4370_vm5 = vcmp.ne.s32.totalorder %v803_v43, 15  ;;  %vm4404_vm6 = vcmp.ne.s32.totalorder %v824_v59, 0 }
  0x18   : > { %v683_v24 = vld [vmem:[#allocation2 + $0x7] sm:$0xff]  ;;  %v684_v25 = vld [vmem:[#allocation2 + $0xf] sm:$0xff]  ;;  %3908 = vmatprep.subr.bf16.mxu1 %v4028_v31  ;;  %6697 = vst [vmem:[#allocation11_spill] sm:$0xff] %v4354_v55  ;;  %v4362_v58 = vld [vmem:[%s6657_s3 + $0x2] ss:$0 sm:$0xff]  ;;  %vm4422_vm7 = vcmp.ne.s32.totalorder %v817_v50, 15 }
  0x19   : > { %3945 = vmatpush3.bf16.msra.mxu0 %v4003_v1  ;;  %2759 = vst.msk [vmem:[#allocation2] sm:$0xff] %vm304_vm0, %v6662_v2  ;;  %v719_v26 = vld [vmem:[#allocation2 + $0x9] sm:$0xff]  ;;  %v1332_v46 = vsel %vm4310_vm3, %v683_v24, 0.0  ;;  %v4383_v3 = vmul.f32 %v4335_v45, %v684_v25  ;;  %v4430_v24 = vadd.s32 152, %v4298_v33  ;;  %v4433_v25 = vadd.s32 160, %v4298_v33 }
  0x1a   : > { %3970 = vmatprep.subr.bf16.mxu0 %v6662_v2  ;;  %v1582_v27 = vld [vmem:[#allocation2 + $0x8] sm:$0xff]  ;;  %v1583_v47 = vld [vmem:[#allocation2 + $0x10] sm:$0xff]  ;;  %v4386_v4 = vmul.f32 %v4362_v58, %v719_v26  ;;  %v4444_v34 = vadd.s32 168, %v4298_v33  ;;  %v4451_v43 = vld [vmem:[%s6657_s3 + $0x7] ss:$0 sm:$0xff]  ;;  %vm4456_vm8 = vcmp.ne.s32.totalorder %v831_v60, 15 }
  0x1b   : > { %2760 = vst.msk [vmem:[#allocation2 + $0x8] sm:$0xff] %vm304_vm0, %v6662_v2  ;;  %3909 = vmatpush3.bf16.msra.mxu1 %v4028_v31  ;;  %v4344_v51 = vmul.f32 %v4322_v40, %v1582_v27  ;;  %v4375_v63 = vmul.f32 %v4322_v40, %v1583_v47  ;;  %6709 = vst [vmem:[#allocation15_spill] sm:$0xff] %v4430_v24  ;;  %v4438_v27 = vld [vmem:[%s6657_s3 + $0x4] ss:$0 sm:$0xff]  ;;  %v4469_v60 = vld [vmem:[%s6657_s3 + $0x3] ss:$0 sm:$0xff] }
  0x1c   : > { %3875 = vmatmul.mubr.msk.bf16.gmra.mxu0 %vm441_vm1, %v4007_v6  ;;  %3954 = vmatprep.subr.bf16.mxu1 %v4280_v28  ;;  %6710 = vst [vmem:[#allocation16_spill] sm:$0xff] %v4433_v25  ;;  %6711 = vst [vmem:[#allocation17_spill] sm:$0xff] %v4444_v34 }
  0x1d   : > { %3878 = vmatprep.mubr.msk.bf16.mxu0 %vm441_vm1, %v4008_v7 }
  0x24   : > { %3879 = vmatmul.mubr.msk.bf16.gmra.mxu0 %vm441_vm1, %v4009_v8  ;;  %v4391_v8 = vadd.s32 88, %v4298_v33 }
  0x25   : > { %3882 = vmatprep.mubr.msk.bf16.mxu0 %vm441_vm1, %v4010_v9  ;;  %v4394_v9 = vadd.s32 96, %v4298_v33 }
  0x2c   : > { %3883 = vmatmul.mubr.msk.bf16.gmra.mxu0 %vm441_vm1, %v4011_v10  ;;  %v4397_v10 = vadd.s32 104, %v4298_v33 }
  0x2d   : > { %3886 = vmatprep.mubr.msk.bf16.mxu0 %vm441_vm1, %v4012_v11 }
  0x34   : > { %3887 = vmatmul.mubr.msk.bf16.gmra.mxu0 %vm441_vm1, %v4013_v12 }
  0x35   : > { %3890 = vmatprep.mubr.msk.bf16.mxu0 %vm441_vm1, %v4014_v13 }
  0x3c   : > { %3891 = vmatmul.mubr.msk.bf16.gmra.mxu0 %vm441_vm1, %v4015_v14 }
  0x3d   : > { %3894 = vmatprep.mubr.msk.bf16.mxu0 %vm441_vm1, %v4016_v15 }
  0x44   : > { %3895 = vmatmul.mubr.msk.bf16.gmra.mxu0 %vm441_vm1, %v4017_v16 }
  0x45   : > { %3898 = vmatprep.mubr.msk.bf16.mxu0 %vm441_vm1, %v4018_v17  ;;  %v4409_v17 = vadd.s32 112, %v4298_v33 }
  0x4c   : > { %3899 = vmatmul.mubr.msk.bf16.gmra.mxu0 %vm441_vm1, %v4019_v18  ;;  %v4412_v18 = vadd.s32 120, %v4298_v33 }
  0x4d   : > { %3946 = vmatprep.mubr.msk.bf16.mxu0 %vm441_vm1, %v4020_v19  ;;  %v4415_v19 = vadd.s32 128, %v4298_v33 }
  0x4f   : > { %6704 = vst [vmem:[#allocation12_spill] sm:$0xff] %v4415_v19 }
  0x54   : > { %3947 = vmatmul.mubr.msk.bf16.vlgmr.msra.gmra.mxu0 %vm441_vm1, %v4021_v20  ;;  %v4418_v20 = vadd.s32 136, %v4298_v33 }
  0x55   : > { %3971 = vmatpush3.bf16.msra.mxu0 %v4002_v0  ;;  %3950 = vmatprep.mubr.msk.bf16.mxu0 %vm441_vm1, %v4022_v21  ;;  %v4378_v0 = vmul.f32 %v4335_v45, %v1332_v46 }
  0x56   : > { %3972 = vmatprep.subr.bf16.mxu0 %v6662_v2  ;;  %6705 = vst [vmem:[#allocation13_spill] sm:$0xff] %v4418_v20 }
  0x59   : > { %3973 = vmatpush3.bf16.msra.mxu0 %v4003_v1 }
  0x5c   : > { %3951 = vmatmul.mubr.msk.bf16.gmra.mxu0 %vm441_vm1, %v4023_v22 }
  0x5d   : > { %3974 = vmatprep.mubr.msk.bf16.mxu0 %vm4152_vm2, %v6662_v2 }
  0x64   : > { %3975 = vmatmul.mubr.msk.bf16.vlgmr.msra.gmra.mxu0 %vm441_vm1, %v4024_v23  ;;  %v4427_v23 = vadd.s32 144, %v4298_v33 }
  0x66   : > { %6708 = vst [vmem:[#allocation14_spill] sm:$0xff] %v4427_v23 }
  0xd4   : > { %v3872_v49 = vpop.f32.mrf.mxu0 }
  0xd5   : > { %v533_v53 = vadd.f32 %v3872_v49, %v4317_v39 }
  0xd6   : > { %v524_v57 = vpop.f32.mrf.mxu0 }
  0xd7   : > { %653 = vst.msk [vmem:[#allocation2 + $0x28] sm:$0xff] %vm304_vm0, %v533_v53  ;;  %v525_v1 = vadd.f32 %v4317_v39, %v524_v57 }
  0xd8   : > { %v3873_v6 = vpop.f32.mrf.mxu0 }
  0xd9   : > { %651 = vst.msk [vmem:[#allocation2 + $0x18] sm:$0xff] %vm304_vm0, %v525_v1  ;;  %v536_v11 = vadd.f32 %v3873_v6, %v4317_v39 }
  0xda   : > { %v527_v15 = vpop.f32.mrf.mxu0 }
  0xdb   : > { %654 = vst.msk [vmem:[#allocation2 + $0x30] sm:$0xff] %vm304_vm0, %v536_v11  ;;  %v528_v21 = vadd.f32 %v4317_v39, %v527_v15 }
  0xdc   : > { %v3876_v26 = vpop.f32.mrf.mxu0 }
  0xdd   : > { %652 = vst.msk [vmem:[#allocation2 + $0x20] sm:$0xff] %vm304_vm0, %v528_v21  ;;  %v549_v38 = vadd.f32 %v3876_v26, %v4317_v39 }
  0xde   : > { %v540_v49 = vpop.f32.mrf.mxu0  ;;  %v1514_v53 = vld [vmem:[#allocation2 + $0x28] sm:$0xff] }
  0xdf   : > { %657 = vst.msk [vmem:[#allocation2 + $0x48] sm:$0xff] %vm304_vm0, %v549_v38  ;;  %v541_v11 = vadd.f32 %v4317_v39, %v540_v49  ;;  %v1552_v6 = vmul.f32 %v4438_v27, %v1514_v53  ;;  %v4476_v38 = vmul.f32 %v4322_v40, %v1514_v53  ;;  %v4479_v49 = vmul.f32 %v4451_v43, %v1514_v53 }
  0xe0   : > { %v3877_v47 = vpop.f32.mrf.mxu0  ;;  %v685_v46 = vld [vmem:[#allocation2 + $0x17] sm:$0xff] }
  0xe1   : > { %v720_v1 = vld [vmem:[#allocation2 + $0x11] sm:$0xff]  ;;  %655 = vst.msk [vmem:[#allocation2 + $0x38] sm:$0xff] %vm304_vm0, %v541_v11  ;;  %v552_v21 = vadd.f32 %v3877_v47, %v4317_v39  ;;  %v1334_v26 = vsel %vm4366_vm4, %v685_v46, 0.0 }
  0xe2   : > { %v1512_v59 = vld [vmem:[#allocation2 + $0x18] sm:$0xff]  ;;  %v1477_v15 = vsel %vm4370_vm5, %v720_v1, 0.0  ;;  %v543_v32 = vpop.f32.mrf.mxu0  ;;  %v4489_v31 = vld [vmem:[#allocation2 + $0x2f] sm:$0xff]  ;;  %v1662_v11 = vmul.f32 %v4335_v45, %v1334_v26  ;;  %v1800_v61 = vmul.f32 %v4469_v60, %v1334_v26 }
  0xe3   : > { %v1550_v44 = vmul.f32 %v4438_v27, %v1512_v59  ;;  %v4491_v30 = vld [vmem:[#allocation2 + $0x29] sm:$0xff]  ;;  %v1592_v57 = vmul.f32 %v4322_v40, %v1512_v59  ;;  %v1731_v47 = vmul.f32 %v4362_v58, %v1477_v15  ;;  %658 = vst.msk [vmem:[#allocation2 + $0x50] sm:$0xff] %vm304_vm0, %v552_v21  ;;  %v544_v62 = vadd.f32 %v4317_v39, %v543_v32 }
  0xe4   : > { %v4493_v53 = vld [vmem:[#allocation2 + $0x30] sm:$0xff]  ;;  %v3880_v59 = vpop.f32.mrf.mxu0  ;;  %v686_v13 = vld [vmem:[#allocation2 + $0x1f] sm:$0xff]  ;;  %v687_v2 = vld [vmem:[#allocation2 + $0x27] sm:$0xff]  ;;  %v4510_v26 = vmul.f32 %v4335_v45, %v4489_v31  ;;  %v4514_v32 = vmul.f32 %v4362_v58, %v4491_v30  ;;  %v1803_v21 = vmul.f32 %v4469_v60, %v4489_v31 }
  0xe5   : > { %v1553_v46 = vmul.f32 %v4438_v27, %v4493_v53  ;;  %v4505_v1 = vmul.f32 %v4322_v40, %v4493_v53  ;;  %v1622_v14 = vadd.f32 %v4344_v51, %v1550_v44  ;;  %v721_v12 = vld [vmem:[#allocation2 + $0x19] sm:$0xff]  ;;  %v1624_v15 = vadd.f32 %v1592_v57, %v1552_v6  ;;  %656 = vst.msk [vmem:[#allocation2 + $0x40] sm:$0xff] %vm304_vm0, %v544_v62  ;;  %v722_v44 = vld [vmem:[#allocation2 + $0x21] sm:$0xff] }
  0xe6   : > { %v565_v51 = vadd.f32 %v3880_v59, %v4317_v39  ;;  %v4522_v7 = vsel %vm4404_vm6, %v687_v2, 0.0  ;;  %v1513_v57 = vld [vmem:[#allocation2 + $0x20] sm:$0xff]  ;;  %v1663_v6 = vmul.f32 %v4335_v45, %v686_v13  ;;  %v556_v42 = vpop.f32.mrf.mxu0  ;;  %v1479_v37 = vsel %vm4422_vm7, %v722_v44, 0.0 }
  0xe7   : > { %v1692_v5 = vadd.f32 %v4378_v0, %v1622_v14  ;;  %v1551_v36 = vmul.f32 %v4438_v27, %v1513_v57  ;;  %v1593_v62 = vmul.f32 %v4322_v40, %v1513_v57  ;;  %v1664_v59 = vmul.f32 %v4335_v45, %v4522_v7 }
  0xe8   : > { %661 = vst.msk [vmem:[#allocation2 + $0x68] sm:$0xff] %vm304_vm0, %v565_v51  ;;  %v557_v2 = vadd.f32 %v4317_v39, %v556_v42  ;;  %v1694_v16 = vadd.f32 %v1662_v11, %v1624_v15  ;;  %v1732_v35 = vmul.f32 %v4362_v58, %v721_v12  ;;  %v1733_v0 = vmul.f32 %v4362_v58, %v1479_v37  ;;  %v3881_v44 = vpop.f32.mrf.mxu0  ;;  %v724_v57 = vld [vmem:[#allocation2 + $0x31] sm:$0xff] }
  0xe9   : > { %v6714_v14 = vand.u32 15, %v4340_v48  ;;  %v4542_v33 = vld [vmem:[#allocation2 + $0x38] sm:$0xff]  ;;  %v1623_v34 = vadd.f32 %v4375_v63, %v1551_v36  ;;  %v1625_v51 = vadd.f32 %v1593_v62, %v1553_v46  ;;  %v1762_v42 = vadd.f32 %v4386_v4, %v1692_v5  ;;  %v4562_v5 = vld [vmem:[%s6657_s3 + $0x5] ss:$0 sm:$0xff] }
  0xea   : > { %v1801_v11 = vmul.f32 %v4469_v60, %v686_v13  ;;  %v6717_v15 = vand.u32 15, %v4347_v52  ;;  %659 = vst.msk [vmem:[#allocation2 + $0x58] sm:$0xff] %vm304_vm0, %v557_v2  ;;  %v1481_v48 = vsel %vm4456_vm8, %v724_v57, 0.0  ;;  %v1554_v36 = vmul.f32 %v4438_v27, %v4542_v33  ;;  %v559_v4 = vpop.f32.mrf.mxu0 }
  0xeb   : > { %vm4538_vm9 = vcmp.ne.s32.totalorder %v6714_v14, 0  ;;  %v568_v14 = vadd.f32 %v3881_v44, %v4317_v39  ;;  %v1764_v63 = vadd.f32 %v1732_v35, %v1694_v16  ;;  %v1693_v13 = vadd.f32 %v4383_v3, %v1623_v34 }
  0xec   : > { %vm4549_vm10 = vcmp.ne.s32.totalorder %v6717_v15, 15  ;;  %v1695_v46 = vadd.f32 %v1663_v6, %v1625_v51  ;;  %v1735_v62 = vmul.f32 %v4362_v58, %v1481_v48  ;;  %v1802_v2 = vmul.f32 %v4469_v60, %v4522_v7  ;;  %v3884_v57 = vpop.f32.mrf.mxu0  ;;  %v4572_v15 = vld [vmem:[#allocation2 + $0x3f] sm:$0xff]  ;;  %v691_v24 = vld [vmem:[#allocation2 + $0x47] sm:$0xff] }
  0xed   : > { %662 = vst.msk [vmem:[#allocation2 + $0x70] sm:$0xff] %vm304_vm0, %v568_v14  ;;  %v560_v50 = vadd.f32 %v4317_v39, %v559_v4  ;;  %v1626_v35 = vadd.f32 %v4476_v38, %v1554_v36  ;;  %v1832_v16 = vadd.f32 %v1800_v61, %v1762_v42  ;;  %v1870_v44 = vmul.f32 %v4562_v5, %v721_v12  ;;  %v4574_v52 = vld [vmem:[#allocation2 + $0x40] sm:$0xff] }
  0xee   : > { %v1763_v3 = vadd.f32 %v1731_v47, %v1693_v13  ;;  %v1765_v34 = vadd.f32 %v1733_v0, %v1695_v46  ;;  %v4576_v6 = vadd.f32 %v1802_v2, %v1764_v63  ;;  %v1871_v51 = vmul.f32 %v4562_v5, %v1479_v37  ;;  %v572_v42 = vpop.f32.mrf.mxu0  ;;  %v4588_v47 = vld [vmem:[%s6657_s3 + $0x6] ss:$0 sm:$0xff]  ;;  %v4593_v37 = vld [vmem:[%s6657_s3 + $0x8] ss:$0 sm:$0xff]  ;;  %v4596_v13 = vld [vmem:[#allocation2 + $0x50] sm:$0xff] }
  0xef   : > { %660 = vst.msk [vmem:[#allocation2 + $0x60] sm:$0xff] %vm304_vm0, %v560_v50  ;;  %v581_v14 = vadd.f32 %v3884_v57, %v4317_v39  ;;  %v1555_v38 = vmul.f32 %v4438_v27, %v4574_v52  ;;  %v1696_v61 = vadd.f32 %v1664_v59, %v1626_v35  ;;  %v1805_v12 = vmul.f32 %v4469_v60, %v4572_v15  ;;  %v689_v59 = vld [vmem:[#allocation2 + $0x37] sm:$0xff] }
  0xf0   : > { %v1833_v0 = vadd.f32 %v1801_v11, %v1763_v3  ;;  %v1835_v36 = vadd.f32 %v1803_v21, %v1765_v34  ;;  %v1873_v63 = vmul.f32 %v4562_v5, %v1481_v48  ;;  %v1902_v4 = vadd.f32 %v1870_v44, %v1832_v16  ;;  %v4606_v11 = vld [vmem:[#allocation2 + $0x4f] sm:$0xff]  ;;  %v3885_v16 = vpop.f32.mrf.mxu0 }
  0xf1   : > { %665 = vst.msk [vmem:[#allocation2 + $0x88] sm:$0xff] %vm304_vm0, %v581_v14  ;;  %v573_v46 = vadd.f32 %v4317_v39, %v572_v42  ;;  %v1627_v2 = vadd.f32 %v4505_v1, %v1555_v38  ;;  %v4602_v50 = vadd.f32 %v4514_v32, %v1696_v61  ;;  %v1943_v35 = vmul.f32 %v4451_v43, %v4493_v53  ;;  %v4608_v21 = vld [vmem:[#allocation2 + $0x49] sm:$0xff]  ;;  %v726_v1 = vld [vmem:[#allocation2 + $0x41] sm:$0xff]  ;;  %v4615_v14 = vld [vmem:[#allocation2 + $0x51] sm:$0xff] }
  0xf2   : > { %v1903_v44 = vadd.f32 %v1871_v51, %v1833_v0  ;;  %v4610_v57 = vadd.f32 %v1873_v63, %v1835_v36  ;;  %v1974_v3 = vadd.f32 %v4479_v49, %v1902_v4  ;;  %v2012_v34 = vmul.f32 %v4588_v47, %v4522_v7  ;;  %v4617_v32 = vld [vmem:[#allocation2 + $0x57] sm:$0xff]  ;;  %v575_v0 = vpop.f32.mrf.mxu0 }
  0xf3   : > { %663 = vst.msk [vmem:[#allocation2 + $0x78] sm:$0xff] %vm304_vm0, %v573_v46  ;;  %v584_v53 = vadd.f32 %v3885_v16, %v4317_v39  ;;  %v1697_v38 = vadd.f32 %v4510_v26, %v1627_v2  ;;  %v2013_v51 = vmul.f32 %v4588_v47, %v4489_v31  ;;  %v2082_v49 = vmul.f32 %v4593_v37, %v4491_v30 }
  0xf4   : > { %v6720_v61 = vand.u32 15, %v4351_v54  ;;  %v6723_v42 = vmov 0.0   ;;  %v1975_v36 = vadd.f32 %v1943_v35, %v1903_v44  ;;  %v2044_v63 = vadd.f32 %v2012_v34, %v1974_v3  ;;  %v4648_v35 = vld [vmem:[%s6658_s4] ss:$0 sm:$0xff] }
  0xf5   : > { %2761 = vst.msk [vmem:[#allocation2 + $0x50] sm:$0xff] %vm304_vm0, %v6723_v42  ;;  %v2083_v26 = vmul.f32 %v4593_v37, %v1481_v48  ;;  %v1338_v31 = vsel %vm4538_vm9, %v689_v59, 0.0  ;;  %v6724_v4 = vand.u32 15, %v4354_v55  ;;  %666 = vst.msk [vmem:[#allocation2 + $0x90] sm:$0xff] %vm304_vm0, %v584_v53  ;;  %v576_v2 = vadd.f32 %v4317_v39, %v575_v0  ;;  %v3888_v59 = vpop.f32.mrf.mxu0 }
  0xf6   : > { %vm4628_vm11 = vcmp.ne.s32.totalorder %v6720_v61, 0  ;;  %v1767_v16 = vadd.f32 %v1735_v62, %v1697_v38  ;;  %v1483_v48 = vsel %vm4549_vm10, %v726_v1, 0.0  ;;  %v1557_v22 = vmul.f32 %v4438_v27, %v4596_v13  ;;  %v4659_v61 = vld [vmem:[#allocation2 + $0x5f] sm:$0xff] }
  0xf7   : > { %vm4639_vm12 = vcmp.ne.s32.totalorder %v6724_v4, 15  ;;  %v2045_v44 = vadd.f32 %v2013_v51, %v1975_v36  ;;  %v2114_v3 = vadd.f32 %v2082_v49, %v2044_v63  ;;  %v1597_v34 = vmul.f32 %v4322_v40, %v4574_v52  ;;  %v4661_v0 = vld [vmem:[#allocation2 + $0x59] sm:$0xff]  ;;  %664 = vst.msk [vmem:[#allocation2 + $0x80] sm:$0xff] %vm304_vm0, %v576_v2  ;;  %v588_v49 = vpop.f32.mrf.mxu0 }
  0xf8   : > { %v4657_v53 = vmul.f32 %v4335_v45, %v1338_v31  ;;  %v4663_v62 = vld [vmem:[#allocation2 + $0x58] sm:$0xff]  ;;  %v597_v25 = vadd.f32 %v3888_v59, %v4317_v39  ;;  %v4667_v1 = vadd.f32 %v1805_v12, %v1767_v16  ;;  %v1667_v38 = vmul.f32 %v4335_v45, %v4572_v15 }
  0xf9   : > { %v1737_v51 = vmul.f32 %v4362_v58, %v1483_v48  ;;  %2762 = vst.msk [vmem:[#allocation2 + $0x58] sm:$0xff] %vm304_vm0, %v6723_v42  ;;  %v2115_v36 = vadd.f32 %v2083_v26, %v2045_v44  ;;  %v4675_v63 = vadd.f32 %v4648_v35, %v2114_v3  ;;  %v1629_v4 = vadd.f32 %v1597_v34, %v1557_v22  ;;  %v3889_v26 = vpop.f32.mrf.mxu0  ;;  %v4692_v3 = vld [vmem:[#allocation2 + $0x39] sm:$0xff] }
  0xfa   : > { %v1804_v2 = vmul.f32 %v4469_v60, %v1338_v31  ;;  %669 = vst.msk [vmem:[#allocation2 + $0xa8] sm:$0xff] %vm304_vm0, %v597_v25  ;;  %v589_v12 = vadd.f32 %v4317_v39, %v588_v49  ;;  %v1872_v16 = vmul.f32 %v4562_v5, %v4491_v30  ;;  %v4683_v59 = vmul.f32 %v4562_v5, %v1483_v48 }
  0xfb   : > { %v1944_v55 = vmul.f32 %v4451_v43, %v4542_v33  ;;  %v4688_v44 = vadd.f32 %v4648_v35, %v2115_v36  ;;  %v2184_v22 = vmul.f32 %v4675_v63, %v4675_v63  ;;  %v1699_v34 = vadd.f32 %v1667_v38, %v1629_v4  ;;  %v591_v23 = vpop.f32.mrf.mxu0 }
  0xfc   : > { %v1945_v25 = vmul.f32 %v4451_v43, %v4574_v52  ;;  %667 = vst.msk [vmem:[#allocation2 + $0x98] sm:$0xff] %vm304_vm0, %v589_v12  ;;  %v600_v30 = vadd.f32 %v3889_v26, %v4317_v39  ;;  %v1904_v49 = vadd.f32 %v1872_v16, %v4576_v6  ;;  %v2014_v54 = vmul.f32 %v4588_v47, %v1338_v31  ;;  %v1518_v12 = vld [vmem:[#allocation2 + $0x48] sm:$0xff] }
  0xfd   : > { %v2015_v36 = vmul.f32 %v4588_v47, %v4572_v15  ;;  %v2185_v42 = vmul.f32 %v4688_v44, %v4688_v44  ;;  %v2216_v38 = vmul.f32 %v2184_v22, %v4675_v63  ;;  %v4705_v4 = vadd.f32 %v1737_v51, %v1699_v34  ;;  %v3892_v26 = vpop.f32.mrf.mxu0 }
  0xfe   : > { %v1977_v52 = vadd.f32 %v1945_v25, %v4610_v57  ;;  %670 = vst.msk [vmem:[#allocation2 + $0xb0] sm:$0xff] %vm304_vm0, %v600_v30  ;;  %v592_v6 = vadd.f32 %v4317_v39, %v591_v23  ;;  %v1976_v31 = vadd.f32 %v1944_v55, %v1904_v49  ;;  %v2084_v15 = vmul.f32 %v4593_v37, %v4692_v3 }
  0xff   : > { %v2085_v16 = vmul.f32 %v4593_v37, %v1483_v48  ;;  %v2217_v20 = vmul.f32 %v2185_v42, %v4688_v44  ;;  %v2248_v19 = vmul.f32 0.044715, %v2216_v38  ;;  %v1340_v51 = vsel %vm4628_vm11, %v691_v24, 0.0  ;;  %v604_v7 = vpop.f32.mrf.mxu0 }
 0x100   : > { %v2047_v22 = vadd.f32 %v2015_v36, %v1977_v52  ;;  %v6727_v57 = vand.u32 15, %v4357_v56  ;;  %668 = vst.msk [vmem:[#allocation2 + $0xa0] sm:$0xff] %vm304_vm0, %v592_v6  ;;  %v613_v55 = vadd.f32 %v3892_v26, %v4317_v39  ;;  %v2046_v23 = vadd.f32 %v2014_v54, %v1976_v31 }
 0x101   : > { %v1485_v42 = vsel %vm4639_vm12, %v4615_v14, 0.0  ;;  %v4728_v48 = vmul.f32 %v4438_v27, %v1518_v12  ;;  %v6730_v24 = vand.u32 15, %v4391_v8  ;;  %v2249_v25 = vmul.f32 0.044715, %v2217_v20  ;;  %v3893_v38 = vpop.f32.mrf.mxu0 }
 0x102   : > { %vm4718_vm13 = vcmp.ne.s32.totalorder %v6727_v57, 0  ;;  %v2280_v30 = vadd.f32 %v2248_v19, %v4675_v63  ;;  %v2117_v49 = vadd.f32 %v2085_v16, %v2047_v22  ;;  %v4738_v54 = vmul.f32 %v4322_v40, %v1518_v12  ;;  %673 = vst.msk [vmem:[#allocation2 + $0xc8] sm:$0xff] %vm304_vm0, %v613_v55 }
 0x103   : > { %vm4732_vm14 = vcmp.ne.s32.totalorder %v6730_v24, 15  ;;  %v605_v14 = vadd.f32 %v4317_v39, %v604_v7  ;;  %v2116_v46 = vadd.f32 %v2084_v15, %v2046_v23  ;;  %v4743_v36 = vmul.f32 %v4335_v45, %v1340_v51  ;;  %v607_v22 = vpop.f32.mrf.mxu0 }
 0x104   : > { %v4746_v8 = vmul.f32 %v4362_v58, %v1485_v42  ;;  %v2281_v20 = vadd.f32 %v2249_v25, %v4688_v44  ;;  %v2312_v52 = vmul.f32 0.7978846, %v2280_v30  ;;  %v4750_v19 = vadd.f32 %v4648_v35, %v2117_v49 }
 0x105   : > { %v4753_v6 = vmul.f32 %v4469_v60, %v1340_v51  ;;  %671 = vst.msk [vmem:[#allocation2 + $0xb8] sm:$0xff] %vm304_vm0, %v605_v14  ;;  %v616_v31 = vadd.f32 %v3893_v38, %v4317_v39  ;;  %v4758_v15 = vadd.f32 %v4648_v35, %v2116_v46  ;;  %v1836_v16 = vadd.f32 %v1804_v2, %v4602_v50  ;;  %v3896_v25 = vpop.f32.mrf.mxu0 }
 0x106   : > { %v1874_v26 = vmul.f32 %v4562_v5, %v4692_v3  ;;  %v2313_v57 = vmul.f32 0.7978846, %v2281_v20  ;;  %4029 = vtanh.f32 %v2312_v52  ;;  %v2187_v55 = vmul.f32 %v4750_v19, %v4750_v19 }
 0x107   : > { %v4766_v23 = vmul.f32 %v4562_v5, %v1485_v42  ;;  %674 = vst.msk [vmem:[#allocation2 + $0xd0] sm:$0xff] %vm304_vm0, %v616_v31  ;;  %v608_v24 = vadd.f32 %v4317_v39, %v607_v22  ;;  %v2186_v7 = vmul.f32 %v4758_v15, %v4758_v15  ;;  %v1907_v2 = vadd.f32 %v4683_v59, %v4667_v1  ;;  %v730_v59 = vld [vmem:[#allocation2 + $0x61] sm:$0xff]  ;;  %v620_v52 = vpop.f32.mrf.mxu0 }
 0x108   : > { %v1906_v50 = vadd.f32 %v1874_v26, %v1836_v16  ;;  %4031 = vtanh.f32 %v2313_v57  ;;  %v2219_v30 = vmul.f32 %v2187_v55, %v4750_v19  ;;  %v1946_v49 = vmul.f32 %v4451_v43, %v1518_v12  ;;  %v4786_v22 = vld [vmem:[#allocation2 + $0x60] sm:$0xff] }
 0x109   : > { %v1947_v14 = vmul.f32 %v4451_v43, %v4596_v13  ;;  %672 = vst.msk [vmem:[#allocation2 + $0xc0] sm:$0xff] %vm304_vm0, %v608_v24  ;;  %v629_v46 = vadd.f32 %v3896_v25, %v4317_v39  ;;  %v2218_v38 = vmul.f32 %v2186_v7, %v4758_v15  ;;  %v2016_v20 = vmul.f32 %v4588_v47, %v1340_v51  ;;  %v3897_v7 = vpop.f32.mrf.mxu0 }
 0x10a   : > { %v2017_v1 = vmul.f32 %v4588_v47, %v4606_v11  ;;  %v2251_v31 = vmul.f32 0.044715, %v2219_v30  ;;  %v1978_v16 = vadd.f32 %v1946_v49, %v1906_v50  ;;  %v2086_v12 = vmul.f32 %v4593_v37, %v4608_v21 }
 0x10b   : > { %v1979_v26 = vadd.f32 %v1947_v14, %v1907_v2  ;;  %677 = vst.msk [vmem:[#allocation2 + $0xe8] sm:$0xff] %vm304_vm0, %v629_v46  ;;  %v621_v57 = vadd.f32 %v4317_v39, %v620_v52  ;;  %v2250_v55 = vmul.f32 0.044715, %v2218_v38  ;;  %v2087_v51 = vmul.f32 %v4593_v37, %v1485_v42  ;;  %v623_v14 = vpop.f32.mrf.mxu0 }
 0x10c   : > { %v4794_v24 = vsel %vm4718_vm13, %v4617_v32, 0.0  ;;  %v2283_v50 = vadd.f32 %v2251_v31, %v4750_v19  ;;  %v2048_v2 = vadd.f32 %v2016_v20, %v1978_v16  ;;  %v4799_v30 = vsel %vm4732_vm14, %v730_v59, 0.0 }
 0x10d   : > { %v2049_v25 = vadd.f32 %v2017_v1, %v1979_v26  ;;  %675 = vst.msk [vmem:[#allocation2 + $0xd8] sm:$0xff] %vm304_vm0, %v621_v57  ;;  %v632_v49 = vadd.f32 %v3897_v7, %v4317_v39  ;;  %v2282_v42 = vadd.f32 %v2250_v55, %v4758_v15  ;;  %v4806_v34 = vmul.f32 %v4438_v27, %v4663_v62  ;;  %v3900_v16 = vpop.f32.mrf.mxu0 }
 0x10e   : > { %v1559_v32 = vmul.f32 %v4438_v27, %v4786_v22  ;;  %v2315_v46 = vmul.f32 0.7978846, %v2283_v50  ;;  %v2118_v38 = vadd.f32 %v2086_v12, %v2048_v2  ;;  %v1596_v56 = vmul.f32 %v4322_v40, %v4542_v33 }
 0x10f   : > { %v2119_v20 = vadd.f32 %v2087_v51, %v2049_v25  ;;  %678 = vst.msk [vmem:[#allocation2 + $0xf0] sm:$0xff] %vm304_vm0, %v632_v49  ;;  %v624_v1 = vadd.f32 %v4317_v39, %v623_v14  ;;  %v2314_v59 = vmul.f32 0.7978846, %v2282_v42  ;;  %v1599_v52 = vmul.f32 %v4322_v40, %v4596_v13  ;;  %v636_v51 = vpop.f32.mrf.mxu0 }
 0x110   : > { %v4818_v31 = vmul.f32 %v4322_v40, %v4663_v62  ;;  %4033 = vtanh.f32 %v2315_v46  ;;  %v4821_v26 = vadd.f32 %v4648_v35, %v2118_v38  ;;  %v4828_v33 = vmul.f32 %v4322_v40, %v4786_v22 }
 0x111   : > { %v4824_v12 = vadd.f32 %v4648_v35, %v2119_v20  ;;  %676 = vst.msk [vmem:[#allocation2 + $0xe0] sm:$0xff] %vm304_vm0, %v624_v1  ;;  %v645_v13 = vadd.f32 %v3900_v16, %v4317_v39  ;;  %4035 = vtanh.f32 %v2314_v59  ;;  %v1628_v57 = vadd.f32 %v1596_v56, %v4728_v48 }
 0x112   : > { %v4833_v55 = vadd.f32 %v1599_v52, %v1559_v32  ;;  %v2188_v7 = vmul.f32 %v4821_v26, %v4821_v26  ;;  %v4841_v2 = vmul.f32 %v4335_v45, %v4794_v24  ;;  %v4845_v25 = vmul.f32 %v4335_v45, %v4659_v61 }
 0x113   : > { %v2189_v50 = vmul.f32 %v4824_v12, %v4824_v12  ;;  %v4030_v49 = vpop.eup %4029  ;;  %681 = vst.msk [vmem:[#allocation2 + $0x108] sm:$0xff] %vm304_vm0, %v645_v13  ;;  %v637_v48 = vadd.f32 %v4317_v39, %v636_v51  ;;  %v1698_v42 = vadd.f32 %v4657_v53, %v1628_v57  ;;  %v1736_v32 = vmul.f32 %v4362_v58, %v4692_v3  ;;  %v3901_v53 = vpop.f32.mrf.mxu0 }
 0x114   : > { %v4854_v14 = vmul.f32 %v4362_v58, %v4661_v0  ;;  %v6734_v46 = vand.u32 15, %v4394_v9  ;;  %v6737_v20 = vand.u32 15, %v4397_v10  ;;  %v2376_v1 = vadd.f32 1.0, %v4030_v49 }
 0x115   : > { %v2220_v3 = vmul.f32 %v2188_v7, %v4821_v26  ;;  %v2221_v59 = vmul.f32 %v2189_v50, %v4824_v12  ;;  %v4872_v52 = vmul.f32 %v4362_v58, %v4799_v30  ;;  %v4032_v9 = vpop.eup %4031  ;;  %679 = vst.msk [vmem:[#allocation2 + $0xf8] sm:$0xff] %vm304_vm0, %v637_v48  ;;  %v648_v16 = vadd.f32 %v3901_v53, %v4317_v39  ;;  %v639_v51 = vpop.f32.mrf.mxu0 }
 0x116   : > { %6733 = vst [vmem:[#allocation18_spill] sm:$0xff] %v4854_v14  ;;  %vm4858_vm15 = vcmp.ne.s32.totalorder %v6734_v46, 0  ;;  %vm4864_vm3 = vcmp.ne.s32.totalorder %v6737_v20, 15  ;;  %v1768_v10 = vadd.f32 %v1736_v32, %v1698_v42  ;;  %v1807_v13 = vmul.f32 %v4469_v60, %v4606_v11 }
 0x117   : > { %6740 = vst [vmem:[#allocation19_spill] sm:$0xff] %v4872_v52  ;;  %v4880_v57 = vmul.f32 %v4469_v60, %v4794_v24  ;;  %v2377_v7 = vadd.f32 1.0, %v4032_v9  ;;  %v2408_v50 = vmul.f32 0.5, %v2376_v1  ;;  %v2252_v49 = vmul.f32 0.044715, %v2220_v3  ;;  %682 = vst.msk [vmem:[#allocation2 + $0x110] sm:$0xff] %vm304_vm0, %v648_v16  ;;  %v3948_v53 = vpop.f32.mrf.mxu0 }
 0x118   : > { %v2253_v46 = vmul.f32 0.044715, %v2221_v59  ;;  %v640_v20 = vadd.f32 %v4317_v39, %v639_v51  ;;  %v1838_v48 = vadd.f32 %v4753_v6, %v1768_v10  ;;  %v1839_v42 = vadd.f32 %v1807_v13, %v4705_v4 }
 0x119   : > { %v1876_v32 = vmul.f32 %v4562_v5, %v4608_v21  ;;  %v2409_v52 = vmul.f32 0.5, %v2377_v7  ;;  %v2440_v14 = vmul.f32 %v2408_v50, %v4675_v63  ;;  %v2284_v9 = vadd.f32 %v2252_v49, %v4821_v26  ;;  %v2837_v16 = vpop.f32.mrf.mxu0 }
 0x11a   : > { %v2285_v1 = vadd.f32 %v2253_v46, %v4824_v12  ;;  %680 = vst.msk [vmem:[#allocation2 + $0x100] sm:$0xff] %vm304_vm0, %v640_v20  ;;  %v2846_v3 = vadd.f32 %v3948_v53, %v4317_v39  ;;  %v4895_v6 = vmul.f32 %v4562_v5, %v4799_v30  ;;  %v1909_v59 = vadd.f32 %v4766_v23, %v1839_v42  ;;  %v695_v46 = vld [vmem:[#allocation2 + $0x67] sm:$0xff] }
 0x11b   : > { %v1908_v4 = vadd.f32 %v1876_v32, %v1838_v48  ;;  %v2441_v10 = vmul.f32 %v2409_v52, %v4688_v44  ;;  %v2316_v13 = vmul.f32 0.7978846, %v2284_v9  ;;  %v1948_v51 = vmul.f32 %v4451_v43, %v4663_v62  ;;  %v732_v44 = vld [vmem:[#allocation2 + $0x71] sm:$0xff]  ;;  %v3949_v52 = vpop.f32.mrf.mxu0  ;;  %v4917_v32 = vld [vmem:[#allocation2 + $0x68] sm:$0xff] }
 0x11c   : > { %v2317_v63 = vmul.f32 0.7978846, %v2285_v1  ;;  %v2838_v7 = vadd.f32 %v4317_v39, %v2837_v16  ;;  %2870 = vst.msk [vmem:[#allocation2 + $0x20] sm:$0xff] %vm304_vm0, %v2846_v3  ;;  %v1949_v50 = vmul.f32 %v4451_v43, %v4786_v22  ;;  %v2018_v49 = vmul.f32 %v4588_v47, %v4794_v24  ;;  %v4923_v1 = vld [vmem:[#allocation2 + $0x70] sm:$0xff] }
 0x11d   : > { %v2019_v23 = vmul.f32 %v4588_v47, %v4659_v61  ;;  %v2472_v20 = vpack.c.bf16 %v2441_v10, %v2440_v14  ;;  %v6741_v48 = vand.u32 7, %v4325_v41  ;;  %4037 = vtanh.f32 %v2316_v13  ;;  %v4034_v24 = vpop.eup %4033  ;;  %v2840_v16 = vpop.f32.mrf.mxu0 }
 0x11e   : > { %v1980_v42 = vadd.f32 %v1948_v51, %v1908_v4  ;;  %v2088_v22 = vmul.f32 %v4593_v37, %v4661_v0  ;;  %v2849_v53 = vadd.f32 %v3949_v52, %v4317_v39  ;;  %2868 = vst.msk [vmem:[#allocation2 + $0x10] sm:$0xff] %vm304_vm0, %v2838_v7  ;;  %4039 = vtanh.f32 %v2317_v63  ;;  %v4036_v3 = vpop.eup %4035 }
 0x11f   : > { %vm4911_vm4 = vcmp.ne.s32.totalorder %v6741_v48, 0  ;;  %v1981_v14 = vadd.f32 %v1949_v50, %v1909_v59  ;;  %v2089_v9 = vmul.f32 %v4593_v37, %v4799_v30  ;;  %3910 = vmatprep.mubr.msk.bf16.mxu1 %vm304_vm0, %v2472_v20  ;;  %v2379_v4 = vadd.f32 1.0, %v4034_v24  ;;  %v3952_v52 = vpop.f32.mrf.mxu0 }
 0x120   : > { %v2050_v10 = vadd.f32 %v2018_v49, %v1980_v42  ;;  %v4928_v13 = vsel %vm4858_vm15, %v695_v46, 0.0  ;;  %v4932_v51 = vsel %vm4864_vm3, %v732_v44, 0.0  ;;  %2871 = vst.msk [vmem:[#allocation2 + $0x28] sm:$0xff] %vm304_vm0, %v2849_v53  ;;  %v2378_v59 = vadd.f32 1.0, %v4036_v3 }
 0x121   : > { %v2841_v30 = vadd.f32 %v4317_v39, %v2840_v16  ;;  %v2051_v63 = vadd.f32 %v2019_v23, %v1981_v14  ;;  %v1560_v7 = vmul.f32 %v4438_v27, %v4917_v32  ;;  %v2411_v50 = vmul.f32 0.5, %v2379_v4  ;;  %v4946_v23 = vld [vmem:[#allocation2 + $0x6f] sm:$0xff] }
 0x122   : > { %v2120_v49 = vadd.f32 %v2088_v22, %v2050_v10  ;;  %v1561_v38 = vmul.f32 %v4438_v27, %v4923_v1  ;;  %v4942_v56 = vmul.f32 %v4322_v40, %v4917_v32  ;;  %v2410_v46 = vmul.f32 0.5, %v2378_v59  ;;  %v2853_v22 = vpop.f32.mrf.mxu0 }
 0x123   : > { %2869 = vst.msk [vmem:[#allocation2 + $0x18] sm:$0xff] %vm304_vm0, %v2841_v30  ;;  %v2862_v44 = vadd.f32 %v3952_v52, %v4317_v39  ;;  %v2121_v20 = vadd.f32 %v2089_v9, %v2051_v63  ;;  %v4950_v48 = vmul.f32 %v4322_v40, %v4923_v1  ;;  %v2443_v42 = vmul.f32 %v2411_v50, %v4750_v19  ;;  %v4967_v19 = vld [vmem:[#allocation2 + $0x69] sm:$0xff] }
 0x124   : > { %v4954_v24 = vadd.f32 %v4648_v35, %v2120_v49  ;;  %v1630_v53 = vadd.f32 %v4738_v54, %v4806_v34  ;;  %v4959_v14 = vadd.f32 %v4818_v31, %v1560_v7  ;;  %v2442_v9 = vmul.f32 %v2410_v46, %v4758_v15  ;;  %v3953_v16 = vpop.f32.mrf.mxu0 }
 0x125   : > { %v2854_v3 = vadd.f32 %v4317_v39, %v2853_v22  ;;  %2874 = vst.msk [vmem:[#allocation2 + $0x40] sm:$0xff] %vm304_vm0, %v2862_v44  ;;  %v4965_v40 = vadd.f32 %v4648_v35, %v2121_v20  ;;  %v4970_v4 = vadd.f32 %v4828_v33, %v1561_v38  ;;  %v1669_v34 = vmul.f32 %v4335_v45, %v4606_v11  ;;  %v5118_v20 = vld [vmem:[%s6657_s3] ss:$0 sm:$0xff] }
 0x126   : > { %v2190_v54 = vmul.f32 %v4954_v24, %v4954_v24  ;;  %v4978_v15 = vmul.f32 %v4335_v45, %v4928_v13  ;;  %v4982_v31 = vmul.f32 %v4335_v45, %v4946_v23  ;;  %v2473_v10 = vpack.c.bf16 %v2443_v42, %v2442_v9  ;;  %v2856_v7 = vpop.f32.mrf.mxu0 }
 0x127   : > { %2872 = vst.msk [vmem:[#allocation2 + $0x30] sm:$0xff] %vm304_vm0, %v2854_v3  ;;  %v2865_v33 = vadd.f32 %v3953_v16, %v4317_v39  ;;  %v2191_v59 = vmul.f32 %v4965_v40, %v4965_v40  ;;  %v1700_v30 = vadd.f32 %v4743_v36, %v1630_v53  ;;  %v2880_v63 = vld [vmem:[#allocation2 + $0x27] sm:$0xff]  ;;  %v1701_v50 = vadd.f32 %v1669_v34, %v4833_v55 }
 0x128   : > { %v2222_v11 = vmul.f32 %v2190_v54, %v4954_v24  ;;  %v1738_v52 = vmul.f32 %v4362_v58, %v4608_v21  ;;  %v4995_v49 = vmul.f32 %v4362_v58, %v4967_v19  ;;  %v6744_v38 = vand.u32 15, %v4409_v17  ;;  %3911 = vmatmul.mubr.msk.bf16.vlgmr.msra.gmra.mxu1 %vm304_vm0, %v2473_v10 }
 0x129   : > { %v3050_v36 = vsel %vm4911_vm4, %v2880_v63, 0.0  ;;  %2875 = vst.msk [vmem:[#allocation2 + $0x48] sm:$0xff] %vm304_vm0, %v2865_v33  ;;  %v2223_v55 = vmul.f32 %v2191_v59, %v4965_v40  ;;  %v2857_v21 = vadd.f32 %v4317_v39, %v2856_v7  ;;  %v5011_v44 = vmul.f32 %v4362_v58, %v4932_v51  ;;  %3955 = vmatpush3.bf16.msra.mxu1 %v4280_v28  ;;  %v3457_v58 = vpop.f32.mrf.mxu0 }
 0x12a   : > { %vm4999_vm5 = vcmp.ne.s32.totalorder %v6744_v38, 0  ;;  %v6747_v17 = vand.u32 15, %v4412_v18  ;;  %v5020_v62 = vmul.f32 %v4335_v45, %v3050_v36  ;;  %v5023_v42 = vmul.f32 %v4469_v60, %v3050_v36  ;;  %v4038_v9 = vpop.eup %4037  ;;  %3956 = vmatprep.subr.bf16.mxu1 %v4287_v29  ;;  %v4113_v38 = vld [vmem:[%s6659_s5 + $0x10] sm:$0xff]  }
 0x12b   : > { %v5026_v22 = vmul.f32 %v4588_v47, %v3050_v36  ;;  %v2254_v53 = vmul.f32 0.044715, %v2222_v11  ;;  %v2255_v3 = vmul.f32 0.044715, %v2223_v55  ;;  %2873 = vst.msk [vmem:[#allocation2 + $0x38] sm:$0xff] %vm304_vm0, %v2857_v21  ;;  %v5031_v18 = vadd.f32 %v4317_v39, %v3457_v58  ;;  %v4040_v54 = vpop.eup %4039  ;;  %v3976_v33 = vpop.f32.mrf.mxu0 }
 0x12c   : > { %vm5015_vm6 = vcmp.ne.s32.totalorder %v6747_v17, 15  ;;  %6750 = vst [vmem:[#allocation20_spill] sm:$0xff] %v5020_v62  ;;  %6751 = vst [vmem:[#allocation21_spill] sm:$0xff] %v5023_v42  ;;  %v1770_v16 = vadd.f32 %v1738_v52, %v1700_v30  ;;  %v1771_v45 = vadd.f32 %v4746_v8, %v1701_v50  ;;  %v2380_v34 = vadd.f32 1.0, %v4038_v9  ;;  %v4114_v17 = vld [vmem:[%s6659_s5 + $0x8] sm:$0xff]   ;;  %v697_v9 = vld [vmem:[#allocation2 + $0x77] sm:$0xff] }
 0x12d   : > { %6752 = vst [vmem:[#allocation22_spill] sm:$0xff] %v5026_v22  ;;  %v2286_v10 = vadd.f32 %v2254_v53, %v4954_v24  ;;  %v1809_v28 = vmul.f32 %v4469_v60, %v4659_v61  ;;  %v5040_v59 = vmul.f32 %v4469_v60, %v4928_v13  ;;  %v2381_v63 = vadd.f32 1.0, %v4040_v54  ;;  %v3460_v50 = vpop.f32.mrf.mxu0  ;;  %3957 = vmatpush3.bf16.msra.mxu1 %v4113_v38  ;;  %v734_v54 = vld [vmem:[#allocation2 + $0x81] sm:$0xff]  ;;  %v700_v62 = vld [vmem:[#allocation2 + $0x8f] sm:$0xff] }
 0x12e   : > { %v2287_v11 = vadd.f32 %v2255_v3, %v4965_v40  ;;  %v5045_v8 = vmul.f32 %v4469_v60, %v4946_v23  ;;  %v1840_v29 = vadd.f32 %v4880_v57, %v1770_v16  ;;  %v2412_v30 = vmul.f32 0.5, %v2380_v34  ;;  %3958 = vmatprep.subr.bf16.mxu1 %v4114_v17  ;;  %v1524_v34 = vld [vmem:[#allocation2 + $0x78] sm:$0xff]  ;;  %v6764_v22 = vld [vmem:[#allocation14_spill] sm:$0xff] }
 0x12f   : > { %v2318_v7 = vmul.f32 0.7978846, %v2286_v10  ;;  %v1841_v52 = vadd.f32 %v1809_v28, %v1771_v45  ;;  %v1878_v61 = vmul.f32 %v4562_v5, %v4661_v0  ;;  %v2413_v36 = vmul.f32 0.5, %v2381_v63  ;;  %v1525_v10 = vld [vmem:[#allocation2 + $0x80] sm:$0xff]  ;;  %v6753_v63 = vld [vmem:[#allocation12_spill] sm:$0xff] }
 0x130   : > { %v2319_v55 = vmul.f32 0.7978846, %v2287_v11  ;;  %v5054_v21 = vadd.f32 %v4317_v39, %v3460_v50  ;;  %v5058_v57 = vmul.f32 %v4562_v5, %v4967_v19  ;;  %v2444_v0 = vmul.f32 %v2412_v30, %v4821_v26  ;;  %v3977_v39 = vpop.f32.mrf.mxu0  ;;  %v698_v30 = vld [vmem:[#allocation2 + $0x7f] sm:$0xff] }
 0x131   : > { %4041 = vtanh.f32 %v2318_v7  ;;  %v5066_v53 = vmul.f32 %v4562_v5, %v4932_v51  ;;  %v1910_v58 = vadd.f32 %v1878_v61, %v1840_v29  ;;  %v2445_v3 = vmul.f32 %v2413_v36, %v4824_v12  ;;  %3959 = vmatpush3.bf16.msra.mxu1 %v4114_v17  ;;  %v4115_v50 = vld [vmem:[%s6659_s5] sm:$0xff]  }
 0x132   : > { %4043 = vtanh.f32 %v2319_v55  ;;  %v1911_v16 = vadd.f32 %v4895_v6, %v1841_v52  ;;  %v1950_v45 = vmul.f32 %v4451_v43, %v4917_v32  ;;  %v1951_v26 = vmul.f32 %v4451_v43, %v4923_v1  ;;  %3960 = vmatprep.subr.bf16.mxu1 %v4115_v50  ;;  %v733_v61 = vld [vmem:[#allocation2 + $0x79] sm:$0xff]  ;;  %v5107_v55 = vld [vmem:[%s6657_s3 + $0x1] ss:$0 sm:$0xff] }
 0x133   : > { %v2020_v33 = vmul.f32 %v4588_v47, %v4928_v13  ;;  %v2021_v28 = vmul.f32 %v4588_v47, %v4946_v23  ;;  %v2090_v12 = vmul.f32 %v4593_v37, %v4967_v19  ;;  %v6754_v6 = vand.u32 15, %v6753_v63  ;;  %v6757_v23 = vld [vmem:[#allocation13_spill] sm:$0xff]  ;;  %v6763_v63 = vld [vmem:[#allocation19_spill] sm:$0xff] }
 0x134   : > { %v2474_v32 = vpack.c.bf16 %v2445_v3, %v2444_v0  ;;  %v1982_v29 = vadd.f32 %v1950_v45, %v1910_v58  ;;  %v2091_v1 = vmul.f32 %v4593_v37, %v4932_v51  ;;  %v1346_v13 = vsel %vm4999_vm5, %v697_v9, 0.0 }
 0x135   : > { %vm5082_vm7 = vcmp.ne.s32.totalorder %v6754_v6, 0  ;;  %v6758_v7 = vand.u32 15, %v6757_v23  ;;  %v1983_v52 = vadd.f32 %v1951_v26, %v1911_v16  ;;  %v1491_v51 = vsel %vm5015_vm6, %v734_v54, 0.0  ;;  %3961 = vmatpush3.bf16.msra.mxu1 %v4115_v50  ;;  %v5139_v26 = vld [vmem:[%s6657_s3 + $0x2] ss:$0 sm:$0xff] }
 0x136   : > { %v1562_v38 = vmul.f32 %v4438_v27, %v1524_v34  ;;  %v1563_v46 = vmul.f32 %v4438_v27, %v1525_v10  ;;  %3914 = vmatprep.mubr.msk.bf16.mxu1 %vm304_vm0, %v2474_v32  ;;  %v2052_v36 = vadd.f32 %v2020_v33, %v1982_v29  ;;  %v5110_v17 = vmul.f32 %v5107_v55, %v1524_v34 }
 0x137   : > { %vm5092_vm8 = vcmp.ne.s32.totalorder %v6758_v7, 15  ;;  %v5113_v0 = vmul.f32 %v5107_v55, %v1525_v10  ;;  %v5121_v27 = vmul.f32 %v5118_v20, %v1346_v13  ;;  %v2053_v58 = vadd.f32 %v2021_v28, %v1983_v52  ;;  %v699_v7 = vld [vmem:[#allocation2 + $0x87] sm:$0xff] }
 0x138   : > { %v5124_v9 = vadd.f32 %v4942_v56, %v1562_v38  ;;  %v5127_v39 = vadd.f32 %v4950_v48, %v1563_v46  ;;  %v5130_v3 = vmul.f32 %v5118_v20, %v698_v30  ;;  %v2122_v16 = vadd.f32 %v2090_v12, %v2052_v36  ;;  %v736_v36 = vld [vmem:[#allocation2 + $0x91] sm:$0xff] }
 0x139   : > { %v1702_v45 = vadd.f32 %v4841_v2, %v4959_v14  ;;  %v1703_v54 = vadd.f32 %v4845_v25, %v4970_v4  ;;  %v5142_v56 = vmul.f32 %v5139_v26, %v733_v61  ;;  %v6761_v48 = vmov 0.0   ;;  %v6762_v14 = vld [vmem:[#allocation18_spill] sm:$0xff] }
 0x13a   : > { %3978 = vmatprep.subr.bf16.mxu1 %v6761_v48  ;;  %v2123_v33 = vadd.f32 %v2091_v1, %v2053_v58  ;;  %v5146_v28 = vmul.f32 %v5139_v26, %v1491_v51  ;;  %v5149_v12 = vmul.f32 %v4469_v60, %v1346_v13  ;;  %v5152_v2 = vmul.f32 %v4469_v60, %v698_v30  ;;  %v5175_v58 = vld [vmem:[#allocation2 + $0x88] sm:$0xff] }
 0x13b   : > { %v5155_v25 = vadd.f32 %v4648_v35, %v2122_v16  ;;  %v1772_v4 = vadd.f32 %v6762_v14, %v1702_v45  ;;  %v1773_v6 = vadd.f32 %v6763_v63, %v1703_v54  ;;  %v5160_v32 = vmul.f32 %v4562_v5, %v733_v61 }
 0x13c   : > { %v5163_v29 = vadd.f32 %v4648_v35, %v2123_v33  ;;  %v5166_v1 = vmul.f32 %v4562_v5, %v1491_v51  ;;  %v1952_v23 = vmul.f32 %v4451_v43, %v1524_v34  ;;  %v1953_v60 = vmul.f32 %v4451_v43, %v1525_v10  ;;  %v1527_v33 = vld [vmem:[#allocation2 + $0x90] sm:$0xff] }
 0x13d   : > { %v2192_v50 = vmul.f32 %v5155_v25, %v5155_v25  ;;  %v1842_v52 = vadd.f32 %v5040_v59, %v1772_v4  ;;  %v1843_v38 = vadd.f32 %v5045_v8, %v1773_v6  ;;  %v2022_v46 = vmul.f32 %v4588_v47, %v1346_v13 }
 0x13e   : > { %v2193_v16 = vmul.f32 %v5163_v29, %v5163_v29  ;;  %v2023_v34 = vmul.f32 %v4588_v47, %v698_v30  ;;  %v2092_v43 = vmul.f32 %v4593_v37, %v733_v61  ;;  %v2093_v10 = vmul.f32 %v4593_v37, %v1491_v51  ;;  %v4042_v45 = vpop.eup %4041  ;;  %v5197_v51 = vld [vmem:[%s6657_s3 + $0x4] ss:$0 sm:$0xff] }
 0x13f   : > { %v2224_v54 = vmul.f32 %v2192_v50, %v5155_v25  ;;  %v1912_v59 = vadd.f32 %v5058_v57, %v1842_v52  ;;  %v1913_v8 = vadd.f32 %v5066_v53, %v1843_v38  ;;  %v5187_v13 = vsel %vm5082_vm7, %v699_v7, 0.0  ;;  %v4044_v14 = vpop.eup %4043 }
 0x140   : > { %v2382_v4 = vadd.f32 1.0, %v4042_v45  ;;  %v2225_v30 = vmul.f32 %v2193_v16, %v5163_v29  ;;  %v5192_v61 = vsel %vm5092_vm8, %v736_v36, 0.0  ;;  %v1564_v57 = vmul.f32 %v5197_v51, %v5175_v58 }
 0x141   : > { %v2383_v53 = vadd.f32 1.0, %v4044_v14  ;;  %v2256_v11 = vmul.f32 0.044715, %v2224_v54  ;;  %v1984_v63 = vadd.f32 %v1952_v23, %v1912_v59  ;;  %v1985_v6 = vadd.f32 %v1953_v60, %v1913_v8  ;;  %v6768_v14 = vld [vmem:[#allocation15_spill] sm:$0xff] }
 0x142   : > { %v2414_v7 = vmul.f32 0.5, %v2382_v4  ;;  %v2257_v50 = vmul.f32 0.044715, %v2225_v30  ;;  %v1565_v52 = vmul.f32 %v5197_v51, %v1527_v33  ;;  %v5204_v19 = vmul.f32 %v5107_v55, %v5175_v58 }
 0x143   : > { %v2415_v38 = vmul.f32 0.5, %v2383_v53  ;;  %v2288_v36 = vadd.f32 %v2256_v11, %v5155_v25  ;;  %v2054_v16 = vadd.f32 %v2022_v46, %v1984_v63  ;;  %v2055_v45 = vadd.f32 %v2023_v34, %v1985_v6 }
 0x144   : > { %v6765_v42 = vand.u32 15, %v6764_v22  ;;  %v2446_v23 = vmul.f32 %v2414_v7, %v4954_v24  ;;  %v2289_v60 = vadd.f32 %v2257_v50, %v5163_v29  ;;  %v5216_v59 = vmul.f32 %v5107_v55, %v1527_v33  ;;  %v735_v24 = vld [vmem:[#allocation2 + $0x89] sm:$0xff] }
 0x145   : > { %v5219_v8 = vadd.f32 %v5110_v17, %v1564_v57  ;;  %v6769_v46 = vand.u32 15, %v6768_v14  ;;  %v2320_v22 = vmul.f32 0.7978846, %v2288_v36  ;;  %v2124_v4 = vadd.f32 %v2092_v43, %v2054_v16 }
 0x146   : > { %vm5209_vm9 = vcmp.ne.s32.totalorder %v6765_v42, 0  ;;  %v2447_v42 = vmul.f32 %v2415_v38, %v4965_v40  ;;  %v2125_v30 = vadd.f32 %v2093_v10, %v2055_v45  ;;  %v2321_v53 = vmul.f32 0.7978846, %v2289_v60  ;;  %v701_v60 = vld [vmem:[#allocation2 + $0x97] sm:$0xff] }
 0x147   : > { %vm5223_vm10 = vcmp.ne.s32.totalorder %v6769_v46, 15  ;;  %v5229_v11 = vadd.f32 %v5113_v0, %v1565_v52  ;;  %v5233_v17 = vmul.f32 %v5118_v20, %v5187_v13  ;;  %v5236_v57 = vmul.f32 %v5118_v20, %v700_v62 }
 0x148   : > { %v2475_v63 = vpack.c.bf16 %v2447_v42, %v2446_v23  ;;  %4045 = vtanh.f32 %v2320_v22  ;;  %v5239_v6 = vadd.f32 %v4648_v35, %v2124_v4  ;;  %v5242_v40 = vadd.f32 %v4648_v35, %v2125_v30  ;;  %v5295_v4 = vld [vmem:[#allocation2 + $0x98] sm:$0xff] }
 0x149   : > { %4047 = vtanh.f32 %v2321_v53  ;;  %v1704_v0 = vadd.f32 %v4978_v15, %v5124_v9  ;;  %v1705_v43 = vadd.f32 %v4982_v31, %v5127_v39  ;;  %v5249_v10 = vmul.f32 %v5139_v26, %v735_v24  ;;  %v5263_v15 = vld [vmem:[%s6657_s3 + $0x3] ss:$0 sm:$0xff] }
 0x14a   : > { %3915 = vmatmul.mubr.msk.bf16.gmra.mxu1 %vm304_vm0, %v2475_v63  ;;  %v2194_v7 = vmul.f32 %v5239_v6, %v5239_v6  ;;  %v2195_v50 = vmul.f32 %v5242_v40, %v5242_v40  ;;  %v5258_v52 = vmul.f32 %v5139_v26, %v5192_v61  ;;  %v5267_v31 = vmul.f32 %v5263_v15, %v5187_v13 }
 0x14b   : > { %v1774_v9 = vadd.f32 %v4995_v49, %v1704_v0  ;;  %v1775_v39 = vadd.f32 %v5011_v44, %v1705_v43  ;;  %v5272_v38 = vmul.f32 %v5263_v15, %v700_v62  ;;  %v5275_v36 = vmul.f32 %v4562_v5, %v735_v24  ;;  %v5286_v49 = vld [vmem:[%s6657_s3 + $0x7] ss:$0 sm:$0xff] }
 0x14c   : > { %v2226_v16 = vmul.f32 %v2194_v7, %v5239_v6  ;;  %v2227_v45 = vmul.f32 %v2195_v50, %v5242_v40  ;;  %v5281_v23 = vmul.f32 %v4562_v5, %v5192_v61  ;;  %v1954_v44 = vmul.f32 %v5286_v49, %v5175_v58  ;;  %v738_v5 = vld [vmem:[#allocation2 + $0xa1] sm:$0xff] }
 0x14d   : > { %v1844_v14 = vadd.f32 %v5149_v12, %v1774_v9  ;;  %v1845_v46 = vadd.f32 %v5152_v2, %v1775_v39  ;;  %v1955_v42 = vmul.f32 %v5286_v49, %v1527_v33  ;;  %v2024_v22 = vmul.f32 %v4588_v47, %v5187_v13  ;;  %v5299_v58 = vld [vmem:[#allocation2 + $0xa0] sm:$0xff] }
 0x14e   : > { %v2258_v30 = vmul.f32 0.044715, %v2226_v16  ;;  %v2259_v53 = vmul.f32 0.044715, %v2227_v45  ;;  %v2025_v63 = vmul.f32 %v4588_v47, %v700_v62  ;;  %v2094_v0 = vmul.f32 %v4593_v37, %v735_v24  ;;  %v702_v24 = vld [vmem:[#allocation2 + $0x9f] sm:$0xff] }
 0x14f   : > { %v1914_v12 = vadd.f32 %v5160_v32, %v1844_v14  ;;  %v1915_v2 = vadd.f32 %v5166_v1, %v1845_v46  ;;  %v2095_v33 = vmul.f32 %v4593_v37, %v5192_v61  ;;  %v5307_v13 = vsel %vm5209_vm9, %v701_v60, 0.0  ;;  %v737_v9 = vld [vmem:[#allocation2 + $0x99] sm:$0xff] }
 0x150   : > { %v2290_v43 = vadd.f32 %v2258_v30, %v5239_v6  ;;  %v2291_v7 = vadd.f32 %v2259_v53, %v5242_v40  ;;  %v5313_v47 = vsel %vm5223_vm10, %v738_v5, 0.0  ;;  %v1566_v62 = vmul.f32 %v5197_v51, %v5295_v4  ;;  %v6772_v14 = vld [vmem:[#allocation16_spill] sm:$0xff]  ;;  %v6776_v5 = vld [vmem:[#allocation17_spill] sm:$0xff] }
 0x151   : > { %v1986_v32 = vadd.f32 %v1954_v44, %v1914_v12  ;;  %v1987_v1 = vadd.f32 %v1955_v42, %v1915_v2  ;;  %v1567_v37 = vmul.f32 %v5197_v51, %v5299_v58  ;;  %v5321_v61 = vmul.f32 %v5107_v55, %v5295_v4 }
 0x152   : > { %v2322_v54 = vmul.f32 0.7978846, %v2290_v43  ;;  %v2323_v50 = vmul.f32 0.7978846, %v2291_v7  ;;  %v5325_v34 = vmul.f32 %v5107_v55, %v5299_v58  ;;  %v5328_v39 = vadd.f32 %v5204_v19, %v1566_v62 }
 0x153   : > { %v2056_v16 = vadd.f32 %v2024_v22, %v1986_v32  ;;  %v2057_v45 = vadd.f32 %v2025_v63, %v1987_v1  ;;  %v5331_v44 = vadd.f32 %v5216_v59, %v1567_v37  ;;  %v5335_v60 = vmul.f32 %v5118_v20, %v5307_v13 }
 0x154   : > { %v6773_v46 = vand.u32 15, %v6772_v14  ;;  %v6777_v30 = vand.u32 15, %v6776_v5  ;;  %4049 = vtanh.f32 %v2322_v54  ;;  %v5350_v59 = vmul.f32 %v5118_v20, %v702_v24 }
 0x155   : > { %v1706_v22 = vadd.f32 %v5121_v27, %v5219_v8  ;;  %v1707_v53 = vadd.f32 %v5130_v3, %v5229_v11  ;;  %v4046_v63 = vpop.eup %4045  ;;  %4051 = vtanh.f32 %v2323_v50  ;;  %v2126_v12 = vadd.f32 %v2094_v0, %v2056_v16 }
 0x156   : > { %vm5339_vm11 = vcmp.ne.s32.totalorder %v6773_v46, 0  ;;  %vm5345_vm12 = vcmp.ne.s32.totalorder %v6777_v30, 15  ;;  %v2127_v2 = vadd.f32 %v2095_v33, %v2057_v45  ;;  %v5357_v43 = vmul.f32 %v5139_v26, %v737_v9  ;;  %v4048_v7 = vpop.eup %4047  ;;  %v5375_v33 = vld [vmem:[#allocation2 + $0x7] sm:$0xff]  ;;  %v5391_v45 = vld [vmem:[%s6657_s3 + $0x5] ss:$0 sm:$0xff] }
 0x157   : > { %v2384_v62 = vadd.f32 1.0, %v4046_v63  ;;  %v5361_v32 = vmul.f32 %v5139_v26, %v5313_v47  ;;  %v1776_v1 = vadd.f32 %v5142_v56, %v1706_v22  ;;  %v1777_v27 = vadd.f32 %v5146_v28, %v1707_v53  ;;  %6780 = vst [vmem:[#allocation12_spill] sm:$0xff] %v5375_v33  ;;  %3411 = vst.msk [vmem:[#allocation2] sm:$0xff] %vm304_vm0, %v6761_v48  ;;  %v703_v30 = vld [vmem:[#allocation2 + $0xa7] sm:$0xff] }
 0x158   : > { %v2385_v8 = vadd.f32 1.0, %v4048_v7  ;;  %v5366_v3 = vadd.f32 %v4648_v35, %v2126_v12  ;;  %v5369_v11 = vadd.f32 %v4648_v35, %v2127_v2  ;;  %v5373_v0 = vmul.f32 %v5263_v15, %v5307_v13  ;;  %v5403_v22 = vld [vmem:[#allocation2 + $0xa8] sm:$0xff]  ;;  %v740_v2 = vld [vmem:[#allocation2 + $0xb1] sm:$0xff] }
 0x159   : > { %v2416_v37 = vmul.f32 0.5, %v2384_v62  ;;  %v5378_v54 = vmul.f32 %v5263_v15, %v702_v24  ;;  %v1846_v56 = vadd.f32 %v5267_v31, %v1776_v1  ;;  %v1847_v28 = vadd.f32 %v5272_v38, %v1777_v27  ;;  %v5410_v7 = vld [vmem:[#allocation2 + $0xf] sm:$0xff] }
 0x15a   : > { %v2417_v50 = vmul.f32 0.5, %v2385_v8  ;;  %v2196_v35 = vmul.f32 %v5366_v3, %v5366_v3  ;;  %v2197_v16 = vmul.f32 %v5369_v11, %v5369_v11  ;;  %v5394_v14 = vmul.f32 %v5391_v45, %v737_v9  ;;  %6781 = vst [vmem:[#allocation13_spill] sm:$0xff] %v5410_v7  ;;  %v5412_v62 = vld [vmem:[#allocation2 + $0x9] sm:$0xff]  ;;  %v5430_v8 = vld [vmem:[#allocation2 + $0x17] sm:$0xff] }
 0x15b   : > { %v2448_v31 = vmul.f32 %v2416_v37, %v5155_v25  ;;  %v5399_v38 = vmul.f32 %v5391_v45, %v5313_v47  ;;  %v1916_v46 = vadd.f32 %v5275_v36, %v1846_v56  ;;  %v1917_v5 = vadd.f32 %v5281_v23, %v1847_v28  ;;  %6782 = vst [vmem:[#allocation18_spill] sm:$0xff] %v5412_v62  ;;  %v5419_v23 = vld [vmem:[%s6657_s3 + $0x6] ss:$0 sm:$0xff]  ;;  %v5434_v37 = vld [vmem:[#allocation2 + $0x10] sm:$0xff] }
 0x15c   : > { %v2449_v53 = vmul.f32 %v2417_v50, %v5163_v29  ;;  %v2228_v63 = vmul.f32 %v2196_v35, %v5366_v3  ;;  %v2229_v12 = vmul.f32 %v2197_v16, %v5369_v11  ;;  %v1956_v25 = vmul.f32 %v5286_v49, %v5295_v4  ;;  %v5427_v4 = vld [vmem:[%s6657_s3 + $0x8] ss:$0 sm:$0xff]  ;;  %6783 = vst [vmem:[#allocation19_spill] sm:$0xff] %v5430_v8  ;;  %v744_v62 = vld [vmem:[#allocation2 + $0xd1] sm:$0xff]  ;;  %v1537_v8 = vld [vmem:[#allocation2 + $0xe0] sm:$0xff] }
 0x15d   : > { %v1957_v36 = vmul.f32 %v5286_v49, %v5299_v58  ;;  %v2026_v29 = vmul.f32 %v5419_v23, %v5307_v13  ;;  %v2027_v1 = vmul.f32 %v5419_v23, %v702_v24  ;;  %v2096_v27 = vmul.f32 %v5427_v4, %v737_v9  ;;  %v5432_v58 = vld [vmem:[#allocation2 + $0x11] sm:$0xff]  ;;  %6785 = vst [vmem:[#allocation15_spill] sm:$0xff] %v5434_v37 }
 0x15e   : > { %6784 = vst [vmem:[#allocation14_spill] sm:$0xff] %v5432_v58  ;;  %v2476_v56 = vpack.c.bf16 %v2449_v53, %v2448_v31  ;;  %v2260_v28 = vmul.f32 0.044715, %v2228_v63  ;;  %v2261_v50 = vmul.f32 0.044715, %v2229_v12  ;;  %v1988_v35 = vadd.f32 %v1956_v25, %v1916_v46  ;;  %v5436_v13 = vld [vmem:[#allocation2 + $0xb0] sm:$0xff] }
 0x15f   : > { %3465 = vst.msk [vmem:[#allocation2 + $0x10] sm:$0xff] %vm304_vm0, %v5054_v21  ;;  %v1989_v24 = vadd.f32 %v1957_v36, %v1917_v5  ;;  %v2097_v16 = vmul.f32 %v5427_v4, %v5313_v47  ;;  %v5444_v9 = vsel %vm5339_vm11, %v703_v30, 0.0  ;;  %v5448_v37 = vsel %vm5345_vm12, %v740_v2, 0.0  ;;  %v704_v21 = vld [vmem:[#allocation2 + $0xaf] sm:$0xff]  ;;  %v5465_v63 = vld [vmem:[#allocation2 + $0x1f] sm:$0xff] }
 0x160   : > { %3918 = vmatprep.mubr.msk.bf16.mxu1 %vm304_vm0, %v2476_v56  ;;  %v2292_v31 = vadd.f32 %v2260_v28, %v5366_v3  ;;  %v2293_v46 = vadd.f32 %v2261_v50, %v5369_v11  ;;  %v2058_v53 = vadd.f32 %v2026_v29, %v1988_v35  ;;  %v1568_v5 = vmul.f32 %v5197_v51, %v5403_v22  ;;  %v5467_v12 = vld [vmem:[#allocation2 + $0x19] sm:$0xff] }
 0x161   : > { %v2059_v47 = vadd.f32 %v2027_v1, %v1989_v24  ;;  %v1569_v42 = vmul.f32 %v5197_v51, %v5436_v13  ;;  %v5459_v19 = vmul.f32 %v5107_v55, %v5403_v22  ;;  %v5463_v30 = vmul.f32 %v5107_v55, %v5436_v13  ;;  %6786 = vst [vmem:[#allocation16_spill] sm:$0xff] %v5465_v63  ;;  %v5469_v25 = vld [vmem:[#allocation2 + $0x18] sm:$0xff]  ;;  %v4050_v2 = vpop.eup %4049  ;;  %v739_v24 = vld [vmem:[#allocation2 + $0xa9] sm:$0xff] }
 0x162   : > { %6787 = vst [vmem:[#allocation17_spill] sm:$0xff] %v5467_v12  ;;  %6788 = vst [vmem:[#allocation23_spill] sm:$0xff] %v5469_v25  ;;  %v2324_v36 = vmul.f32 0.7978846, %v2292_v31  ;;  %v2325_v29 = vmul.f32 0.7978846, %v2293_v46  ;;  %v2128_v1 = vadd.f32 %v2096_v27, %v2058_v53  ;;  %v5472_v56 = vadd.f32 %v5321_v61, %v1568_v5  ;;  %v4052_v28 = vpop.eup %4051 }
 0x163   : > { %3412 = vst.msk [vmem:[#allocation2 + $0x18] sm:$0xff] %vm304_vm0, %v6761_v48  ;;  %v2386_v50 = vadd.f32 1.0, %v4050_v2  ;;  %v2129_v35 = vadd.f32 %v2097_v16, %v2059_v47  ;;  %v5477_v58 = vadd.f32 %v5325_v34, %v1569_v42  ;;  %v5481_v25 = vmul.f32 %v5118_v20, %v5444_v9  ;;  %v5483_v31 = vld [vmem:[#allocation2 + $0x8] sm:$0xff]  ;;  %v5488_v61 = vld [vmem:[%s6658_s4] ss:$0 sm:$0xff] }
 0x164   : > { %6789 = vst [vmem:[#allocation24_spill] sm:$0xff] %v5483_v31  ;;  %v2387_v27 = vadd.f32 1.0, %v4052_v28  ;;  %4053 = vtanh.f32 %v2324_v36  ;;  %v5491_v46 = vadd.f32 %v5488_v61, %v2128_v1  ;;  %v5494_v16 = vmul.f32 %v5118_v20, %v704_v21  ;;  %3464 = vst.msk [vmem:[#allocation2 + $0x8] sm:$0xff] %vm304_vm0, %v5031_v18 }
 0x165   : > { %v2418_v34 = vmul.f32 0.5, %v2386_v50  ;;  %4055 = vtanh.f32 %v2325_v29  ;;  %v5499_v53 = vadd.f32 %v5488_v61, %v2129_v35  ;;  %v1708_v5 = vadd.f32 %v5233_v17, %v5328_v39 }
 0x166   : > { %v2419_v47 = vmul.f32 0.5, %v2387_v27  ;;  %v2198_v42 = vmul.f32 %v5491_v46, %v5491_v46  ;;  %v1709_v2 = vadd.f32 %v5236_v57, %v5331_v44  ;;  %v5508_v36 = vmul.f32 %v5139_v26, %v739_v24 }
 0x167   : > { %v2450_v18 = vmul.f32 %v2418_v34, %v5239_v6  ;;  %v2199_v29 = vmul.f32 %v5499_v53, %v5499_v53  ;;  %v5515_v1 = vmul.f32 %v5139_v26, %v5448_v37  ;;  %v1778_v17 = vadd.f32 %v5249_v10, %v1708_v5 }
 0x168   : > { %v2451_v39 = vmul.f32 %v2419_v47, %v5242_v40  ;;  %v2230_v28 = vmul.f32 %v2198_v42, %v5491_v46  ;;  %v1779_v57 = vadd.f32 %v5258_v52, %v1709_v2  ;;  %v5523_v44 = vmul.f32 %v5263_v15, %v5444_v9 }
 0x169   : > { %v2231_v6 = vmul.f32 %v2199_v29, %v5499_v53  ;;  %v5527_v50 = vmul.f32 %v5263_v15, %v704_v21  ;;  %v1848_v35 = vadd.f32 %v5373_v0, %v1778_v17  ;;  %v5531_v27 = vmul.f32 %v5391_v45, %v739_v24  ;;  %v5549_v17 = vld [vmem:[#allocation2 + $0xb8] sm:$0xff] }
 0x16a   : > { %v2477_v10 = vpack.c.bf16 %v2451_v39, %v2450_v18  ;;  %v2262_v40 = vmul.f32 0.044715, %v2230_v28  ;;  %v1849_v34 = vadd.f32 %v5378_v54, %v1779_v57  ;;  %v5536_v52 = vmul.f32 %v5391_v45, %v5448_v37 }
 0x16b   : > { %v2263_v5 = vmul.f32 0.044715, %v2231_v6  ;;  %v1918_v47 = vadd.f32 %v5394_v14, %v1848_v35  ;;  %v1958_v42 = vmul.f32 %v5286_v49, %v5403_v22  ;;  %v1959_v0 = vmul.f32 %v5286_v49, %v5436_v13  ;;  %v5551_v14 = vld [vmem:[#allocation2 + $0xc0] sm:$0xff] }
 0x16c   : > { %3919 = vmatmul.mubr.msk.bf16.gmra.mxu1 %vm304_vm0, %v2477_v10  ;;  %v2294_v2 = vadd.f32 %v2262_v40, %v5491_v46  ;;  %v1919_v18 = vadd.f32 %v5399_v38, %v1849_v34  ;;  %v2028_v54 = vmul.f32 %v5419_v23, %v5444_v9  ;;  %v2029_v29 = vmul.f32 %v5419_v23, %v704_v21  ;;  %v6790_v38 = vld [vmem:[#allocation3_spill] sm:$0xff] }
 0x16d   : > { %v2295_v22 = vadd.f32 %v2263_v5, %v5499_v53  ;;  %v1990_v39 = vadd.f32 %v1958_v42, %v1918_v47  ;;  %v2098_v13 = vmul.f32 %v5427_v4, %v739_v24  ;;  %v2099_v28 = vmul.f32 %v5427_v4, %v5448_v37  ;;  %v705_v24 = vld [vmem:[#allocation2 + $0xb7] sm:$0xff]  ;;  %v742_v47 = vld [vmem:[#allocation2 + $0xc1] sm:$0xff] }
 0x16e   : > { %v2326_v57 = vmul.f32 0.7978846, %v2294_v2  ;;  %v1991_v6 = vadd.f32 %v1959_v0, %v1919_v18  ;;  %v778_v35 = vadd.s32 176, %v6790_v38  ;;  %v779_v9 = vadd.s32 184, %v6790_v38 }
 0x16f   : > { %v2327_v10 = vmul.f32 0.7978846, %v2295_v22  ;;  %v2060_v21 = vadd.f32 %v2028_v54, %v1990_v39  ;;  %v1570_v40 = vmul.f32 %v5197_v51, %v5549_v17  ;;  %v1571_v34 = vmul.f32 %v5197_v51, %v5551_v14 }
 0x170   : > { %4057 = vtanh.f32 %v2326_v57  ;;  %v2061_v5 = vadd.f32 %v2029_v29, %v1991_v6  ;;  %v950_v42 = vand.u32 15, %v778_v35  ;;  %v957_v37 = vand.u32 15, %v779_v9  ;;  %v706_v57 = vld [vmem:[#allocation2 + $0xbf] sm:$0xff] }
 0x171   : > { %v4054_v2 = vpop.eup %4053  ;;  %4059 = vtanh.f32 %v2327_v10  ;;  %v2130_v0 = vadd.f32 %v2098_v13, %v2060_v21  ;;  %v5565_v18 = vmul.f32 %v5107_v55, %v5549_v17  ;;  %v5569_v54 = vmul.f32 %v5107_v55, %v5551_v14  ;;  %v741_v21 = vld [vmem:[#allocation2 + $0xb9] sm:$0xff] }
 0x172   : > { %v4056_v22 = vpop.eup %4055  ;;  %v2388_v39 = vadd.f32 1.0, %v4054_v2  ;;  %v2131_v48 = vadd.f32 %v2099_v28, %v2061_v5  ;;  %vm1246_vm13 = vcmp.ne.s32.totalorder %v950_v42, 0  ;;  %vm1391_vm14 = vcmp.ne.s32.totalorder %v957_v37, 15 }
 0x173   : > { %v2389_v29 = vadd.f32 1.0, %v4056_v22  ;;  %v5572_v6 = vadd.f32 %v5488_v61, %v2130_v0  ;;  %v1354_v35 = vsel %vm1246_vm13, %v705_v24, 0.0  ;;  %v1499_v13 = vsel %vm1391_vm14, %v742_v47, 0.0 }
 0x174   : > { %v2420_v9 = vmul.f32 0.5, %v2388_v39  ;;  %v5575_v10 = vadd.f32 %v5488_v61, %v2131_v48  ;;  %v5578_v31 = vadd.f32 %v5459_v19, %v1570_v40  ;;  %v5581_v2 = vadd.f32 %v5463_v30, %v1571_v34 }
 0x175   : > { %v2421_v28 = vmul.f32 0.5, %v2389_v29  ;;  %v2200_v5 = vmul.f32 %v5572_v6, %v5572_v6  ;;  %v5586_v42 = vmul.f32 %v5118_v20, %v1354_v35  ;;  %v5589_v24 = vmul.f32 %v5118_v20, %v706_v57 }
 0x176   : > { %v2452_v48 = vmul.f32 %v2420_v9, %v5366_v3  ;;  %v2201_v47 = vmul.f32 %v5575_v10, %v5575_v10  ;;  %v1710_v19 = vadd.f32 %v5335_v60, %v5472_v56  ;;  %v1711_v30 = vadd.f32 %v5350_v59, %v5477_v58 }
 0x177   : > { %v2453_v40 = vmul.f32 %v2421_v28, %v5369_v11  ;;  %v2232_v34 = vmul.f32 %v2200_v5, %v5572_v6  ;;  %v5601_v37 = vmul.f32 %v5139_v26, %v741_v21  ;;  %v5604_v0 = vmul.f32 %v5139_v26, %v1499_v13 }
 0x178   : > { %v2233_v3 = vmul.f32 %v2201_v47, %v5575_v10  ;;  %v1780_v22 = vadd.f32 %v5357_v43, %v1710_v19  ;;  %v1781_v39 = vadd.f32 %v5361_v32, %v1711_v30  ;;  %v5610_v60 = vmul.f32 %v5263_v15, %v1354_v35 }
 0x179   : > { %v2478_v59 = vpack.c.bf16 %v2453_v40, %v2452_v48  ;;  %v2264_v58 = vmul.f32 0.044715, %v2232_v34  ;;  %v5613_v11 = vmul.f32 %v5263_v15, %v706_v57  ;;  %v5616_v56 = vmul.f32 %v5391_v45, %v741_v21 }
 0x17a   : > { %v2265_v29 = vmul.f32 0.044715, %v2233_v3  ;;  %v1850_v9 = vadd.f32 %v5523_v44, %v1780_v22  ;;  %v1851_v28 = vadd.f32 %v5527_v50, %v1781_v39  ;;  %v5621_v43 = vmul.f32 %v5391_v45, %v1499_v13 }
 0x17b   : > { %3922 = vmatprep.mubr.msk.bf16.mxu1 %vm304_vm0, %v2478_v59  ;;  %v2296_v32 = vadd.f32 %v2264_v58, %v5572_v6  ;;  %v1960_v5 = vmul.f32 %v5286_v49, %v5549_v17  ;;  %v1961_v48 = vmul.f32 %v5286_v49, %v5551_v14  ;;  %v2030_v47 = vmul.f32 %v5419_v23, %v1354_v35 }
 0x17c   : > { %v2297_v19 = vadd.f32 %v2265_v29, %v5575_v10  ;;  %v1920_v44 = vadd.f32 %v5531_v27, %v1850_v9  ;;  %v1921_v50 = vadd.f32 %v5536_v52, %v1851_v28  ;;  %v2031_v30 = vmul.f32 %v5419_v23, %v706_v57  ;;  %v1534_v29 = vld [vmem:[#allocation2 + $0xc8] sm:$0xff] }
 0x17d   : > { %v4058_v40 = vpop.eup %4057  ;;  %v2328_v34 = vmul.f32 0.7978846, %v2296_v32  ;;  %v2100_v3 = vmul.f32 %v5427_v4, %v741_v21  ;;  %v2101_v22 = vmul.f32 %v5427_v4, %v1499_v13  ;;  %v780_v17 = vadd.s32 192, %v6790_v38  ;;  %v707_v27 = vld [vmem:[#allocation2 + $0xc7] sm:$0xff]  ;;  %v1535_v32 = vld [vmem:[#allocation2 + $0xd0] sm:$0xff] }
 0x17e   : > { %v4060_v39 = vpop.eup %4059  ;;  %v2390_v14 = vadd.f32 1.0, %v4058_v40  ;;  %v2329_v59 = vmul.f32 0.7978846, %v2297_v19  ;;  %v1992_v35 = vadd.f32 %v1960_v5, %v1920_v44  ;;  %v1993_v58 = vadd.f32 %v1961_v48, %v1921_v50 }
 0x17f   : > { %v2391_v12 = vadd.f32 1.0, %v4060_v39  ;;  %4061 = vtanh.f32 %v2328_v34  ;;  %v781_v52 = vadd.s32 200, %v6790_v38  ;;  %v964_v57 = vand.u32 15, %v780_v17  ;;  %v708_v34 = vld [vmem:[#allocation2 + $0xcf] sm:$0xff] }
 0x180   : > { %v2422_v9 = vmul.f32 0.5, %v2390_v14  ;;  %4063 = vtanh.f32 %v2329_v59  ;;  %v2062_v28 = vadd.f32 %v2030_v47, %v1992_v35  ;;  %v2063_v21 = vadd.f32 %v2031_v30, %v1993_v58  ;;  %v743_v39 = vld [vmem:[#allocation2 + $0xc9] sm:$0xff] }
 0x181   : > { %v2423_v13 = vmul.f32 0.5, %v2391_v12  ;;  %v971_v63 = vand.u32 15, %v781_v52  ;;  %vm1248_vm15 = vcmp.ne.s32.totalorder %v964_v57, 0  ;;  %v1572_v19 = vmul.f32 %v5197_v51, %v1534_v29 }
 0x182   : > { %v2454_v5 = vmul.f32 %v2422_v9, %v5491_v46  ;;  %v2132_v48 = vadd.f32 %v2100_v3, %v2062_v28  ;;  %v2133_v44 = vadd.f32 %v2101_v22, %v2063_v21  ;;  %v1356_v50 = vsel %vm1248_vm15, %v707_v27, 0.0 }
 0x183   : > { %v2455_v40 = vmul.f32 %v2423_v13, %v5499_v53  ;;  %vm1393_vm3 = vcmp.ne.s32.totalorder %v971_v63, 15  ;;  %v1573_v17 = vmul.f32 %v5197_v51, %v1535_v32  ;;  %v5643_v47 = vmul.f32 %v5107_v55, %v1534_v29 }
 0x184   : > { %v5646_v12 = vadd.f32 %v5488_v61, %v2132_v48  ;;  %v5649_v30 = vadd.f32 %v5488_v61, %v2133_v44  ;;  %v1501_v46 = vsel %vm1393_vm3, %v744_v62, 0.0  ;;  %v5652_v3 = vmul.f32 %v5107_v55, %v1535_v32 }
 0x185   : > { %v2479_v22 = vpack.c.bf16 %v2455_v40, %v2454_v5  ;;  %v5655_v53 = vadd.f32 %v5565_v18, %v1572_v19  ;;  %v5658_v63 = vadd.f32 %v5569_v54, %v1573_v17  ;;  %v5661_v14 = vmul.f32 %v5118_v20, %v1356_v50 }
 0x186   : > { %v2202_v59 = vmul.f32 %v5646_v12, %v5646_v12  ;;  %v2203_v35 = vmul.f32 %v5649_v30, %v5649_v30  ;;  %v5668_v62 = vmul.f32 %v5118_v20, %v708_v34  ;;  %v1712_v58 = vadd.f32 %v5481_v25, %v5578_v31 }
 0x187   : > { %3923 = vmatmul.mubr.msk.bf16.gmra.mxu1 %vm304_vm0, %v2479_v22  ;;  %v1713_v18 = vadd.f32 %v5494_v16, %v5581_v2  ;;  %v5676_v54 = vmul.f32 %v5139_v26, %v743_v39  ;;  %v5679_v27 = vmul.f32 %v5139_v26, %v1501_v46  ;;  %v5682_v52 = vmul.f32 %v5263_v15, %v1356_v50 }
 0x188   : > { %v2234_v57 = vmul.f32 %v2202_v59, %v5646_v12  ;;  %v2235_v9 = vmul.f32 %v2203_v35, %v5649_v30  ;;  %v1782_v25 = vadd.f32 %v5508_v36, %v1712_v58  ;;  %v5688_v31 = vmul.f32 %v5263_v15, %v708_v34 }
 0x189   : > { %v1783_v16 = vadd.f32 %v5515_v1, %v1713_v18  ;;  %v5692_v2 = vmul.f32 %v5391_v45, %v743_v39  ;;  %v5695_v28 = vmul.f32 %v5391_v45, %v1501_v46  ;;  %v1962_v21 = vmul.f32 %v5286_v49, %v1534_v29 }
 0x18a   : > { %v2266_v13 = vmul.f32 0.044715, %v2234_v57  ;;  %v2267_v19 = vmul.f32 0.044715, %v2235_v9  ;;  %v1852_v5 = vadd.f32 %v5610_v60, %v1782_v25  ;;  %v1963_v48 = vmul.f32 %v5286_v49, %v1535_v32 }
 0x18b   : > { %v1853_v36 = vadd.f32 %v5613_v11, %v1783_v16  ;;  %v2032_v44 = vmul.f32 %v5419_v23, %v1356_v50  ;;  %v2033_v1 = vmul.f32 %v5419_v23, %v708_v34  ;;  %v2102_v40 = vmul.f32 %v5427_v4, %v743_v39  ;;  %v1536_v34 = vld [vmem:[#allocation2 + $0xd8] sm:$0xff] }
 0x18c   : > { %v4062_v17 = vpop.eup %4061  ;;  %v2298_v22 = vadd.f32 %v2266_v13, %v5646_v12  ;;  %v2299_v59 = vadd.f32 %v2267_v19, %v5649_v30  ;;  %v1922_v29 = vadd.f32 %v5616_v56, %v1852_v5  ;;  %v2103_v35 = vmul.f32 %v5427_v4, %v1501_v46  ;;  %v709_v13 = vld [vmem:[#allocation2 + $0xd7] sm:$0xff] }
 0x18d   : > { %v4064_v60 = vpop.eup %4063  ;;  %v2392_v58 = vadd.f32 1.0, %v4062_v17  ;;  %v1923_v32 = vadd.f32 %v5621_v43, %v1853_v36  ;;  %v782_v11 = vadd.s32 208, %v6790_v38  ;;  %v783_v50 = vadd.s32 216, %v6790_v38  ;;  %v746_v17 = vld [vmem:[#allocation2 + $0xe1] sm:$0xff] }
 0x18e   : > { %v2393_v18 = vadd.f32 1.0, %v4064_v60  ;;  %v2330_v39 = vmul.f32 0.7978846, %v2298_v22  ;;  %v2331_v57 = vmul.f32 0.7978846, %v2299_v59  ;;  %v1994_v9 = vadd.f32 %v1962_v21, %v1922_v29  ;;  %v710_v59 = vld [vmem:[#allocation2 + $0xdf] sm:$0xff] }
 0x18f   : > { %v2424_v25 = vmul.f32 0.5, %v2392_v58  ;;  %v1995_v16 = vadd.f32 %v1963_v48, %v1923_v32  ;;  %v978_v19 = vand.u32 15, %v782_v11  ;;  %v985_v56 = vand.u32 15, %v783_v50  ;;  %v745_v60 = vld [vmem:[#allocation2 + $0xd9] sm:$0xff] }
 0x190   : > { %v2425_v5 = vmul.f32 0.5, %v2393_v18  ;;  %4065 = vtanh.f32 %v2330_v39  ;;  %v2064_v46 = vadd.f32 %v2032_v44, %v1994_v9  ;;  %v1574_v43 = vmul.f32 %v5197_v51, %v1536_v34 }
 0x191   : > { %v2456_v36 = vmul.f32 %v2424_v25, %v5572_v6  ;;  %4067 = vtanh.f32 %v2331_v57  ;;  %v2065_v7 = vadd.f32 %v2033_v1, %v1995_v16  ;;  %vm1250_vm4 = vcmp.ne.s32.totalorder %v978_v19, 0 }
 0x192   : > { %v2457_v22 = vmul.f32 %v2425_v5, %v5575_v10  ;;  %v2134_v21 = vadd.f32 %v2102_v40, %v2064_v46  ;;  %v1358_v48 = vsel %vm1250_vm4, %v709_v13, 0.0  ;;  %vm1395_vm5 = vcmp.ne.s32.totalorder %v985_v56, 15 }
 0x193   : > { %v2135_v29 = vadd.f32 %v2103_v35, %v2065_v7  ;;  %v1503_v58 = vsel %vm1395_vm5, %v746_v17, 0.0  ;;  %v1575_v44 = vmul.f32 %v5197_v51, %v1537_v8  ;;  %v5716_v32 = vmul.f32 %v5107_v55, %v1536_v34 }
 0x194   : > { %v2480_v11 = vpack.c.bf16 %v2457_v22, %v2456_v36  ;;  %v5719_v6 = vadd.f32 %v5488_v61, %v2134_v21  ;;  %v5722_v1 = vmul.f32 %v5107_v55, %v1537_v8  ;;  %v5725_v10 = vadd.f32 %v5643_v47, %v1574_v43  ;;  %v5777_v43 = vld [vmem:[#allocation2 + $0xf0] sm:$0xff] }
 0x195   : > { %v5728_v40 = vadd.f32 %v5488_v61, %v2135_v29  ;;  %v5731_v7 = vadd.f32 %v5652_v3, %v1575_v44  ;;  %v5734_v35 = vmul.f32 %v5118_v20, %v1358_v48  ;;  %v5737_v50 = vmul.f32 %v5118_v20, %v710_v59 }
 0x196   : > { %3926 = vmatprep.mubr.msk.bf16.mxu1 %vm304_vm0, %v2480_v11  ;;  %v2204_v18 = vmul.f32 %v5719_v6, %v5719_v6  ;;  %v1714_v47 = vadd.f32 %v5586_v42, %v5655_v53  ;;  %v1715_v39 = vadd.f32 %v5589_v24, %v5658_v63  ;;  %v5747_v3 = vmul.f32 %v5139_v26, %v745_v60 }
 0x197   : > { %v2205_v57 = vmul.f32 %v5728_v40, %v5728_v40  ;;  %v5752_v20 = vmul.f32 %v5139_v26, %v1503_v58  ;;  %v5755_v9 = vmul.f32 %v5263_v15, %v1358_v48  ;;  %v5758_v25 = vmul.f32 %v5263_v15, %v710_v59 }
 0x198   : > { %v2236_v42 = vmul.f32 %v2204_v18, %v5719_v6  ;;  %v1784_v53 = vadd.f32 %v5601_v37, %v1714_v47  ;;  %v1785_v24 = vadd.f32 %v5604_v0, %v1715_v39  ;;  %v5764_v63 = vmul.f32 %v5391_v45, %v745_v60  ;;  %v5775_v0 = vld [vmem:[#allocation2 + $0xe8] sm:$0xff] }
 0x199   : > { %v2237_v16 = vmul.f32 %v2205_v57, %v5728_v40  ;;  %v5768_v13 = vmul.f32 %v5391_v45, %v1503_v58  ;;  %v1964_v19 = vmul.f32 %v5286_v49, %v1536_v34  ;;  %v1965_v56 = vmul.f32 %v5286_v49, %v1537_v8 }
 0x19a   : > { %v2268_v5 = vmul.f32 0.044715, %v2236_v42  ;;  %v1854_v46 = vadd.f32 %v5682_v52, %v1784_v53  ;;  %v1855_v17 = vadd.f32 %v5688_v31, %v1785_v24  ;;  %v2034_v37 = vmul.f32 %v5419_v23, %v1358_v48  ;;  %v711_v42 = vld [vmem:[#allocation2 + $0xe7] sm:$0xff] }
 0x19b   : > { %v2269_v36 = vmul.f32 0.044715, %v2237_v16  ;;  %v2035_v22 = vmul.f32 %v5419_v23, %v710_v59  ;;  %v2104_v21 = vmul.f32 %v5427_v4, %v745_v60  ;;  %v2105_v34 = vmul.f32 %v5427_v4, %v1503_v58 }
 0x19c   : > { %v2300_v8 = vadd.f32 %v2268_v5, %v5719_v6  ;;  %v1924_v29 = vadd.f32 %v5692_v2, %v1854_v46  ;;  %v1925_v52 = vadd.f32 %v5695_v28, %v1855_v17  ;;  %v784_v31 = vadd.s32 224, %v6790_v38  ;;  %v748_v17 = vld [vmem:[#allocation2 + $0xf1] sm:$0xff] }
 0x19d   : > { %v4066_v48 = vpop.eup %4065  ;;  %v2301_v44 = vadd.f32 %v2269_v36, %v5728_v40  ;;  %v785_v11 = vadd.s32 232, %v6790_v38  ;;  %v1576_v59 = vmul.f32 %v5197_v51, %v5775_v0  ;;  %v1577_v60 = vmul.f32 %v5197_v51, %v5777_v43 }
 0x19e   : > { %v4068_v58 = vpop.eup %4067  ;;  %v2394_v18 = vadd.f32 1.0, %v4066_v48  ;;  %v2332_v47 = vmul.f32 0.7978846, %v2300_v8  ;;  %v1996_v39 = vadd.f32 %v1964_v19, %v1924_v29  ;;  %v1997_v2 = vadd.f32 %v1965_v56, %v1925_v52  ;;  %v712_v19 = vld [vmem:[#allocation2 + $0xef] sm:$0xff] }
 0x19f   : > { %v2395_v57 = vadd.f32 1.0, %v4068_v58  ;;  %v2333_v28 = vmul.f32 0.7978846, %v2301_v44  ;;  %v992_v53 = vand.u32 15, %v784_v31  ;;  %v999_v24 = vand.u32 15, %v785_v11  ;;  %v747_v52 = vld [vmem:[#allocation2 + $0xe9] sm:$0xff] }
 0x1a0   : > { %v2426_v16 = vmul.f32 0.5, %v2394_v18  ;;  %4069 = vtanh.f32 %v2332_v47  ;;  %v2066_v5 = vadd.f32 %v2034_v37, %v1996_v39  ;;  %v2067_v46 = vadd.f32 %v2035_v22, %v1997_v2  ;;  %v5817_v11 = vld [vmem:[%s6657_s3] ss:$0 sm:$0xff] }
 0x1a1   : > { %v2427_v36 = vmul.f32 0.5, %v2395_v57  ;;  %4071 = vtanh.f32 %v2333_v28  ;;  %vm1252_vm6 = vcmp.ne.s32.totalorder %v992_v53, 0  ;;  %vm1397_vm7 = vcmp.ne.s32.totalorder %v999_v24, 15 }
 0x1a2   : > { %v2458_v33 = vmul.f32 %v2426_v16, %v5646_v12  ;;  %v2136_v48 = vadd.f32 %v2104_v21, %v2066_v5  ;;  %v2137_v8 = vadd.f32 %v2105_v34, %v2067_v46  ;;  %v1360_v56 = vsel %vm1252_vm6, %v711_v42, 0.0  ;;  %v5863_v16 = vld [vmem:[#allocation2 + $0xf8] sm:$0xff]  ;;  %v5865_v5 = vld [vmem:[#allocation2 + $0x100] sm:$0xff] }
 0x1a3   : > { %v2459_v29 = vmul.f32 %v2427_v36, %v5649_v30  ;;  %v1505_v31 = vsel %vm1397_vm7, %v748_v17, 0.0  ;;  %v5796_v44 = vmul.f32 %v5107_v55, %v5775_v0  ;;  %v5800_v37 = vmul.f32 %v5107_v55, %v5777_v43 }
 0x1a4   : > { %v5803_v22 = vadd.f32 %v5488_v61, %v2136_v48  ;;  %v5806_v12 = vadd.f32 %v5488_v61, %v2137_v8  ;;  %v5809_v21 = vadd.f32 %v5716_v32, %v1576_v59  ;;  %v5812_v30 = vadd.f32 %v5722_v1, %v1577_v60 }
 0x1a5   : > { %v2481_v34 = vpack.c.bf16 %v2459_v29, %v2458_v33  ;;  %v5820_v55 = vmul.f32 %v5817_v11, %v1360_v56  ;;  %v5823_v58 = vmul.f32 %v5817_v11, %v712_v19  ;;  %v1716_v18 = vadd.f32 %v5661_v14, %v5725_v10 }
 0x1a6   : > { %v2206_v32 = vmul.f32 %v5803_v22, %v5803_v22  ;;  %v2207_v33 = vmul.f32 %v5806_v12, %v5806_v12  ;;  %v1717_v1 = vadd.f32 %v5668_v62, %v5731_v7  ;;  %v5834_v59 = vmul.f32 %v5139_v26, %v747_v52 }
 0x1a7   : > { %3927 = vmatmul.mubr.msk.bf16.gmra.mxu1 %vm304_vm0, %v2481_v34  ;;  %v5838_v60 = vmul.f32 %v5139_v26, %v1505_v31  ;;  %v1786_v47 = vadd.f32 %v5676_v54, %v1716_v18  ;;  %v5842_v14 = vmul.f32 %v5263_v15, %v1360_v56  ;;  %v5845_v10 = vmul.f32 %v5263_v15, %v712_v19 }
 0x1a8   : > { %v2238_v39 = vmul.f32 %v2206_v32, %v5803_v22  ;;  %v2239_v62 = vmul.f32 %v2207_v33, %v5806_v12  ;;  %v1787_v7 = vadd.f32 %v5679_v27, %v1717_v1  ;;  %v5851_v2 = vmul.f32 %v5391_v45, %v747_v52 }
 0x1a9   : > { %v1856_v26 = vadd.f32 %v5755_v9, %v1786_v47  ;;  %v5855_v57 = vmul.f32 %v5391_v45, %v1505_v31  ;;  %v1966_v54 = vmul.f32 %v5286_v49, %v5775_v0  ;;  %v1967_v28 = vmul.f32 %v5286_v49, %v5777_v43 }
 0x1aa   : > { %v2270_v42 = vmul.f32 0.044715, %v2238_v39  ;;  %v2271_v53 = vmul.f32 0.044715, %v2239_v62  ;;  %v1857_v24 = vadd.f32 %v5758_v25, %v1787_v7  ;;  %v2036_v27 = vmul.f32 %v5419_v23, %v1360_v56 }
 0x1ab   : > { %v1926_v9 = vadd.f32 %v5764_v63, %v1856_v26  ;;  %v2037_v46 = vmul.f32 %v5419_v23, %v712_v19  ;;  %v2106_v17 = vmul.f32 %v5427_v4, %v747_v52  ;;  %v2107_v0 = vmul.f32 %v5427_v4, %v1505_v31  ;;  %v750_v26 = vld [vmem:[#allocation2 + $0x101] sm:$0xff] }
 0x1ac   : > { %v2302_v43 = vadd.f32 %v2270_v42, %v5803_v22  ;;  %v2303_v36 = vadd.f32 %v2271_v53, %v5806_v12  ;;  %v1927_v25 = vadd.f32 %v5768_v13, %v1857_v24  ;;  %v786_v48 = vadd.s32 240, %v6790_v38  ;;  %v713_v13 = vld [vmem:[#allocation2 + $0xf7] sm:$0xff] }
 0x1ad   : > { %v4070_v8 = vpop.eup %4069  ;;  %v1998_v56 = vadd.f32 %v1966_v54, %v1926_v9  ;;  %v787_v29 = vadd.s32 248, %v6790_v38  ;;  %v1578_v63 = vmul.f32 %v5197_v51, %v5863_v16  ;;  %v1579_v19 = vmul.f32 %v5197_v51, %v5865_v5  ;;  %v5883_v54 = vld [vmem:[%s6657_s3 + $0x1] ss:$0 sm:$0xff] }
 0x1ae   : > { %v4072_v52 = vpop.eup %4071  ;;  %v2396_v31 = vadd.f32 1.0, %v4070_v8  ;;  %v2334_v34 = vmul.f32 0.7978846, %v2302_v43  ;;  %v2335_v18 = vmul.f32 0.7978846, %v2303_v36  ;;  %v1999_v32 = vadd.f32 %v1967_v28, %v1927_v25  ;;  %v749_v36 = vld [vmem:[#allocation2 + $0xf9] sm:$0xff] }
 0x1af   : > { %v2397_v33 = vadd.f32 1.0, %v4072_v52  ;;  %v2068_v1 = vadd.f32 %v2036_v27, %v1998_v56  ;;  %v1006_v47 = vand.u32 15, %v786_v48  ;;  %v1013_v39 = vand.u32 15, %v787_v29  ;;  %v714_v27 = vld [vmem:[#allocation2 + $0xff] sm:$0xff] }
 0x1b0   : > { %v2428_v62 = vmul.f32 0.5, %v2396_v31  ;;  %4073 = vtanh.f32 %v2334_v34  ;;  %v2069_v7 = vadd.f32 %v2037_v46, %v1999_v32  ;;  %v5887_v51 = vmul.f32 %v5883_v54, %v5863_v16 }
 0x1b1   : > { %v2429_v42 = vmul.f32 0.5, %v2397_v33  ;;  %4075 = vtanh.f32 %v2335_v18  ;;  %v2138_v28 = vadd.f32 %v2106_v17, %v2068_v1  ;;  %vm1254_vm8 = vcmp.ne.s32.totalorder %v1006_v47, 0 }
 0x1b2   : > { %v2460_v53 = vmul.f32 %v2428_v62, %v5719_v6  ;;  %v2139_v24 = vadd.f32 %v2107_v0, %v2069_v7  ;;  %v1362_v9 = vsel %vm1254_vm8, %v713_v13, 0.0  ;;  %vm1399_vm9 = vcmp.ne.s32.totalorder %v1013_v39, 15  ;;  %v1542_v7 = vld [vmem:[#allocation2 + $0x108] sm:$0xff] }
 0x1b3   : > { %v2461_v46 = vmul.f32 %v2429_v42, %v5728_v40  ;;  %v5892_v43 = vadd.f32 %v5488_v61, %v2138_v28  ;;  %v1507_v25 = vsel %vm1399_vm9, %v750_v26, 0.0  ;;  %v5896_v48 = vmul.f32 %v5883_v54, %v5865_v5  ;;  %v1543_v26 = vld [vmem:[#allocation2 + $0x110] sm:$0xff] }
 0x1b4   : > { %v5899_v17 = vadd.f32 %v5488_v61, %v2139_v24  ;;  %v5902_v6 = vadd.f32 %v5796_v44, %v1578_v63  ;;  %v5905_v0 = vadd.f32 %v5800_v37, %v1579_v19  ;;  %v5908_v40 = vmul.f32 %v5817_v11, %v1362_v9  ;;  %v5924_v63 = vld [vmem:[%s6657_s3 + $0x2] ss:$0 sm:$0xff] }
 0x1b5   : > { %v2482_v8 = vpack.c.bf16 %v2461_v46, %v2460_v53  ;;  %v2208_v56 = vmul.f32 %v5892_v43, %v5892_v43  ;;  %v5913_v29 = vmul.f32 %v5817_v11, %v714_v27  ;;  %v1718_v52 = vadd.f32 %v5734_v35, %v5809_v21  ;;  %v5968_v46 = vld [vmem:[%s6657_s3 + $0x4] ss:$0 sm:$0xff] }
 0x1b6   : > { %v2209_v44 = vmul.f32 %v5899_v17, %v5899_v17  ;;  %v1719_v37 = vadd.f32 %v5737_v50, %v5812_v30  ;;  %v5927_v19 = vmul.f32 %v5924_v63, %v749_v36  ;;  %v5930_v31 = vmul.f32 %v5924_v63, %v1507_v25 }
 0x1b7   : > { %3930 = vmatprep.mubr.msk.bf16.mxu1 %vm304_vm0, %v2482_v8  ;;  %v2240_v35 = vmul.f32 %v2208_v56, %v5892_v43  ;;  %v1788_v21 = vadd.f32 %v5747_v3, %v1718_v52  ;;  %v5936_v34 = vmul.f32 %v5263_v15, %v1362_v9  ;;  %v5939_v50 = vmul.f32 %v5263_v15, %v714_v27  ;;  %v715_v52 = vld [vmem:[#allocation2 + $0x107] sm:$0xff] }
 0x1b8   : > { %v2241_v30 = vmul.f32 %v2209_v44, %v5899_v17  ;;  %v1789_v18 = vadd.f32 %v5752_v20, %v1719_v37  ;;  %v5944_v32 = vmul.f32 %v5391_v45, %v749_v36  ;;  %v5947_v33 = vmul.f32 %v5391_v45, %v1507_v25 }
 0x1b9   : > { %v2272_v1 = vmul.f32 0.044715, %v2240_v35  ;;  %v1858_v13 = vadd.f32 %v5842_v14, %v1788_v21  ;;  %v1968_v3 = vmul.f32 %v5286_v49, %v5863_v16  ;;  %v1969_v15 = vmul.f32 %v5286_v49, %v5865_v5  ;;  %v752_v21 = vld [vmem:[#allocation2 + $0x111] sm:$0xff] }
 0x1ba   : > { %v2273_v47 = vmul.f32 0.044715, %v2241_v30  ;;  %v1859_v39 = vadd.f32 %v5845_v10, %v1789_v18  ;;  %v2038_v20 = vmul.f32 %v5419_v23, %v1362_v9  ;;  %v2039_v62 = vmul.f32 %v5419_v23, %v714_v27 }
 0x1bb   : > { %v2304_v42 = vadd.f32 %v2272_v1, %v5892_v43  ;;  %v1928_v28 = vadd.f32 %v5851_v2, %v1858_v13  ;;  %v2108_v14 = vmul.f32 %v5427_v4, %v749_v36  ;;  %v2109_v16 = vmul.f32 %v5427_v4, %v1507_v25 }
 0x1bc   : > { %v2305_v53 = vadd.f32 %v2273_v47, %v5899_v17  ;;  %v1929_v49 = vadd.f32 %v5855_v57, %v1859_v39  ;;  %v788_v10 = vadd.s32 256, %v6790_v38  ;;  %v789_v5 = vadd.s32 264, %v6790_v38  ;;  %v716_v47 = vld [vmem:[#allocation2 + $0x10f] sm:$0xff] }
 0x1bd   : > { %v4074_v24 = vpop.eup %4073  ;;  %v2336_v27 = vmul.f32 0.7978846, %v2304_v42  ;;  %v2000_v9 = vadd.f32 %v1968_v3, %v1928_v28  ;;  %v1580_v2 = vmul.f32 %v5968_v46, %v1542_v7  ;;  %v1581_v36 = vmul.f32 %v5968_v46, %v1543_v26 }
 0x1be   : > { %v4076_v25 = vpop.eup %4075  ;;  %v2398_v8 = vadd.f32 1.0, %v4074_v24  ;;  %v2337_v56 = vmul.f32 0.7978846, %v2305_v53  ;;  %v2001_v57 = vadd.f32 %v1969_v15, %v1929_v49  ;;  %v1020_v44 = vand.u32 15, %v788_v10  ;;  %v751_v15 = vld [vmem:[#allocation2 + $0x109] sm:$0xff] }
 0x1bf   : > { %v2399_v37 = vadd.f32 1.0, %v4076_v25  ;;  %4077 = vtanh.f32 %v2336_v27  ;;  %v2070_v35 = vadd.f32 %v2038_v20, %v2000_v9  ;;  %v1027_v30 = vand.u32 15, %v789_v5  ;;  %v6012_v9 = vld [vmem:[%s6657_s3 + $0x7] ss:$0 sm:$0xff] }
 0x1c0   : > { %v2430_v18 = vmul.f32 0.5, %v2398_v8  ;;  %4079 = vtanh.f32 %v2337_v56  ;;  %v2071_v1 = vadd.f32 %v2039_v62, %v2001_v57  ;;  %vm1256_vm10 = vcmp.ne.s32.totalorder %v1020_v44, 0 }
 0x1c1   : > { %v2431_v13 = vmul.f32 0.5, %v2399_v37  ;;  %v2140_v3 = vadd.f32 %v2108_v14, %v2070_v35  ;;  %v1364_v39 = vsel %vm1256_vm10, %v715_v52, 0.0  ;;  %vm1401_vm11 = vcmp.ne.s32.totalorder %v1027_v30, 15 }
 0x1c2   : > { %v2462_v42 = vmul.f32 %v2430_v18, %v5803_v22  ;;  %v2141_v28 = vadd.f32 %v2109_v16, %v2071_v1  ;;  %v1509_v53 = vsel %vm1401_vm11, %v752_v21, 0.0  ;;  %v1652_v49 = vadd.f32 %v5887_v51, %v1580_v2  ;;  %v5989_v51 = vld [vmem:[%s6657_s3 + $0x3] ss:$0 sm:$0xff] }
 0x1c3   : > { %v2463_v20 = vmul.f32 %v2431_v13, %v5806_v12  ;;  %v5976_v10 = vadd.f32 %v5488_v61, %v2140_v3  ;;  %v1653_v62 = vadd.f32 %v5896_v48, %v1581_v36  ;;  %v1720_v14 = vadd.f32 %v5820_v55, %v5902_v6 }
 0x1c4   : > { %v5982_v5 = vadd.f32 %v5488_v61, %v2141_v28  ;;  %v1721_v22 = vadd.f32 %v5823_v58, %v5905_v0  ;;  %v5992_v12 = vmul.f32 %v5989_v51, %v1364_v39  ;;  %v5995_v16 = vmul.f32 %v5989_v51, %v716_v47 }
 0x1c5   : > { %v2483_v48 = vpack.c.bf16 %v2463_v20, %v2462_v42  ;;  %v2210_v55 = vmul.f32 %v5976_v10, %v5976_v10  ;;  %v1790_v6 = vadd.f32 %v5834_v59, %v1720_v14  ;;  %v6001_v24 = vmul.f32 %v5391_v45, %v751_v15 }
 0x1c6   : > { %v2211_v58 = vmul.f32 %v5982_v5, %v5982_v5  ;;  %v1791_v0 = vadd.f32 %v5838_v60, %v1721_v22  ;;  %v6007_v27 = vmul.f32 %v5391_v45, %v1509_v53  ;;  %v1970_v2 = vmul.f32 %v6012_v9, %v1542_v7  ;;  %v1934_v22 = vld [vmem:[#allocation2 + $0x118] sm:$0xff] }
 0x1c7   : > { %3931 = vmatmul.mubr.msk.bf16.gmra.mxu1 %vm304_vm0, %v2483_v48  ;;  %v2242_v59 = vmul.f32 %v2210_v55, %v5976_v10  ;;  %v1860_v36 = vadd.f32 %v5936_v34, %v1790_v6  ;;  %v1971_v25 = vmul.f32 %v6012_v9, %v1543_v26  ;;  %v2040_v60 = vmul.f32 %v5419_v23, %v1364_v39  ;;  %v1935_v48 = vld [vmem:[#allocation2 + $0x120] sm:$0xff] }
 0x1c8   : > { %v2243_v45 = vmul.f32 %v2211_v58, %v5982_v5  ;;  %v1861_v8 = vadd.f32 %v5939_v50, %v1791_v0  ;;  %v2041_v56 = vmul.f32 %v5419_v23, %v716_v47  ;;  %v2110_v57 = vmul.f32 %v5427_v4, %v751_v15  ;;  %v717_v23 = vld [vmem:[#allocation2 + $0x117] sm:$0xff]  ;;  %v754_v15 = vld [vmem:[#allocation2 + $0x121] sm:$0xff] }
 0x1c9   : > { %v2274_v52 = vmul.f32 0.044715, %v2242_v59  ;;  %v1930_v7 = vadd.f32 %v5944_v32, %v1860_v36  ;;  %v2111_v44 = vmul.f32 %v5427_v4, %v1509_v53  ;;  %v790_v37 = vadd.s32 272, %v6790_v38  ;;  %v718_v59 = vld [vmem:[#allocation2 + $0x11f] sm:$0xff] }
 0x1ca   : > { %v2275_v34 = vmul.f32 0.044715, %v2243_v45  ;;  %v1931_v26 = vadd.f32 %v5947_v33, %v1861_v8  ;;  %v791_v35 = vadd.s32 280, %v6790_v38  ;;  %v1722_v21 = vadd.f32 %v5908_v40, %v1652_v49  ;;  %v753_v36 = vld [vmem:[#allocation2 + $0x119] sm:$0xff] }
 0x1cb   : > { %v2306_v50 = vadd.f32 %v2274_v52, %v5976_v10  ;;  %v2002_v30 = vadd.f32 %v1970_v2, %v1930_v7  ;;  %v1034_v18 = vand.u32 15, %v790_v37  ;;  %v1723_v1 = vadd.f32 %v5913_v29, %v1653_v62  ;;  %v6074_v37 = vld [vmem:[%s6657_s3 + $0x8] ss:$0 sm:$0xff] }
 0x1cc   : > { %v4078_v13 = vpop.eup %4077  ;;  %v2307_v32 = vadd.f32 %v2275_v34, %v5982_v5  ;;  %v2003_v4 = vadd.f32 %v1971_v25, %v1931_v26  ;;  %v1041_v3 = vand.u32 15, %v791_v35  ;;  %v1792_v47 = vadd.f32 %v5927_v19, %v1722_v21 }
 0x1cd   : > { %v4080_v39 = vpop.eup %4079  ;;  %v2400_v33 = vadd.f32 1.0, %v4078_v13  ;;  %v2338_v42 = vmul.f32 0.7978846, %v2306_v50  ;;  %v2072_v28 = vadd.f32 %v2040_v60, %v2002_v30  ;;  %vm6034_vm12 = vcmp.ne.s32.totalorder %v1034_v18, 0  ;;  %v6798_v18 = vld [vmem:[#allocation4_spill] sm:$0xff] }
 0x1ce   : > { %v2401_v53 = vadd.f32 1.0, %v4080_v39  ;;  %v2339_v49 = vmul.f32 0.7978846, %v2307_v32  ;;  %v2073_v20 = vadd.f32 %v2041_v56, %v2003_v4  ;;  %v1366_v29 = vsel %vm6034_vm12, %v717_v23, 0.0 }
 0x1cf   : > { %v2432_v62 = vmul.f32 0.5, %v2400_v33  ;;  %4081 = vtanh.f32 %v2338_v42  ;;  %v2142_v14 = vadd.f32 %v2110_v57, %v2072_v28  ;;  %vm6040_vm13 = vcmp.ne.s32.totalorder %v1041_v3, 15 }
 0x1d0   : > { %v2433_v55 = vmul.f32 0.5, %v2401_v53  ;;  %4083 = vtanh.f32 %v2339_v49  ;;  %v2143_v6 = vadd.f32 %v2111_v44, %v2073_v20  ;;  %v1511_v58 = vsel %vm6040_vm13, %v754_v15, 0.0  ;;  %v6803_v53 = vld [vmem:[#allocation12_spill] sm:$0xff]  ;;  %v6804_v20 = vld [vmem:[#allocation13_spill] sm:$0xff] }
 0x1d1   : > { %v2464_v0 = vmul.f32 %v2432_v62, %v5892_v43  ;;  %v6048_v2 = vadd.f32 %v5488_v61, %v2142_v14  ;;  %v1793_v25 = vadd.f32 %v5930_v31, %v1723_v1  ;;  %v1862_v60 = vadd.f32 %v5992_v12, %v1792_v47  ;;  %v6065_v31 = vld [vmem:[%s6657_s3 + $0x6] ss:$0 sm:$0xff]  ;;  %v6800_v47 = vld [vmem:[#allocation6_spill] sm:$0xff]  ;;  %v6805_v62 = vld [vmem:[#allocation19_spill] sm:$0xff] }
 0x1d2   : > { %v2465_v45 = vmul.f32 %v2433_v55, %v5899_v17  ;;  %v6054_v8 = vadd.f32 %v5488_v61, %v2143_v6  ;;  %v1972_v56 = vmul.f32 %v6012_v9, %v1934_v22  ;;  %v1973_v57 = vmul.f32 %v6012_v9, %v1935_v48  ;;  %v6110_v48 = vld [vmem:[%s6658_s4] ss:$0 sm:$0xff]  ;;  %v6806_v6 = vld [vmem:[#allocation16_spill] sm:$0xff] }
 0x1d3   : > { %v2212_v43 = vmul.f32 %v6048_v2, %v6048_v2  ;;  %v1863_v52 = vadd.f32 %v5995_v16, %v1793_v25  ;;  %v1932_v7 = vadd.f32 %v6001_v24, %v1862_v60  ;;  %v2042_v17 = vmul.f32 %v6065_v31, %v1366_v29 }
 0x1d4   : > { %v2484_v61 = vpack.c.bf16 %v2465_v45, %v2464_v0  ;;  %v2213_v12 = vmul.f32 %v6054_v8, %v6054_v8  ;;  %v2043_v44 = vmul.f32 %v6065_v31, %v718_v59  ;;  %v2112_v16 = vmul.f32 %v6074_v37, %v753_v36 }
 0x1d5   : > { %v6795_v24 = vand.u32 7, %v4325_v41  ;;  %v2244_v26 = vmul.f32 %v2212_v43, %v6048_v2  ;;  %v1933_v35 = vadd.f32 %v6007_v27, %v1863_v52  ;;  %v2004_v21 = vadd.f32 %v1972_v56, %v1932_v7  ;;  %v6799_v41 = vld [vmem:[#allocation5_spill] sm:$0xff]  ;;  %v2890_v7 = vld [vmem:[#allocation2 + $0x29] sm:$0xff] }
 0x1d6   : > { %v2113_v50 = vmul.f32 %v6074_v37, %v1511_v58  ;;  %3934 = vmatprep.mubr.msk.bf16.mxu1 %vm304_vm0, %v2484_v61  ;;  %v2245_v30 = vmul.f32 %v2213_v12, %v6054_v8  ;;  %v2900_v23 = vand.u32 7, %v6790_v38  ;;  %v2907_v1 = vand.u32 7, %v6798_v18  ;;  %v2889_v52 = vld [vmem:[#allocation2 + $0x21] sm:$0xff] }
 0x1d7   : > { %vm6079_vm14 = vcmp.ne.s32.totalorder %v6795_v24, 7  ;;  %v2914_v13 = vand.u32 7, %v6799_v41  ;;  %v2276_v32 = vmul.f32 0.044715, %v2244_v26  ;;  %v2005_v4 = vadd.f32 %v1973_v57, %v1933_v35  ;;  %v6813_v61 = vld [vmem:[#allocation18_spill] sm:$0xff] }
 0x1d8   : > { %v2074_v3 = vadd.f32 %v2042_v17, %v2004_v21  ;;  %v2921_v39 = vand.u32 7, %v6800_v47  ;;  %v2277_v33 = vmul.f32 0.044715, %v2245_v30  ;;  %vm6092_vm15 = vcmp.ne.s32.totalorder %v2900_v23, 0  ;;  %v6814_v26 = vld [vmem:[#allocation14_spill] sm:$0xff]  ;;  %v6144_v21 = vld [vmem:[#allocation2 + $0x20] sm:$0xff] }
 0x1d9   : > { %vm3017_vm3 = vcmp.ne.s32.totalorder %v2907_v1, 0  ;;  %vm3018_vm4 = vcmp.ne.s32.totalorder %v2914_v13, 0  ;;  %v2308_v42 = vadd.f32 %v2276_v32, %v6048_v2  ;;  %v2075_v28 = vadd.f32 %v2043_v44, %v2005_v4 }
 0x1da   : > { %v2144_v15 = vadd.f32 %v2112_v16, %v2074_v3  ;;  %vm3019_vm5 = vcmp.ne.s32.totalorder %v2921_v39, 0  ;;  %v2309_v40 = vadd.f32 %v2277_v33, %v6054_v8  ;;  %v3046_v49 = vsel %vm6092_vm15, %v6803_v53, 0.0  ;;  %v6818_v53 = vld [vmem:[#allocation24_spill] sm:$0xff] }
 0x1db   : > { %v6102_v29 = vsel %vm3017_vm3, %v6804_v20, 0.0  ;;  %v6105_v14 = vsel %vm3018_vm4, %v6805_v62, 0.0  ;;  %v2340_v19 = vmul.f32 0.7978846, %v2308_v42  ;;  %v2145_v22 = vadd.f32 %v2113_v50, %v2075_v28  ;;  %v6146_v50 = vld [vmem:[#allocation2 + $0x28] sm:$0xff]  ;;  %v6817_v42 = vld [vmem:[#allocation23_spill] sm:$0xff] }
 0x1dc   : > { %v6113_v55 = vadd.f32 %v6110_v48, %v2144_v15  ;;  %v6116_v58 = vsel %vm3019_vm5, %v6806_v6, 0.0  ;;  %v4082_v0 = vpop.eup %4081  ;;  %v2341_v59 = vmul.f32 0.7978846, %v2309_v40  ;;  %vm6118_vm6 = vcmp.ne.s32.totalorder %v2900_v23, 7  ;;  %v6815_v23 = vld [vmem:[#allocation17_spill] sm:$0xff] }
 0x1dd   : > { %vm6122_vm7 = vcmp.ne.s32.totalorder %v2907_v1, 7  ;;  %vm6126_vm8 = vcmp.ne.s32.totalorder %v2914_v13, 7  ;;  %v4084_v45 = vpop.eup %4083  ;;  %v2402_v56 = vadd.f32 1.0, %v4082_v0  ;;  %4085 = vtanh.f32 %v2340_v19 }
 0x1de   : > { %v6131_v57 = vadd.f32 %v6110_v48, %v2145_v22  ;;  %v2214_v43 = vmul.f32 %v6113_v55, %v6113_v55  ;;  %v2403_v17 = vadd.f32 1.0, %v4084_v45  ;;  %4087 = vtanh.f32 %v2341_v59 }
 0x1df   : > { %vm3059_vm9 = vcmp.ne.s32.totalorder %v2921_v39, 7  ;;  %v3086_v12 = vsel %vm6118_vm6, %v6813_v61, 0.0  ;;  %v2434_v44 = vmul.f32 0.5, %v2402_v56  ;;  %v3087_v35 = vsel %vm6122_vm7, %v6814_v26, 0.0  ;;  %v6816_v39 = vld [vmem:[#allocation15_spill] sm:$0xff] }
 0x1e0   : > { %v2215_v16 = vmul.f32 %v6131_v57, %v6131_v57  ;;  %v2246_v24 = vmul.f32 %v2214_v43, %v6113_v55  ;;  %v2435_v30 = vmul.f32 0.5, %v2403_v17  ;;  %v6151_v1 = vsel %vm6126_vm8, %v6815_v23, 0.0  ;;  %v6819_v17 = vld [vmem:[#allocation7_spill] sm:$0xff] }
 0x1e1   : > { %v6153_v13 = vsel %vm3059_vm9, %v2889_v52, 0.0  ;;  %v6157_v32 = vsel %vm6079_vm14, %v2890_v7, 0.0  ;;  %v2466_v4 = vmul.f32 %v2434_v44, %v5976_v10  ;;  %v3104_v33 = vmul.f32 %v5968_v46, %v6816_v39 }
 0x1e2   : > { %v2247_v3 = vmul.f32 %v2215_v16, %v6131_v57  ;;  %v2278_v47 = vmul.f32 0.044715, %v2246_v24  ;;  %v2467_v27 = vmul.f32 %v2435_v30, %v5982_v5  ;;  %v3105_v28 = vmul.f32 %v5968_v46, %v6817_v42 }
 0x1e3   : > { %v3106_v15 = vmul.f32 %v5968_v46, %v6144_v21  ;;  %v3107_v34 = vmul.f32 %v5968_v46, %v6146_v50  ;;  %v3113_v20 = vmul.f32 %v5883_v54, %v6818_v53  ;;  %v3114_v62 = vmul.f32 %v5883_v54, %v6816_v39 }
 0x1e4   : > { %v2279_v40 = vmul.f32 0.044715, %v2247_v3  ;;  %v2310_v10 = vadd.f32 %v2278_v47, %v6113_v55  ;;  %v2485_v19 = vpack.c.bf16 %v2467_v27, %v2466_v4  ;;  %v3115_v5 = vmul.f32 %v5883_v54, %v6817_v42 }
 0x1e5   : > { %v3116_v22 = vmul.f32 %v5883_v54, %v6144_v21  ;;  %v3129_v6 = vmul.f32 %v5817_v11, %v3046_v49  ;;  %v3121_v36 = vadd.f32 %v3113_v20, %v3104_v33  ;;  %v3122_v25 = vadd.f32 %v3114_v62, %v3105_v28 }
 0x1e6   : > { %v2311_v0 = vadd.f32 %v2279_v40, %v6131_v57  ;;  %v2342_v59 = vmul.f32 0.7978846, %v2310_v10  ;;  %3935 = vmatmul.mubr.msk.bf16.gmra.mxu1 %vm304_vm0, %v2485_v19  ;;  %v3123_v60 = vadd.f32 %v3115_v5, %v3106_v15  ;;  %v3130_v56 = vmul.f32 %v5817_v11, %v6102_v29 }
 0x1e7   : > { %v3124_v45 = vadd.f32 %v3116_v22, %v3107_v34  ;;  %v3131_v43 = vmul.f32 %v5817_v11, %v6105_v14  ;;  %v3132_v49 = vmul.f32 %v5817_v11, %v6116_v58  ;;  %v3137_v7 = vadd.f32 %v3129_v6, %v3121_v36  ;;  %v6215_v22 = vld [vmem:[%s6657_s3 + $0x5] ss:$0 sm:$0xff] }
 0x1e8   : > { %v2343_v52 = vmul.f32 0.7978846, %v2311_v0  ;;  %4089 = vtanh.f32 %v2342_v59  ;;  %v6820_v61 = vand.u32 7, %v6819_v17  ;;  %v3138_v26 = vadd.f32 %v3130_v56, %v3122_v25  ;;  %v6826_v59 = vld [vmem:[#allocation21_spill] sm:$0xff] }
 0x1e9   : > { %v3139_v30 = vadd.f32 %v3131_v43, %v3123_v60  ;;  %v3145_v23 = vmul.f32 %v5924_v63, %v3086_v12  ;;  %v3146_v4 = vmul.f32 %v5924_v63, %v3087_v35  ;;  %v3140_v3 = vadd.f32 %v3132_v49, %v3124_v45 }
 0x1ea   : > { %vm6190_vm10 = vcmp.ne.s32.totalorder %v6820_v61, 0  ;;  %v6823_v16 = vmov %v6820_v61  ;;  %4091 = vtanh.f32 %v2343_v52  ;;  %v3147_v47 = vmul.f32 %v5924_v63, %v6151_v1  ;;  %v4086_v33 = vpop.eup %4085 }
 0x1eb   : > { %vm6196_vm11 = vcmp.ne.s32.totalorder %v6823_v16, 7  ;;  %v3148_v39 = vmul.f32 %v5924_v63, %v6153_v13  ;;  %v3153_v27 = vadd.f32 %v3145_v23, %v3137_v7  ;;  %v3154_v28 = vadd.f32 %v3146_v4, %v3138_v26  ;;  %v4088_v12 = vpop.eup %4087  ;;  %v2891_v23 = vld [vmem:[#allocation2 + $0x31] sm:$0xff] }
 0x1ec   : > { %v3161_v15 = vmul.f32 %v5989_v51, %v6102_v29  ;;  %v3162_v34 = vmul.f32 %v5989_v51, %v6105_v14  ;;  %v2404_v40 = vadd.f32 1.0, %v4086_v33  ;;  %v3155_v10 = vadd.f32 %v3147_v47, %v3139_v30  ;;  %v2881_v30 = vld [vmem:[#allocation2 + $0x2f] sm:$0xff] }
 0x1ed   : > { %v3156_v53 = vadd.f32 %v3148_v39, %v3140_v3  ;;  %v3163_v20 = vmul.f32 %v5989_v51, %v6116_v58  ;;  %v2405_v62 = vadd.f32 1.0, %v4088_v12  ;;  %v3177_v29 = vmul.f32 %v6215_v22, %v3087_v35  ;;  %v6237_v47 = vld [vmem:[#allocation2 + $0x30] sm:$0xff] }
 0x1ee   : > { %v3169_v19 = vadd.f32 %v3161_v15, %v3153_v27  ;;  %v3170_v5 = vadd.f32 %v3162_v34, %v3154_v28  ;;  %v2436_v6 = vmul.f32 0.5, %v2404_v40  ;;  %v3178_v25 = vmul.f32 %v6215_v22, %v6151_v1 }
 0x1ef   : > { %v3171_v0 = vadd.f32 %v3163_v20, %v3155_v10  ;;  %v3172_v36 = vadd.f32 %v6826_v59, %v3156_v53  ;;  %v2437_v60 = vmul.f32 0.5, %v2405_v62  ;;  %v3179_v45 = vmul.f32 %v6215_v22, %v6153_v13 }
 0x1f0   : > { %v3180_v56 = vmul.f32 %v6215_v22, %v6157_v32  ;;  %v3185_v43 = vadd.f32 %v3177_v29, %v3169_v19  ;;  %v2468_v52 = vmul.f32 %v2436_v6, %v6048_v2  ;;  %v3186_v49 = vadd.f32 %v3178_v25, %v3170_v5  ;;  %v6828_v5 = vld [vmem:[#allocation8_spill] sm:$0xff]  ;;  %v6829_v6 = vld [vmem:[#allocation9_spill] sm:$0xff] }
 0x1f1   : > { %v3194_v35 = vmul.f32 %v6012_v9, %v6817_v42  ;;  %v3195_v7 = vmul.f32 %v6012_v9, %v6144_v21  ;;  %v2469_v17 = vmul.f32 %v2437_v60, %v6054_v8  ;;  %v3187_v61 = vadd.f32 %v3179_v45, %v3171_v0  ;;  %v2882_v45 = vld [vmem:[#allocation2 + $0x37] sm:$0xff] }
 0x1f2   : > { %v3188_v16 = vadd.f32 %v3180_v56, %v3172_v36  ;;  %v3196_v26 = vmul.f32 %v6012_v9, %v6146_v50  ;;  %v3210_v2 = vmul.f32 %v6065_v31, %v6105_v14  ;;  %v3211_v42 = vmul.f32 %v6065_v31, %v6116_v58  ;;  %v2883_v56 = vld [vmem:[#allocation2 + $0x3f] sm:$0xff] }
 0x1f3   : > { %v3202_v4 = vadd.f32 %v3194_v35, %v3185_v43  ;;  %v3203_v3 = vadd.f32 %v3195_v7, %v3186_v49  ;;  %v2486_v21 = vpack.c.bf16 %v2469_v17, %v2468_v52  ;;  %v3226_v8 = vmul.f32 %v6074_v37, %v6151_v1 }
 0x1f4   : > { %v3204_v39 = vadd.f32 %v3196_v26, %v3187_v61  ;;  %v3227_v33 = vmul.f32 %v6074_v37, %v6153_v13  ;;  %v6245_v15 = vsel %vm6190_vm10, %v2881_v30, 0.0  ;;  %v6249_v14 = vsel %vm6196_vm11, %v2891_v23, 0.0  ;;  %v6827_v13 = vld [vmem:[#allocation22_spill] sm:$0xff]  ;;  %v2892_v61 = vld [vmem:[#allocation2 + $0x39] sm:$0xff] }
 0x1f5   : > { %v3218_v27 = vadd.f32 %v3210_v2, %v3202_v4  ;;  %v3219_v28 = vadd.f32 %v3211_v42, %v3203_v3  ;;  %v4090_v58 = vpop.eup %4089  ;;  %3938 = vmatprep.mubr.msk.bf16.mxu1 %vm304_vm0, %v2486_v21  ;;  %v3197_v34 = vmul.f32 %v6012_v9, %v6237_v47  ;;  %v3213_v1 = vmul.f32 %v6065_v31, %v6245_v15  ;;  %v2893_v30 = vld [vmem:[#allocation2 + $0x41] sm:$0xff]  ;;  %v3101_v42 = vld [vmem:[#allocation2 + $0x38] sm:$0xff] }
 0x1f6   : > { %v3220_v12 = vadd.f32 %v6827_v13, %v3204_v39  ;;  %v3228_v44 = vmul.f32 %v6074_v37, %v6157_v32  ;;  %v2406_v40 = vadd.f32 1.0, %v4090_v58  ;;  %v3229_v24 = vmul.f32 %v6074_v37, %v6249_v14 }
 0x1f7   : > { %v3234_v10 = vadd.f32 %v3226_v8, %v3218_v27  ;;  %v3235_v53 = vadd.f32 %v3227_v33, %v3219_v28  ;;  %v4092_v20 = vpop.eup %4091  ;;  %v3205_v62 = vadd.f32 %v3197_v34, %v3188_v16  ;;  %v2942_v29 = vand.u32 7, %v6828_v5  ;;  %v3102_v33 = vld [vmem:[#allocation2 + $0x40] sm:$0xff] }
 0x1f8   : > { %v3236_v19 = vadd.f32 %v3228_v44, %v3220_v12  ;;  %v2949_v0 = vand.u32 7, %v6829_v6  ;;  %v2407_v59 = vadd.f32 1.0, %v4092_v20  ;;  %v2438_v36 = vmul.f32 0.5, %v2406_v40 }
 0x1f9   : > { %v6264_v25 = vadd.f32 %v6110_v48, %v3234_v10  ;;  %v6267_v60 = vadd.f32 %v6110_v48, %v3235_v53  ;;  %v3221_v43 = vadd.f32 %v3213_v1, %v3205_v62  ;;  %vm3022_vm12 = vcmp.ne.s32.totalorder %v2942_v29, 0 }
 0x1fa   : > { %v6270_v52 = vadd.f32 %v6110_v48, %v3236_v19  ;;  %vm3023_vm13 = vcmp.ne.s32.totalorder %v2949_v0, 0  ;;  %v2439_v49 = vmul.f32 0.5, %v2407_v59  ;;  %v2470_v35 = vmul.f32 %v2438_v36, %v6113_v55 }
 0x1fb   : > { %v3250_v7 = vmul.f32 %v6264_v25, %v6264_v25  ;;  %v3251_v17 = vmul.f32 %v6267_v60, %v6267_v60  ;;  %v3237_v16 = vadd.f32 %v3229_v24, %v3221_v43  ;;  %v6279_v23 = vsel %vm3022_vm12, %v2882_v45, 0.0 }
 0x1fc   : > { %v3252_v26 = vmul.f32 %v6270_v52, %v6270_v52  ;;  %v6281_v4 = vsel %vm3023_vm13, %v2883_v56, 0.0  ;;  %v2471_v3 = vmul.f32 %v2439_v49, %v6131_v57  ;;  %vm3062_vm14 = vcmp.ne.s32.totalorder %v2942_v29, 7  ;;  %v6830_v49 = vld [vmem:[#allocation20_spill] sm:$0xff] }
 0x1fd   : > { %v3258_v55 = vmul.f32 %v3250_v7, %v6264_v25  ;;  %v3259_v2 = vmul.f32 %v3251_v17, %v6267_v60  ;;  %v6287_v21 = vadd.f32 %v6110_v48, %v3237_v16  ;;  %vm3063_vm15 = vcmp.ne.s32.totalorder %v2949_v0, 7 }
 0x1fe   : > { %v3260_v39 = vmul.f32 %v3252_v26, %v6270_v52  ;;  %v3092_v8 = vsel %vm3062_vm14, %v2892_v61, 0.0  ;;  %v2487_v27 = vpack.c.bf16 %v2471_v3, %v2470_v35  ;;  %v3093_v34 = vsel %vm3063_vm15, %v2893_v30, 0.0 }
 0x1ff   : > { %v3266_v28 = vmul.f32 0.044715, %v3258_v55  ;;  %v3267_v58 = vmul.f32 0.044715, %v3259_v2  ;;  %v3253_v57 = vmul.f32 %v6287_v21, %v6287_v21  ;;  %v3108_v13 = vmul.f32 %v5968_v46, %v6237_v47 }
 0x200   : > { %v3268_v1 = vmul.f32 0.044715, %v3260_v39  ;;  %v3109_v12 = vmul.f32 %v5968_v46, %v3101_v42  ;;  %3939 = vmatmul.mubr.msk.bf16.gmra.mxu1 %vm304_vm0, %v2487_v27  ;;  %v3110_v10 = vmul.f32 %v5968_v46, %v3102_v33  ;;  %v3117_v53 = vmul.f32 %v5883_v54, %v6146_v50 }
 0x201   : > { %v3274_v44 = vadd.f32 %v3266_v28, %v6264_v25  ;;  %v3275_v40 = vadd.f32 %v3267_v58, %v6267_v60  ;;  %v3261_v24 = vmul.f32 %v3253_v57, %v6287_v21  ;;  %v3118_v62 = vmul.f32 %v5883_v54, %v6237_v47 }
 0x202   : > { %v3276_v20 = vadd.f32 %v3268_v1, %v6270_v52  ;;  %v3119_v19 = vmul.f32 %v5883_v54, %v3101_v42  ;;  %v6307_v6 = vmul.f32 %v5883_v54, %v3102_v33  ;;  %v3125_v0 = vadd.f32 %v3117_v53, %v3108_v13 }
 0x203   : > { %v3282_v5 = vmul.f32 0.7978846, %v3274_v44  ;;  %v3283_v29 = vmul.f32 0.7978846, %v3275_v40  ;;  %v3269_v59 = vmul.f32 0.044715, %v3261_v24  ;;  %v3126_v45 = vadd.f32 %v3118_v62, %v3109_v12 }
 0x204   : > { %v3284_v36 = vmul.f32 0.7978846, %v3276_v20  ;;  %v3127_v56 = vadd.f32 %v3119_v19, %v3110_v10  ;;  %v3134_v50 = vmul.f32 %v5817_v11, %v6245_v15  ;;  %v3135_v43 = vmul.f32 %v5817_v11, %v6279_v23  ;;  %v2884_v62 = vld [vmem:[#allocation2 + $0x47] sm:$0xff] }
 0x205   : > { %4093 = vtanh.f32 %v3282_v5  ;;  %v6315_v47 = vmul.f32 %v5817_v11, %v6281_v4  ;;  %v3277_v54 = vadd.f32 %v3269_v59, %v6287_v21  ;;  %v3141_v35 = vadd.f32 %v6830_v49, %v3125_v0  ;;  %v2894_v19 = vld [vmem:[#allocation2 + $0x49] sm:$0xff]  ;;  %v2895_v0 = vld [vmem:[#allocation2 + $0x51] sm:$0xff] }
 0x206   : > { %4095 = vtanh.f32 %v3283_v29  ;;  %v3149_v7 = vmul.f32 %v5924_v63, %v6157_v32  ;;  %v3142_v17 = vadd.f32 %v3134_v50, %v3126_v45  ;;  %v3143_v61 = vadd.f32 %v3135_v43, %v3127_v56  ;;  %v6831_v5 = vld [vmem:[#allocation10_spill] sm:$0xff]  ;;  %v6832_v59 = vld [vmem:[#allocation11_spill] sm:$0xff] }
 0x207   : > { %4097 = vtanh.f32 %v3284_v36  ;;  %v3150_v16 = vmul.f32 %v5924_v63, %v6249_v14  ;;  %v3285_v26 = vmul.f32 0.7978846, %v3277_v54  ;;  %v3151_v30 = vmul.f32 %v5924_v63, %v3092_v8  ;;  %v3193_v49 = vld [vmem:[#allocation2 + $0x50] sm:$0xff]  ;;  %v3466_v43 = vld [vmem:[#allocation2 + $0x3] sm:$0xff] }
 0x208   : > { %v6325_v11 = vmul.f32 %v5924_v63, %v3093_v34  ;;  %v3157_v3 = vadd.f32 %v3149_v7, %v3141_v35  ;;  %v3165_v2 = vmul.f32 %v5989_v51, %v6245_v15  ;;  %v3166_v32 = vmul.f32 %v5989_v51, %v6279_v23  ;;  %v3103_v15 = vld [vmem:[#allocation2 + $0x48] sm:$0xff] }
 0x209   : > { %v3158_v55 = vadd.f32 %v3150_v16, %v3142_v17  ;;  %v3167_v39 = vmul.f32 %v5989_v51, %v6281_v4  ;;  %4099 = vtanh.f32 %v3285_v26  ;;  %v3159_v27 = vadd.f32 %v3151_v30, %v3143_v61 }
 0x20a   : > { %v3181_v28 = vmul.f32 %v6215_v22, %v6249_v14  ;;  %v3182_v58 = vmul.f32 %v6215_v22, %v3092_v8  ;;  %v3173_v57 = vadd.f32 %v3165_v2, %v3157_v3  ;;  %v3183_v13 = vmul.f32 %v6215_v22, %v3093_v34 }
 0x20b   : > { %v3174_v1 = vadd.f32 %v3166_v32, %v3158_v55  ;;  %v3198_v12 = vmul.f32 %v6012_v9, %v3101_v42  ;;  %v3199_v44 = vmul.f32 %v6012_v9, %v3102_v33  ;;  %v3214_v40 = vmul.f32 %v6065_v31, %v6279_v23  ;;  %v2885_v42 = vld [vmem:[#allocation2 + $0x4f] sm:$0xff] }
 0x20c   : > { %v3215_v10 = vmul.f32 %v6065_v31, %v6281_v4  ;;  %v3230_v53 = vmul.f32 %v6074_v37, %v3092_v8  ;;  %v3189_v14 = vadd.f32 %v3181_v28, %v3173_v57  ;;  %v3231_v20 = vmul.f32 %v6074_v37, %v3093_v34  ;;  %v6349_v4 = vpop.f32.mrf.mxu1 }
 0x20d   : > { %v3190_v24 = vadd.f32 %v3182_v58, %v3174_v1  ;;  %v2956_v29 = vand.u32 7, %v6831_v5  ;;  %v2963_v33 = vand.u32 7, %v6832_v59  ;;  %v3111_v36 = vmul.f32 %v5968_v46, %v3103_v15 }
 0x20e   : > { %v3175_v23 = vadd.f32 %v3167_v39, %v3159_v27  ;;  %v3200_v45 = vmul.f32 %v6012_v9, %v3103_v15  ;;  %v3206_v8 = vadd.f32 %v3198_v12, %v3189_v14  ;;  %v6366_v2 = vpop.f32.mrf.mxu1  ;;  %v3201_v58 = vmul.f32 %v6012_v9, %v3193_v49 }
 0x20f   : > { %v3207_v56 = vadd.f32 %v3199_v44, %v3190_v24  ;;  %vm3024_vm3 = vcmp.ne.s32.totalorder %v2956_v29, 0  ;;  %vm3064_vm4 = vcmp.ne.s32.totalorder %v2956_v29, 7  ;;  %vm6351_vm5 = vcmp.ne.s32.totalorder %v2963_v33, 0 }
 0x210   : > { %v3054_v50 = vsel %vm3024_vm3, %v2884_v62, 0.0  ;;  %vm6355_vm6 = vcmp.ne.s32.totalorder %v2963_v33, 7  ;;  %v3094_v54 = vsel %vm3064_vm4, %v2894_v19, 0.0  ;;  %v3222_v35 = vadd.f32 %v3214_v40, %v3206_v8  ;;  %v6379_v62 = vpop.f32.mrf.mxu1 }
 0x211   : > { %v3223_v7 = vadd.f32 %v3215_v10, %v3207_v56  ;;  %v3055_v17 = vsel %vm6351_vm5, %v2885_v42, 0.0  ;;  %v3095_v61 = vsel %vm6355_vm6, %v2895_v0, 0.0  ;;  %v3128_v26 = vadd.f32 %v6307_v6, %v3111_v36 }
 0x212   : > { %v4094_v16 = vpop.eup %4093  ;;  %v3168_v30 = vmul.f32 %v5989_v51, %v3054_v50  ;;  %v3184_v3 = vmul.f32 %v6215_v22, %v3094_v54  ;;  %v3191_v55 = vadd.f32 %v3183_v13, %v3175_v23  ;;  %v3238_v27 = vadd.f32 %v3230_v53, %v3222_v35  ;;  %v6392_v49 = vpop.f32.mrf.mxu1 }
 0x213   : > { %v4096_v32 = vpop.eup %4095  ;;  %v3298_v39 = vadd.f32 1.0, %v4094_v16  ;;  %v3239_v28 = vadd.f32 %v3231_v20, %v3223_v7  ;;  %v3144_v12 = vadd.f32 %v6315_v47, %v3128_v26  ;;  %v3216_v6 = vmul.f32 %v6065_v31, %v3054_v50  ;;  %v3467_v16 = vld [vmem:[#allocation2 + $0xb] sm:$0xff]  ;;  %v3468_v26 = vld [vmem:[#allocation2 + $0x13] sm:$0xff] }
 0x214   : > { %v4098_v57 = vpop.eup %4097  ;;  %v3299_v1 = vadd.f32 1.0, %v4096_v32  ;;  %v3208_v15 = vadd.f32 %v3200_v45, %v3191_v55  ;;  %v6372_v10 = vadd.f32 %v6110_v48, %v3238_v27  ;;  %v3217_v24 = vmul.f32 %v6065_v31, %v3055_v17  ;;  %v3469_v55 = vld [vmem:[#allocation2 + $0x5] sm:$0xff]  ;;  %v3470_v27 = vld [vmem:[#allocation2 + $0xd] sm:$0xff] }
 0x215   : > { %v3306_v44 = vmul.f32 0.5, %v3298_v39  ;;  %v3300_v40 = vadd.f32 1.0, %v4098_v57  ;;  %v6375_v13 = vadd.f32 %v6110_v48, %v3239_v28  ;;  %v3160_v53 = vadd.f32 %v6325_v11, %v3144_v12  ;;  %v3471_v28 = vld [vmem:[#allocation2 + $0x15] sm:$0xff]  ;;  %v3532_v57 = vld [vmem:[#allocation2 + $0x8] sm:$0xff] }
 0x216   : > { %v3307_v14 = vmul.f32 0.5, %v3299_v1  ;;  %v3224_v20 = vadd.f32 %v3216_v6, %v3208_v15  ;;  %v4100_v47 = vpop.eup %4099  ;;  %v3254_v29 = vmul.f32 %v6372_v10, %v6372_v10  ;;  %v3232_v11 = vmul.f32 %v6074_v37, %v3094_v54  ;;  %v6411_v1 = vpop.f32.mrf.mxu1 }
 0x217   : > { %v3314_v19 = vmul.f32 %v3306_v44, %v6264_v25  ;;  %v3308_v5 = vmul.f32 0.5, %v3300_v40  ;;  %v3255_v42 = vmul.f32 %v6375_v13, %v6375_v13  ;;  %v3301_v59 = vadd.f32 1.0, %v4100_v47  ;;  %v4136_v47 = vld [vmem:[%s6659_s5 + $0x18] sm:$0xff]  }
 0x218   : > { %v3315_v0 = vmul.f32 %v3307_v14, %v6267_v60  ;;  %v3176_v33 = vadd.f32 %v3168_v30, %v3160_v53  ;;  %v3262_v23 = vmul.f32 %v3254_v29, %v6372_v10  ;;  %v3233_v25 = vmul.f32 %v6074_v37, %v3095_v61  ;;  %v3533_v53 = vld [vmem:[#allocation2 + $0x10] sm:$0xff] }
 0x219   : > { %v3316_v36 = vmul.f32 %v3308_v5, %v6270_v52  ;;  %v3263_v45 = vmul.f32 %v3255_v42, %v6375_v13  ;;  %v3309_v56 = vmul.f32 0.5, %v3301_v59  ;;  %v3240_v50 = vadd.f32 %v3232_v11, %v3224_v20  ;;  %v6421_v20 = vld [vmem:[#allocation2 + $0xc] sm:$0xff]  ;;  %v6436_v11 = vpop.f32.mrf.mxu1 }
 0x21a   : > { %v3322_v8 = vpack.c.bf16 %v3315_v0, %v3314_v19  ;;  %v3192_v34 = vadd.f32 %v3184_v3, %v3176_v33  ;;  %v3270_v60 = vmul.f32 0.044715, %v3262_v23  ;;  %v3476_v7 = vand.u32 3, %v6790_v38 }
 0x21b   : > { %v3271_v35 = vmul.f32 0.044715, %v3263_v45  ;;  %v3483_v54 = vand.u32 3, %v6798_v18  ;;  %v3317_v52 = vmul.f32 %v3309_v56, %v6287_v21  ;;  %v6399_v61 = vadd.f32 %v6110_v48, %v3240_v50  ;;  %v6464_v3 = vpop.f32.mrf.mxu1 }
 0x21c   : > { %3962 = vmatprep.mubr.msk.bf16.mxu1 %vm304_vm0, %v3322_v8  ;;  %v3209_v17 = vadd.f32 %v3201_v58, %v3192_v34  ;;  %v6837_v30 = vand.u32 3, %v6799_v41  ;;  %v3278_v38 = vadd.f32 %v3270_v60, %v6372_v10  ;;  %vm3508_vm8 = vcmp.ne.s32.totalorder %v3476_v7, 0  ;;  %v4137_v41 = vld [vmem:[%s6657_s3 + $0x1] ss:$0 sm:$0xff]  ;;  %v4138_v34 = vld [vmem:[%s6657_s3] ss:$0 sm:$0xff] }
 0x21d   : > { %v3279_v18 = vadd.f32 %v3271_v35, %v6375_v13  ;;  %vm3509_vm9 = vcmp.ne.s32.totalorder %v3483_v54, 0  ;;  %v3323_v21 = vpack.c.bf16 %v3317_v52, %v3316_v36  ;;  %v3256_v39 = vmul.f32 %v6399_v61, %v6399_v61 }
 0x21e   : > { %vm6403_vm7 = vcmp.ne.s32.totalorder %v6837_v30, 0  ;;  %v3225_v32 = vadd.f32 %v3217_v24, %v3209_v17  ;;  %v3517_v58 = vsel %vm3508_vm8, %v3466_v43, 0.0  ;;  %v3286_v12 = vmul.f32 0.7978846, %v3278_v38  ;;  %v3536_v24 = vld [vmem:[#allocation2 + $0x4] sm:$0xff] }
 0x21f   : > { %v3287_v15 = vmul.f32 0.7978846, %v3279_v18  ;;  %v6413_v6 = vsel %vm3509_vm9, %v3467_v16, 0.0  ;;  %v6417_v44 = vsel %vm6403_vm7, %v3468_v26, 0.0  ;;  %3963 = vmatmul.mubr.msk.bf16.vlgmr.msra.gmra.mxu1 %vm304_vm0, %v3323_v21  ;;  %v3264_v14 = vmul.f32 %v3256_v39, %v6399_v61  ;;  %v4141_v39 = vld [vmem:[%s6659_s5 + $0x8] sm:$0xff]  }
 0x220   : > { %v3241_v40 = vadd.f32 %v3233_v25, %v3225_v32  ;;  %vm3520_vm10 = vcmp.ne.s32.totalorder %v3476_v7, 3  ;;  %vm3521_vm11 = vcmp.ne.s32.totalorder %v3483_v54, 3  ;;  %3979 = vmatpush3.bf16.msra.mxu1 %v4136_v47  ;;  %4101 = vtanh.f32 %v3286_v12  ;;  %v4140_v54 = vld [vmem:[%s6657_s3 + $0x2] ss:$0 sm:$0xff] }
 0x221   : > { %v6840_v19 = vmov %v6837_v30  ;;  %v3529_v5 = vsel %vm3520_vm10, %v3469_v55, 0.0  ;;  %v6428_v29 = vsel %vm3521_vm11, %v3470_v27, 0.0  ;;  %v6841_v42 = vmov 0.0  }
 0x222   : > { %vm3522_vm12 = vcmp.ne.s32.totalorder %v6840_v19, 3  ;;  %3980 = vmatprep.subr.bf16.mxu1 %v6841_v42  ;;  %4103 = vtanh.f32 %v3287_v15  ;;  %v6432_v0 = vadd.f32 %v6110_v48, %v3241_v40  ;;  %v3272_v59 = vmul.f32 0.044715, %v3264_v14  ;;  %v3581_v14 = vld [vmem:[#allocation2 + $0x14] sm:$0xff] }
 0x223   : > { %v6434_v33 = vsel %vm3522_vm12, %v3471_v28, 0.0  ;;  %v3534_v36 = vmul.f32 %v5968_v46, %v3532_v57  ;;  %v3535_v23 = vmul.f32 %v5968_v46, %v3533_v53  ;;  %v3538_v45 = vmul.f32 %v4137_v41, %v3536_v24  ;;  %v4139_v46 = vld [vmem:[%s6659_s5 + $0x10] sm:$0xff]   ;;  %v2619_v53 = vpop.f32.mrf.mxu1 }
 0x224   : > { %v3539_v25 = vmul.f32 %v4137_v41, %v6421_v20  ;;  %v3257_v8 = vmul.f32 %v6432_v0, %v6432_v0  ;;  %v3280_v56 = vadd.f32 %v3272_v59, %v6399_v61  ;;  %v3542_v50 = vmul.f32 %v4138_v34, %v3517_v58  ;;  %3981 = vmatpush3.bf16.msra.mxu1 %v4139_v46  ;;  %v6484_v41 = vld [vmem:[%s6660_s6] ss:$0 sm:$0xff] }
 0x225   : > { %v3543_v43 = vmul.f32 %v4138_v34, %v6413_v6  ;;  %v3540_v60 = vadd.f32 %v3538_v45, %v3534_v36  ;;  %v3546_v7 = vmul.f32 %v5924_v63, %v3529_v5  ;;  %v3547_v52 = vmul.f32 %v4140_v54, %v6428_v29  ;;  %3982 = vmatprep.subr.bf16.mxu1 %v6841_v42 }
 0x226   : > { %v3541_v35 = vadd.f32 %v3539_v25, %v3535_v23  ;;  %v3265_v17 = vmul.f32 %v3257_v8, %v6432_v0  ;;  %v3288_v16 = vmul.f32 0.7978846, %v3280_v56  ;;  %v3550_v26 = vmul.f32 %v5989_v51, %v3517_v58 }
 0x227   : > { %v3551_v30 = vmul.f32 %v5989_v51, %v6413_v6  ;;  %v3544_v38 = vadd.f32 %v3542_v50, %v3540_v60  ;;  %v3552_v18 = vmul.f32 %v5989_v51, %v6417_v44  ;;  %vm3556_vm13 = vcmask 1043456  }
 0x228   : > { %v3545_v63 = vadd.f32 %v3543_v43, %v3541_v35  ;;  %v3273_v55 = vmul.f32 0.044715, %v3265_v17  ;;  %4105 = vtanh.f32 %v3288_v16  ;;  %v3557_v21 = vrot.slane %v3550_v26, 4  ;;  %3983 = vmatpush3.bf16.msra.mxu1 %v4141_v39 }
 0x229   : > { %v3558_v32 = vrot.slane %v3551_v30, 4  ;;  %v3548_v27 = vadd.f32 %v3546_v7, %v3544_v38  ;;  %v3560_v58 = vrot.slane %v3552_v18, 4  ;;  %v3566_v57 = vmul.f32 %v6215_v22, %v3529_v5  ;;  %3984 = vmatprep.subr.bf16.mxu1 %v6841_v42 }
 0x22a   : > { %v3549_v28 = vadd.f32 %v3547_v52, %v3545_v63  ;;  %v3281_v12 = vadd.f32 %v3273_v55, %v6432_v0  ;;  %v3567_v15 = vmul.f32 %v6215_v22, %v6428_v29  ;;  %v3568_v40 = vmul.f32 %v6215_v22, %v6434_v33  ;;  %v4142_v22 = vld [vmem:[%s6659_s5] sm:$0xff]  }
 0x22b   : > { %v3559_v51 = vsel %vm3556_vm13, %v3557_v21, %v3558_v32  ;;  %v3561_v24 = vsel %vm3556_vm13, %v3558_v32, %v3560_v58  ;;  %v3572_v19 = vrot.slane %v3566_v57, 4  ;;  %v3582_v45 = vmul.f32 %v6012_v9, %v6421_v20 }
 0x22c   : > { %v3564_v47 = vadd.f32 %v3559_v51, %v3548_v27  ;;  %v3289_v5 = vmul.f32 0.7978846, %v3281_v12  ;;  %v3565_v59 = vadd.f32 %v3561_v24, %v3549_v28  ;;  %v3573_v36 = vrot.slane %v3567_v15, 4  ;;  %3985 = vmatpush3.bf16.msra.mxu1 %v4142_v22 }
 0x22d   : > { %v3575_v23 = vrot.slane %v3568_v40, 4  ;;  %v3583_v25 = vmul.f32 %v6012_v9, %v3581_v14  ;;  %v3586_v8 = vmul.f32 %v6065_v31, %v6413_v6  ;;  %v3587_v56 = vmul.f32 %v6065_v31, %v6417_v44  ;;  %v4102_v34 = vpop.eup %4101  ;;  %v3920_v9 = vpop.f32.mrf.mxu1 }
 0x22e   : > { %4107 = vtanh.f32 %v3289_v5  ;;  %v3574_v50 = vsel %vm3556_vm13, %v3572_v19, %v3573_v36  ;;  %v3590_v46 = vmul.f32 %v6074_v37, %v6428_v29  ;;  %v3302_v20 = vadd.f32 1.0, %v4102_v34 }
 0x22f   : > { %v3576_v43 = vsel %vm3556_vm13, %v3573_v36, %v3575_v23  ;;  %v4104_v6 = vpop.eup %4103  ;;  %v3579_v31 = vadd.f32 %v3574_v50, %v3564_v47  ;;  %v2609_v60 = vadd.f32 %v6349_v4, %v6484_v41  ;;  %v2601_v29 = vadd.f32 %v6484_v41, %v6366_v2  ;;  %v2632_v52 = vpop.f32.mrf.mxu1 }
 0x230   : > { %v3580_v44 = vadd.f32 %v3576_v43, %v3565_v59  ;;  %v3303_v35 = vadd.f32 1.0, %v4104_v6  ;;  %v2612_v7 = vadd.f32 %v6379_v62, %v6484_v41  ;;  %v2604_v54 = vadd.f32 %v6484_v41, %v6392_v49 }
 0x231   : > { %v3310_v17 = vmul.f32 0.5, %v3302_v20  ;;  %v3584_v16 = vadd.f32 %v3582_v45, %v3579_v31  ;;  %2729 = vst.msk [vmem:[%s6503_s21 + $0x10] sm:$0xff] %vm441_vm1, %v2609_v60  ;;  %v2625_v4 = vadd.f32 %v6411_v1, %v6484_v41  ;;  %2727 = vst.msk [vmem:[%s6503_s21] sm:$0xff] %vm441_vm1, %v2601_v29  ;;  %v2617_v2 = vadd.f32 %v6484_v41, %v6436_v11  ;;  %v3921_v38 = vpop.f32.mrf.mxu1 }
 0x232   : > { %v3585_v26 = vadd.f32 %v3583_v25, %v3580_v44  ;;  %v3311_v30 = vmul.f32 0.5, %v3303_v35  ;;  %2730 = vst.msk [vmem:[%s6503_s21 + $0x18] sm:$0xff] %vm441_vm1, %v2612_v7  ;;  %2728 = vst.msk [vmem:[%s6503_s21 + $0x8] sm:$0xff] %vm441_vm1, %v2604_v54  ;;  %v2628_v62 = vadd.f32 %v6464_v3, %v6484_v41  ;;  %v2620_v49 = vadd.f32 %v6484_v41, %v2619_v53 }
 0x233   : > { %v3588_v1 = vadd.f32 %v3586_v8, %v3584_v16  ;;  %v3591_v18 = vmul.f32 %v6074_v37, %v6434_v33  ;;  %2733 = vst.msk [vmem:[%s6503_s21 + $0x30] sm:$0xff] %vm441_vm1, %v2625_v4  ;;  %v2641_v55 = vadd.f32 %v3920_v9, %v6484_v41  ;;  %v3318_v21 = vmul.f32 %v3310_v17, %v6372_v10  ;;  %v2635_v33 = vpop.f32.mrf.mxu1 }
 0x234   : > { %v3589_v63 = vadd.f32 %v3587_v56, %v3585_v26  ;;  %v3319_v11 = vmul.f32 %v3311_v30, %v6375_v13  ;;  %2731 = vst.msk [vmem:[%s6503_s21 + $0x20] sm:$0xff] %vm441_vm1, %v2617_v2  ;;  %2734 = vst.msk [vmem:[%s6503_s21 + $0x38] sm:$0xff] %vm441_vm1, %v2628_v62  ;;  %v2633_v3 = vadd.f32 %v6484_v41, %v2632_v52 }
 0x235   : > { %2732 = vst.msk [vmem:[%s6503_s21 + $0x28] sm:$0xff] %vm441_vm1, %v2620_v49  ;;  %v2644_v37 = vadd.f32 %v3921_v38, %v6484_v41  ;;  %v4106_v32 = vpop.eup %4105  ;;  %v3592_v39 = vadd.f32 %v3590_v46, %v3588_v1  ;;  %2737 = vst.msk [vmem:[%s6503_s21 + $0x50] sm:$0xff] %vm441_vm1, %v2641_v55  ;;  %v2636_v10 = vadd.f32 %v6484_v41, %v2635_v33 }
 0x236   : > { %v3593_v27 = vadd.f32 %v3591_v18, %v3589_v63  ;;  %v3324_v13 = vpack.c.bf16 %v3319_v11, %v3318_v21  ;;  %v3304_v28 = vadd.f32 1.0, %v4106_v32  ;;  %2735 = vst.msk [vmem:[%s6503_s21 + $0x40] sm:$0xff] %vm441_vm1, %v2633_v3 }
 0x237   : > { %2738 = vst.msk [vmem:[%s6503_s21 + $0x58] sm:$0xff] %vm441_vm1, %v2644_v37  ;;  %v3594_v58 = vadd.f32 %v6110_v48, %v3592_v39  ;;  %2736 = vst.msk [vmem:[%s6503_s21 + $0x48] sm:$0xff] %vm441_vm1, %v2636_v10 }
 0x238   : > { %v3595_v57 = vadd.f32 %v6110_v48, %v3593_v27  ;;  %3966 = vmatprep.mubr.msk.bf16.mxu1 %vm304_vm0, %v3324_v13  ;;  %v3312_v15 = vmul.f32 0.5, %v3304_v28 }
 0x239   : > { %v3596_v12 = vmul.f32 %v3594_v58, %v3594_v58 }
 0x23a   : > { %v3597_v51 = vmul.f32 %v3595_v57, %v3595_v57  ;;  %v3320_v59 = vmul.f32 %v3312_v15, %v6399_v61 }
 0x23b   : > { %v4108_v40 = vpop.eup %4107  ;;  %v3598_v14 = vmul.f32 %v3596_v12, %v3594_v58 }
 0x23c   : > { %v3599_v53 = vmul.f32 %v3597_v51, %v3595_v57  ;;  %v3305_v24 = vadd.f32 1.0, %v4108_v40 }
 0x23d   : > { %v3600_v47 = vmul.f32 0.044715, %v3598_v14 }
 0x23e   : > { %v3601_v19 = vmul.f32 0.044715, %v3599_v53  ;;  %v3313_v5 = vmul.f32 0.5, %v3305_v24 }
 0x23f   : > { %v3602_v36 = vadd.f32 %v3600_v47, %v3594_v58 }
 0x240   : > { %v3603_v48 = vadd.f32 %v3601_v19, %v3595_v57  ;;  %v3321_v23 = vmul.f32 %v3313_v5, %v6432_v0 }
 0x241   : > { %v3604_v22 = vmul.f32 0.7978846, %v3602_v36 }
 0x242   : > { %v3605_v45 = vmul.f32 0.7978846, %v3603_v48  ;;  %v3325_v25 = vpack.c.bf16 %v3321_v23, %v3320_v59 }
 0x243   : > { %4109 = vtanh.f32 %v3604_v22 }
 0x244   : > { %3967 = vmatmul.mubr.msk.bf16.gmra.mxu1 %vm304_vm0, %v3325_v25  ;;  %4111 = vtanh.f32 %v3605_v45 }
 0x245   : > { %3986 = vmatprep.mubr.msk.bf16.mxu1 %vm4152_vm2, %v6841_v42 }
 0x247   : > { %v3924_v8 = vpop.f32.mrf.mxu1 }
 0x248   : > { %v2657_v61 = vadd.f32 %v3924_v8, %v6484_v41 }
 0x249   : > { %v2648_v56 = vpop.f32.mrf.mxu1 }
 0x24a   : > { %2741 = vst.msk [vmem:[%s6503_s21 + $0x70] sm:$0xff] %vm441_vm1, %v2657_v61  ;;  %v2649_v0 = vadd.f32 %v6484_v41, %v2648_v56 }
 0x24b   : > { %v3925_v34 = vpop.f32.mrf.mxu1 }
 0x24c   : > { %2739 = vst.msk [vmem:[%s6503_s21 + $0x60] sm:$0xff] %vm441_vm1, %v2649_v0  ;;  %v2660_v50 = vadd.f32 %v3925_v34, %v6484_v41 }
 0x24d   : > { %v2651_v43 = vpop.f32.mrf.mxu1 }
 0x24e   : > { %2742 = vst.msk [vmem:[%s6503_s21 + $0x78] sm:$0xff] %vm441_vm1, %v2660_v50  ;;  %v2652_v42 = vadd.f32 %v6484_v41, %v2651_v43 }
 0x250   : > { %v4110_v46 = vpop.eup %4109  ;;  %2740 = vst.msk [vmem:[%s6503_s21 + $0x68] sm:$0xff] %vm441_vm1, %v2652_v42 }
 0x251   : > { %v4112_v9 = vpop.eup %4111  ;;  %v3608_v6 = vadd.f32 1.0, %v4110_v46 }
 0x252   : > { %v3609_v20 = vadd.f32 1.0, %v4112_v9 }
 0x253   : > { %v3610_v31 = vmul.f32 0.5, %v3608_v6 }
 0x254   : > { %v3611_v44 = vmul.f32 0.5, %v3609_v20 }
 0x255   : > { %v3612_v60 = vmul.f32 %v3610_v31, %v3594_v58 }
 0x256   : > { %v3613_v35 = vmul.f32 %v3611_v44, %v3595_v57 }
 0x258   : > { %v3614_v29 = vpack.c.bf16 %v3613_v35, %v3612_v60 }
 0x25a   : > { %3987 = vmatmul.mubr.msk.bf16.vlgmr.msra.gmra.mxu1 %vm304_vm0, %v3614_v29 }
 0x267   : > { %v3928_v7 = vpop.f32.mrf.mxu1 }
 0x268   : > { %v2673_v54 = vadd.f32 %v3928_v7, %v6484_v41 }
 0x269   : > { %v2664_v52 = vpop.f32.mrf.mxu1 }
 0x26a   : > { %2745 = vst.msk [vmem:[%s6503_s21 + $0x90] sm:$0xff] %vm441_vm1, %v2673_v54  ;;  %v2665_v17 = vadd.f32 %v6484_v41, %v2664_v52 }
 0x26b   : > { %v3929_v16 = vpop.f32.mrf.mxu1 }
 0x26c   : > { %2743 = vst.msk [vmem:[%s6503_s21 + $0x80] sm:$0xff] %vm441_vm1, %v2665_v17  ;;  %v2676_v26 = vadd.f32 %v3929_v16, %v6484_v41 }
 0x26d   : > { %v2667_v4 = vpop.f32.mrf.mxu1 }
 0x26e   : > { %2746 = vst.msk [vmem:[%s6503_s21 + $0x98] sm:$0xff] %vm441_vm1, %v2676_v26  ;;  %v2668_v30 = vadd.f32 %v6484_v41, %v2667_v4 }
 0x270   : > { %2744 = vst.msk [vmem:[%s6503_s21 + $0x88] sm:$0xff] %vm441_vm1, %v2668_v30 }
 0x287   : > { %v3932_v2 = vpop.f32.mrf.mxu1 }
 0x288   : > { %v2689_v62 = vadd.f32 %v3932_v2, %v6484_v41 }
 0x289   : > { %v2680_v49 = vpop.f32.mrf.mxu1 }
 0x28a   : > { %2749 = vst.msk [vmem:[%s6503_s21 + $0xb0] sm:$0xff] %vm441_vm1, %v2689_v62  ;;  %v2681_v38 = vadd.f32 %v6484_v41, %v2680_v49 }
 0x28b   : > { %v3933_v1 = vpop.f32.mrf.mxu1 }
 0x28c   : > { %2747 = vst.msk [vmem:[%s6503_s21 + $0xa0] sm:$0xff] %vm441_vm1, %v2681_v38  ;;  %v2692_v63 = vadd.f32 %v3933_v1, %v6484_v41 }
 0x28d   : > { %v2683_v18 = vpop.f32.mrf.mxu1 }
 0x28e   : > { %2750 = vst.msk [vmem:[%s6503_s21 + $0xb8] sm:$0xff] %vm441_vm1, %v2692_v63  ;;  %v2684_v55 = vadd.f32 %v6484_v41, %v2683_v18 }
 0x290   : > { %2748 = vst.msk [vmem:[%s6503_s21 + $0xa8] sm:$0xff] %vm441_vm1, %v2684_v55 }
 0x2a6   : > { %v3936_v21 = vpop.f32.mrf.mxu1 }
 0x2a7   : > { %v2705_v11 = vadd.f32 %v3936_v21, %v6484_v41 }
 0x2a8   : > { %v2696_v3 = vpop.f32.mrf.mxu1 }
 0x2a9   : > { %2753 = vst.msk [vmem:[%s6503_s21 + $0xd0] sm:$0xff] %vm441_vm1, %v2705_v11  ;;  %v2697_v37 = vadd.f32 %v6484_v41, %v2696_v3 }
 0x2aa   : > { %v3937_v33 = vpop.f32.mrf.mxu1 }
 0x2ab   : > { %2751 = vst.msk [vmem:[%s6503_s21 + $0xc0] sm:$0xff] %vm441_vm1, %v2697_v37  ;;  %v2708_v32 = vadd.f32 %v3937_v33, %v6484_v41 }
 0x2ac   : > { %v2699_v39 = vpop.f32.mrf.mxu1 }
 0x2ad   : > { %2754 = vst.msk [vmem:[%s6503_s21 + $0xd8] sm:$0xff] %vm441_vm1, %v2708_v32  ;;  %v2700_v27 = vadd.f32 %v6484_v41, %v2699_v39 }
 0x2af   : > { %2752 = vst.msk [vmem:[%s6503_s21 + $0xc8] sm:$0xff] %vm441_vm1, %v2700_v27 }
 0x2c0   : > { %v3940_v10 = vpop.f32.mrf.mxu1 }
 0x2c1   : > { %v2721_v13 = vadd.f32 %v3940_v10, %v6484_v41 }
 0x2c2   : > { %v2712_v28 = vpop.f32.mrf.mxu1 }
 0x2c3   : > { %2757 = vst.msk [vmem:[%s6503_s21 + $0xf0] sm:$0xff] %vm441_vm1, %v2721_v13  ;;  %v2713_v58 = vadd.f32 %v6484_v41, %v2712_v28 }
 0x2c4   : > { %v3941_v57 = vpop.f32.mrf.mxu1 }
 0x2c5   : > { %2755 = vst.msk [vmem:[%s6503_s21 + $0xe0] sm:$0xff] %vm441_vm1, %v2713_v58  ;;  %v2724_v12 = vadd.f32 %v3941_v57, %v6484_v41 }
 0x2c6   : > { %v2715_v51 = vpop.f32.mrf.mxu1 }
 0x2c7   : > { %2758 = vst.msk [vmem:[%s6503_s21 + $0xf8] sm:$0xff] %vm441_vm1, %v2724_v12  ;;  %v2716_v15 = vadd.f32 %v6484_v41, %v2715_v51 }
 0x2c9   : > { %2756 = vst.msk [vmem:[%s6503_s21 + $0xe8] sm:$0xff] %vm441_vm1, %v2716_v15 }
 0x2df   : > { %v3964_v40 = vpop.f32.mrf.mxu1 }
 0x2e0   : > { %v3381_v14 = vadd.f32 %v3964_v40, %v6484_v41 }
 0x2e1   : > { %v3372_v53 = vpop.f32.mrf.mxu1 }
 0x2e2   : > { %3405 = vst.msk [vmem:[%s6503_s21 + $0x110] sm:$0xff] %vm441_vm1, %v3381_v14  ;;  %v3373_v24 = vadd.f32 %v6484_v41, %v3372_v53 }
 0x2e3   : > { %v3965_v47 = vpop.f32.mrf.mxu1 }
 0x2e4   : > { %3403 = vst.msk [vmem:[%s6503_s21 + $0x100] sm:$0xff] %vm441_vm1, %v3373_v24  ;;  %v3384_v19 = vadd.f32 %v3965_v47, %v6484_v41 }
 0x2e5   : > { %v3375_v5 = vpop.f32.mrf.mxu1 }
 0x2e6   : > { %3406 = vst.msk [vmem:[%s6503_s21 + $0x118] sm:$0xff] %vm441_vm1, %v3384_v19  ;;  %v3376_v59 = vadd.f32 %v6484_v41, %v3375_v5 }
 0x2e8   : > { %3404 = vst.msk [vmem:[%s6503_s21 + $0x108] sm:$0xff] %vm441_vm1, %v3376_v59 }
 0x304   : > { %v3968_v36 = vpop.f32.mrf.mxu1 }
 0x305   : > { %v3397_v48 = vadd.f32 %v3968_v36, %v6484_v41 }
 0x306   : > { %v3388_v23 = vpop.f32.mrf.mxu1 }
 0x307   : > { %3409 = vst.msk [vmem:[%s6503_s21 + $0x130] sm:$0xff] %vm441_vm1, %v3397_v48  ;;  %v3389_v22 = vadd.f32 %v6484_v41, %v3388_v23 }
 0x308   : > { %v3969_v45 = vpop.f32.mrf.mxu1 }
 0x309   : > { %3407 = vst.msk [vmem:[%s6503_s21 + $0x120] sm:$0xff] %vm441_vm1, %v3389_v22  ;;  %v3400_v25 = vadd.f32 %v3969_v45, %v6484_v41 }
 0x30a   : > { %v3391_v8 = vpop.f32.mrf.mxu1 }
 0x30b   : > { %3410 = vst.msk [vmem:[%s6503_s21 + $0x138] sm:$0xff] %vm441_vm1, %v3400_v25  ;;  %v3392_v61 = vadd.f32 %v6484_v41, %v3391_v8 }
 0x30d   : > { %3408 = vst.msk [vmem:[%s6503_s21 + $0x128] sm:$0xff] %vm441_vm1, %v3392_v61 }
 0x31a   : > { %v3652_v56 = vpop.f32.mrf.mxu1 }
 0x31b   : > { %v3653_v0 = vadd.f32 %v6484_v41, %v3652_v56 }
 0x31c   : > { %v3988_v34 = vpop.f32.mrf.mxu1 }
 0x31d   : > { %3659 = vst.msk [vmem:[%s6503_s21 + $0x140] sm:$0xff] %vm441_vm1, %v3653_v0 }
 0x31e   : > { %v3655_v50 = vpop.f32.mrf.mxu1 }
 0x31f   : > { %v3656_v43 = vadd.f32 %v6484_v41, %v3655_v50 }
 0x320   : > { %v3989_v46 = vpop.f32.mrf.mxu1 }
 0x321   : > { %3660 = vst.msk [vmem:[%s6503_s21 + $0x148] sm:$0xff] %vm441_vm1, %v3656_v43 }
 0x322 PF: > { %s17_s24 = sadd.s32 1, %s4149_s24  }
 0x323   : > { %p14_p4 = scmp.ge.s32.totalorder %s17_s24, 4  }
 0x325   :  { %16 = sbr.rel (!%p14_p4) target bundleno = 1 (0x1), region = 78 }

</bundles_post_ra>
